<compile_context>
chip_gen: v5e
topology: v5e:2x2
jax: 0.10.0
libtpu: 0.0.40
codegen_flags: <defaults>
</compile_context>

<pallas_src>
import functools

import jax
import jax.numpy as jnp
from jax.experimental import pallas as pl
from jax.experimental.pallas import tpu as pltpu


# ----------------------------------------------------------------------------
# Fused backbone stand-in + nn.Linear(1000, n_out)
# ----------------------------------------------------------------------------
def _backbone_fc_kernel(x_ref, wbb_ref, bbb_ref, wfc_ref, bfc_ref, o_ref, h_ref):
    # hidden = relu(x @ w_bb + b_bb)   (f32 accumulation on the MXU)
    xb = x_ref[...].astype(jnp.bfloat16)
    h = jnp.dot(xb, wbb_ref[...], preferred_element_type=jnp.float32)
    h = jnp.maximum(h + bbb_ref[...], 0.0)
    # hidden lives only in VMEM (bf16 so it feeds the second MXU pass directly)
    h_ref[...] = h.astype(jnp.bfloat16)
    # out = hidden @ w_fc + b_fc
    out = jnp.dot(h_ref[...], wfc_ref[...], preferred_element_type=jnp.float32)
    o_ref[...] = (out + bfc_ref[...]).astype(o_ref.dtype)


def backbone_fc(x, w_bb, b_bb, w_fc, b_fc):
    """x: (M, K) f32, w_bb: (K, Hpad) bf16, b_bb: (1, Hpad) f32,
    w_fc: (Hpad, N) bf16 (rows >=1000 are zero), b_fc: (1, N) f32 -> (M, N) f32."""
    M, K = x.shape
    Hp = w_bb.shape[1]
    N = w_fc.shape[1]
    tm = 8 if (M % 8 == 0 and M > 8) else M          # parallel grid over M (v7x megacore)
    grid = (M // tm,)
    flops = 2 * M * K * Hp + 2 * M * Hp * N
    bytes_accessed = (x.size * 4 + w_bb.size * 2 + w_fc.size * 2
                      + b_bb.size * 4 + b_fc.size * 4 + M * N * 4)
    return pl.pallas_call(
        _backbone_fc_kernel,
        out_shape=jax.ShapeDtypeStruct((M, N), jnp.float32),
        grid=grid,
        in_specs=[
            pl.BlockSpec((tm, K), lambda i: (i, 0)),
            pl.BlockSpec((K, Hp), lambda i: (0, 0)),
            pl.BlockSpec((1, Hp), lambda i: (0, 0)),
            pl.BlockSpec((Hp, N), lambda i: (0, 0)),
            pl.BlockSpec((1, N), lambda i: (0, 0)),
        ],
        out_specs=pl.BlockSpec((tm, N), lambda i: (i, 0)),
        scratch_shapes=[pltpu.VMEM((tm, Hp), jnp.bfloat16)],
        compiler_params=pltpu.CompilerParams(dimension_semantics=("parallel",)),
        cost_estimate=pl.CostEstimate(flops=flops, transcendentals=0,
                                      bytes_accessed=bytes_accessed),
    )(x, w_bb, b_bb, w_fc, b_fc)
    # TODO(synk): if the real ResNet-18 backbone (large in_feat) replaces this
    # linear stand-in, this whole-weight-in-VMEM dense must gain (tm,tk,tn)
    # tiling with a K-reduction grid axis to fit v7x's 64 MiB VMEM.


# ----------------------------------------------------------------------------
# Fused frame5to1 + emb2word (3 x stride-2 conv) + AdaptiveAvgPool1d(1)
# ----------------------------------------------------------------------------
def _conv_block(src_ref, w_ref, b_ref, k_taps, stride, t_out, relu):
    # Tap-unrolled valid Conv1d: gather the strided input rows for each tap
    # (only the rows that contribute to the strided output), concatenate along
    # the lane axis, and run a single (t_out, K*C) @ (K*C, C) MXU matmul.
    cols = []
    for k in range(k_taps):
        if stride == 1:
            cols.append(src_ref[pl.ds(k, t_out), :])
        else:
            cols.append(src_ref[pl.ds(k, t_out, stride=stride), :])
    xu = jnp.concatenate(cols, axis=-1).astype(jnp.bfloat16)
    acc = jnp.dot(xu, w_ref[...], preferred_element_type=jnp.float32)
    acc = acc + b_ref[...]
    if relu:
        acc = jnp.maximum(acc, 0.0)
    return acc


def _lip_head_kernel(x_ref, w5_ref, b5_ref, w1_ref, b1_ref, w2_ref, b2_ref,
                     w3_ref, b3_ref, o_ref, h1_ref, h2_ref, h3_ref,
                     *, stride, t_lens):
    t1, t2, t3, t4 = t_lens
    # frame5to1: Conv1d(k=5, stride=stride), no activation
    h1_ref[...] = _conv_block(x_ref, w5_ref, b5_ref, 5, stride, t1, relu=False)
    # emb2word: Conv1d(k=3, s=2)+ReLU, Conv1d(k=3, s=2)+ReLU, Conv1d(k=3, s=2)
    h2_ref[...] = _conv_block(h1_ref, w1_ref, b1_ref, 3, 2, t2, relu=True)
    h3_ref[...] = _conv_block(h2_ref, w2_ref, b2_ref, 3, 2, t3, relu=True)
    h4 = _conv_block(h3_ref, w3_ref, b3_ref, 3, 2, t4, relu=False)   # (t4, C) f32
    # AdaptiveAvgPool1d(1) == mean over time
    o_ref[...] = jnp.mean(h4, axis=0, keepdims=True).astype(o_ref.dtype)


def lip_head(x, w5, b5, w1, b1, w2, b2, w3, b3, *, stride):
    """x: (B, T, C) f32; conv weights tap-unrolled (K*C, C) bf16; biases (1, C) f32
    -> (B, C) f32 (pooled word embedding)."""
    B, T, C = x.shape
    t1 = (T - 5) // stride + 1
    t2 = (t1 - 3) // 2 + 1
    t3 = (t2 - 3) // 2 + 1
    t4 = (t3 - 3) // 2 + 1
    if t4 < 1:
        raise ValueError("temporal length too short for the conv stack")
    flops = 2 * B * C * C * (5 * t1 + 3 * (t2 + t3 + t4))
    bytes_accessed = (x.size * 4 + (w5.size + w1.size + w2.size + w3.size) * 2
                      + (b5.size + b1.size + b2.size + b3.size) * 4 + B * C * 4)
    kernel = functools.partial(_lip_head_kernel, stride=stride,
                               t_lens=(t1, t2, t3, t4))
    return pl.pallas_call(
        kernel,
        out_shape=jax.ShapeDtypeStruct((B, C), jnp.float32),
        grid=(B,),
        in_specs=[
            pl.BlockSpec((None, T, C), lambda b: (b, 0, 0)),   # kernel sees (T, C)
            pl.BlockSpec((5 * C, C), lambda b: (0, 0)),
            pl.BlockSpec((1, C), lambda b: (0, 0)),
            pl.BlockSpec((3 * C, C), lambda b: (0, 0)),
            pl.BlockSpec((1, C), lambda b: (0, 0)),
            pl.BlockSpec((3 * C, C), lambda b: (0, 0)),
            pl.BlockSpec((1, C), lambda b: (0, 0)),
            pl.BlockSpec((3 * C, C), lambda b: (0, 0)),
            pl.BlockSpec((1, C), lambda b: (0, 0)),
        ],
        out_specs=pl.BlockSpec((1, C), lambda b: (b, 0)),
        scratch_shapes=[
            pltpu.VMEM((t1, C), jnp.float32),
            pltpu.VMEM((t2, C), jnp.float32),
            pltpu.VMEM((t3, C), jnp.float32),
        ],
        compiler_params=pltpu.CompilerParams(dimension_semantics=("parallel",)),
        cost_estimate=pl.CostEstimate(flops=flops, transcendentals=0,
                                      bytes_accessed=bytes_accessed),
    )(x, w5, b5, w1, b1, w2, b2, w3, b3)


# ----------------------------------------------------------------------------
# ResLip module (deterministic synthetic parameters)
# ----------------------------------------------------------------------------
class ResLipPallas:
    def __init__(self, n_out=128, stride=1, img_shape=(3, 16, 16), key=None):
        self.n_out = n_out
        self.stride = stride
        c, h, w = img_shape
        in_feat = c * h * w
        key = jax.random.PRNGKey(0) if key is None else key
        ks = jax.random.split(key, 12)

        def uni(k, shape, fan_in):
            bound = 1.0 / jnp.sqrt(jnp.float32(fan_in))
            return jax.random.uniform(k, shape, jnp.float32, -bound, bound)

        hid, hid_pad = 1000, 1024   # pad hidden to a multiple of 128 lanes

        # TODO(synk): the pretrained torchvision ResNet-18 backbone cannot be
        # reproduced without a checkpoint; it is replaced by a deterministic
        # linear feature extractor exposing the same 1000-d interface.
        w_bb = uni(ks[0], (in_feat, hid), in_feat)
        b_bb = uni(ks[1], (1, hid), in_feat)
        w_fc = uni(ks[2], (hid, n_out), hid)
        # Zero-pad 1000 -> 1024.  Padded w_fc rows are exactly zero, so the 24
        # extra (ReLU'd) hidden features contribute nothing to the output.
        self.w_bb = jnp.pad(w_bb, ((0, 0), (0, hid_pad - hid))).astype(jnp.bfloat16)
        self.b_bb = jnp.pad(b_bb, ((0, 0), (0, hid_pad - hid)))
        self.w_fc = jnp.pad(w_fc, ((0, hid_pad - hid), (0, 0))).astype(jnp.bfloat16)
        self.b_fc = uni(ks[3], (1, n_out), hid)

        def conv_w(k, ktaps):
            # torch Conv1d weight (Cout, Cin, K), stored transposed (K, Cin, Cout)
            # and tap-unrolled to (K*Cin, Cout) for a single matmul per conv.
            wk = uni(k, (ktaps, n_out, n_out), n_out * ktaps)
            return wk.reshape(ktaps * n_out, n_out).astype(jnp.bfloat16)

        # frame5to1: Conv1d(n_out, n_out, k=5, stride=stride, padding=0)
        self.w_f5 = conv_w(ks[4], 5)
        self.b_f5 = uni(ks[5], (1, n_out), n_out * 5)
        # emb2word: 3 x Conv1d(n_out, n_out, k=3, stride=2)
        self.w_c1 = conv_w(ks[6], 3)
        self.b_c1 = uni(ks[7], (1, n_out), n_out * 3)
        self.w_c2 = conv_w(ks[8], 3)
        self.b_c2 = uni(ks[9], (1, n_out), n_out * 3)
        self.w_c3 = conv_w(ks[10], 3)
        self.b_c3 = uni(ks[11], (1, n_out), n_out * 3)

    def __call__(self, x):
        # x: (d0, d1, C, H, W)
        d0, d1 = x.shape[:2]
        frames = x.reshape(d0 * d1, -1)                              # (d0*d1, C*H*W)
        lip_emb = backbone_fc(frames, self.w_bb, self.b_bb,
                              self.w_fc, self.b_fc)                  # (d0*d1, n_out)
        lip_emb = lip_emb.reshape(d0, d1, self.n_out)                # (B, T, C)
        word_emb = lip_head(lip_emb,
                            self.w_f5, self.b_f5,
                            self.w_c1, self.b_c1,
                            self.w_c2, self.b_c2,
                            self.w_c3, self.b_c3,
                            stride=self.stride)                      # (B, n_out)
        return jnp.squeeze(word_emb)                                 # .squeeze()


# ----------------------------------------------------------------------------
if __name__ == "__main__":
    # d0=2 videos, d1=20 frames (>=19 so all valid convs are non-empty),
    # 3x16x16 frames, n_out=128.
    d0, d1, C, H, W = 2, 20, 3, 16, 16
    n_out = 128

    key = jax.random.PRNGKey(0)
    k_x, k_p = jax.random.split(key)
    x = jax.random.normal(k_x, (d0, d1, C, H, W), dtype=jnp.float32)

    model = ResLipPallas(n_out=n_out, stride=1, img_shape=(C, H, W), key=k_p)
    out = model(x)
    out = jax.block_until_ready(out)

    assert out.shape == (d0, n_out), out.shape
    assert bool(jnp.all(jnp.isfinite(out)))
    print("KERNEL_OK")
</pallas_src>

<mosaic_0001>
module attributes {stable_mosaic.version = 11 : i64} {
  func.func @_backbone_fc_kernel(%arg0: i32, %arg1: memref<8x768xf32, #tpu.memory_space<vmem>>, %arg2: memref<768x1024xbf16, #tpu.memory_space<vmem>>, %arg3: memref<1x1024xf32, #tpu.memory_space<vmem>>, %arg4: memref<1024x128xbf16, #tpu.memory_space<vmem>>, %arg5: memref<1x128xf32, #tpu.memory_space<vmem>>, %arg6: memref<8x128xf32, #tpu.memory_space<vmem>>, %arg7: memref<8x1024xbf16, #tpu.memory_space<vmem>>) attributes {dimension_semantics = [#tpu.dimension_semantics<parallel>], iteration_bounds = array<i64: 5>, scalar_prefetch = 0 : i64, scratch_operands = 1 : i64, tpu.core_type = #tpu.core_type<tc>, window_params = [{transform_indices = @transform_0, window_bounds = array<i64: 8, 768>}, {pipeline_mode = #tpu.pipeline_mode<synchronous>, transform_indices = @transform_1, window_bounds = array<i64: 768, 1024>}, {pipeline_mode = #tpu.pipeline_mode<synchronous>, transform_indices = @transform_2, window_bounds = array<i64: 1, 1024>}, {pipeline_mode = #tpu.pipeline_mode<synchronous>, transform_indices = @transform_3, window_bounds = array<i64: 1024, 128>}, {pipeline_mode = #tpu.pipeline_mode<synchronous>, transform_indices = @transform_4, window_bounds = array<i64: 1, 128>}, {transform_indices = @transform_5, window_bounds = array<i64: 8, 128>}]} {
    %c0 = arith.constant 0 : index
    %c0_0 = arith.constant 0 : index
    %0 = vector.load %arg1[%c0, %c0_0] : memref<8x768xf32, #tpu.memory_space<vmem>>, vector<8x768xf32>
    %1 = arith.truncf %0 : vector<8x768xf32> to vector<8x768xbf16>
    %c0_1 = arith.constant 0 : index
    %c0_2 = arith.constant 0 : index
    %2 = vector.load %arg2[%c0_1, %c0_2] : memref<768x1024xbf16, #tpu.memory_space<vmem>>, vector<768x1024xbf16>
    %cst = arith.constant dense<0.000000e+00> : vector<8x1024xf32>
    %3 = tpu.matmul %1, %2, %cst {dimension_numbers = #tpu.dot_dimension_numbers<[1], [0], [0], [1], [0, 0, 1, 1], [], []>} : vector<8x768xbf16>, vector<768x1024xbf16>, vector<8x1024xf32> -> vector<8x1024xf32>
    %c0_3 = arith.constant 0 : index
    %c0_4 = arith.constant 0 : index
    %4 = vector.load %arg3[%c0_3, %c0_4] : memref<1x1024xf32, #tpu.memory_space<vmem>>, vector<1x1024xf32>
    %5 = vector.broadcast %4 : vector<1x1024xf32> to vector<8x1024xf32>
    %6 = arith.addf %3, %5 : vector<8x1024xf32>
    %cst_5 = arith.constant 0.000000e+00 : f32
    %7 = vector.broadcast %cst_5 : f32 to vector<8x1024xf32>
    %8 = arith.maximumf %6, %7 : vector<8x1024xf32>
    %9 = arith.truncf %8 : vector<8x1024xf32> to vector<8x1024xbf16>
    %c0_6 = arith.constant 0 : index
    %c0_7 = arith.constant 0 : index
    %10 = vector.load %arg7[%c0_6, %c0_7] : memref<8x1024xbf16, #tpu.memory_space<vmem>>, vector<8x1024xbf16>
    tpu.vector_store %arg7[%c0_6, %c0_7], %9 {strides = array<i32>} : memref<8x1024xbf16, #tpu.memory_space<vmem>>, vector<8x1024xbf16>,
    %c0_8 = arith.constant 0 : index
    %c0_9 = arith.constant 0 : index
    %11 = vector.load %arg7[%c0_8, %c0_9] : memref<8x1024xbf16, #tpu.memory_space<vmem>>, vector<8x1024xbf16>
    %c0_10 = arith.constant 0 : index
    %c0_11 = arith.constant 0 : index
    %12 = vector.load %arg4[%c0_10, %c0_11] : memref<1024x128xbf16, #tpu.memory_space<vmem>>, vector<1024x128xbf16>
    %cst_12 = arith.constant dense<0.000000e+00> : vector<8x128xf32>
    %13 = tpu.matmul %11, %12, %cst_12 {dimension_numbers = #tpu.dot_dimension_numbers<[1], [0], [0], [1], [0, 0, 1, 1], [], []>} : vector<8x1024xbf16>, vector<1024x128xbf16>, vector<8x128xf32> -> vector<8x128xf32>
    %c0_13 = arith.constant 0 : index
    %c0_14 = arith.constant 0 : index
    %14 = vector.load %arg5[%c0_13, %c0_14] : memref<1x128xf32, #tpu.memory_space<vmem>>, vector<1x128xf32>
    %15 = vector.broadcast %14 : vector<1x128xf32> to vector<8x128xf32>
    %16 = arith.addf %13, %15 : vector<8x128xf32>
    %c0_15 = arith.constant 0 : index
    %c0_16 = arith.constant 0 : index
    %17 = vector.load %arg6[%c0_15, %c0_16] : memref<8x128xf32, #tpu.memory_space<vmem>>, vector<8x128xf32>
    tpu.vector_store %arg6[%c0_15, %c0_16], %16 {strides = array<i32>} : memref<8x128xf32, #tpu.memory_space<vmem>>, vector<8x128xf32>,
    return
  }
  func.func @transform_0(%arg0: i32) -> (i32, i32) {
    %c0_i32 = arith.constant 0 : i32
    %c0_i32_0 = arith.constant 0 : i32
    return %arg0, %c0_i32 : i32, i32
  }
  func.func @transform_1(%arg0: i32) -> (i32, i32) {
    %c0_i32 = arith.constant 0 : i32
    %c0_i32_0 = arith.constant 0 : i32
    %c0_i32_1 = arith.constant 0 : i32
    return %c0_i32, %c0_i32_0 : i32, i32
  }
  func.func @transform_2(%arg0: i32) -> (i32, i32) {
    %c0_i32 = arith.constant 0 : i32
    %c0_i32_0 = arith.constant 0 : i32
    %c0_i32_1 = arith.constant 0 : i32
    return %c0_i32, %c0_i32_0 : i32, i32
  }
  func.func @transform_3(%arg0: i32) -> (i32, i32) {
    %c0_i32 = arith.constant 0 : i32
    %c0_i32_0 = arith.constant 0 : i32
    %c0_i32_1 = arith.constant 0 : i32
    return %c0_i32, %c0_i32_0 : i32, i32
  }
  func.func @transform_4(%arg0: i32) -> (i32, i32) {
    %c0_i32 = arith.constant 0 : i32
    %c0_i32_0 = arith.constant 0 : i32
    %c0_i32_1 = arith.constant 0 : i32
    return %c0_i32, %c0_i32_0 : i32, i32
  }
  func.func @transform_5(%arg0: i32) -> (i32, i32) {
    %c0_i32 = arith.constant 0 : i32
    %c0_i32_0 = arith.constant 0 : i32
    return %arg0, %c0_i32 : i32, i32
  }
}

</mosaic_0001>

<bundles_post_ra>
// kernel: tpu_custom_call.1
= control target key start
LH: loop header
LB: loop body
LE: loop exit
PB: predicated region body
PF: predicated region fallthrough
CT: control target
= control target key end

     0   :  { %s6957_s0 = inlined_call_operand.hbm [shape: f32[40,768], index: 0, kind: input, shape index: {}]   ;;  %s6958_s1 = inlined_call_operand.hbm [shape: bf16[768,1024], index: 1, kind: input, shape index: {}]   ;;  %s6959_s2 = inlined_call_operand.hbm [shape: f32[1,1024], index: 2, kind: input, shape index: {}]   ;;  %s6960_s3 = inlined_call_operand.hbm [shape: bf16[1024,128], index: 3, kind: input, shape index: {}]   ;;  %s6961_s4 = inlined_call_operand.hbm [shape: f32[1,128], index: 4, kind: input, shape index: {}]   ;;  %s6962_s5 = inlined_call_operand.hbm [shape: f32[40,128], index: 5, kind: output, shape index: {}]  }
   0x1   :  { %6963 = sst [smem:[#allocation17_spill]] %s6958_s1 }
   0x2   :  { %10 = vsyncpa [#allocation4], 0 }
   0x3   :  { %12 = vsyncpa [#allocation4 + $0x1], 0 }
   0x4   :  { %13 = vsyncpa [#allocation7], 0 }
   0x5   :  { %14 = vsyncpa [#allocation10], 0 }
   0x6   :  { %15 = vsyncpa [#allocation5], 0 }
   0x7   :  { %17 = vsyncpa [#allocation5 + $0x1], 0  ;;  %s6675_s18 = smov 0   ;;  %s6677_s19 = smov 0  }
   0x8   :  { %s6679_s20 = smov 0   ;;  %s6681_s21 = smov 0  }
   0x9 LB: > { %s6964_s1 = sld [smem:[#allocation17_spill]]  ;;  %s6699_s25 = sadd.s32 4294967295, %s6635_s21   ;;  %s6635_s21 = sphi %s6681_s21, %s6974_s21   ;;  %s6631_s20 = sphi %s6679_s20, %s6973_s20   ;;  %s6627_s19 = sphi %s6677_s19, %s6972_s19   ;;  %s6623_s18 = sphi %s6675_s18, %s6971_s18  }
   0xa   : > { %p4057_p0 = scmp.ge.s32.totalorder %s6635_s21, 1  ;;  %p44_p1 = scmp.eq.s32.totalorder %s6699_s25, 0 }
   0xb   : > { %p164_p2 = scmp.lt.s32.totalorder %s6635_s21, 6  ;;  %s6637_s27 = smov [#allocation6]  }
   0xc   : > { %s177_s28 = sshll.u32 %s6637_s27, 4  ;;  %s201_s6 = sshll.u32 %s6960_s3, 4  ;;  %s178_s28 = int_to_ptr.vmem [resolvable:$true] %s177_s28  ;;  %s202_s6 = int_to_ptr.hbm [resolvable:$true] %s201_s6 }
   0xd   : > { %p6704_p3 = pnand %p4057_p0, %p164_p2  ;;  %s6638_s8 = smov [#allocation9]  }
   0xe   : > { %s203_s9 = sshll.u32 %s6638_s8, 4  ;;  %s6639_s10 = smov 512   ;;  %s204_s9 = int_to_ptr.vmem [resolvable:$true] %s203_s9 }
   0xf   : > { %s175_s24 = sshll.u32 %s6964_s1, 4  ;;  %p6337_p4 = pneg %p6704_p3  ;;  %s176_s24 = int_to_ptr.hbm [resolvable:$true] %s175_s24 }
  0x10   : > { %s6640_s11 = smov 32   ;;  %s6641_s12 = smov 64  }
  0x11   : > { %p6715_p5 = pnand %p6337_p4, %p44_p1  ;;  %s6642_s13 = smov 4  }
  0x12   : > { %s190_s16 = sshll.u32 %s6959_s2, 4  ;;  %s6643_s17 = smov [#allocation8]   ;;  %s191_s16 = int_to_ptr.hbm [resolvable:$true] %s190_s16 }
  0x13   : > { %6340 = dma.hbm_to_vmem [thread:$0]  (!%p6715_p5), %s176_s24, 49152, %s178_s28, [#allocation7], %s6639_s10, %s6639_s10, %s6640_s11  }
  0x14   : > { %6346 = dma.hbm_to_vmem [thread:$0]  (!%p6715_p5), %s202_s6, 8192, %s204_s9, [#allocation10], %s6641_s12, %s6641_s12, %s6642_s13  }
  0x15   : > { %s192_s22 = sshll.u32 %s6643_s17, 4  ;;  %s216_s27 = sshll.u32 %s6961_s4, 4  ;;  %s193_s22 = int_to_ptr.vmem [resolvable:$true] %s192_s22  ;;  %s217_s27 = int_to_ptr.hbm [resolvable:$true] %s216_s27 }
  0x16   : > { %6343 = dma.hbm_to_vmem [thread:$0]  (!%p6715_p5), %s191_s16, 128, %s193_s22, [#allocation7]  }
  0x17   : > { %s6644_s28 = smov [#allocation11]   ;;  %s4056_s30 = sadd.s32 4294967294, %s6635_s21  }
  0x18   : > { %s218_s29 = sshll.u32 %s6644_s28, 4  ;;  %s6735_s6 = sadd.s32 1, %s6635_s21   ;;  %s219_s29 = int_to_ptr.vmem [resolvable:$true] %s218_s29 }
  0x19   : > { %6349 = dma.hbm_to_vmem [thread:$0]  (!%p6715_p5), %s217_s27, 16, %s219_s29, [#allocation10]  }
  0x1a   : > { %s27_s8 = ssub.s32 %s6635_s21, %s6735_s6  ;;  %s30_s9 = sadd.s32 1, %s6631_s20 }
  0x1b   : > { %p28_p6 = scmp.eq.s32.totalorder %s27_s8, 0  ;;  %p37_p7 = scmp.ne.s32.totalorder %s6631_s20, %s6627_s19 }
  0x1c   : > { %p38_p8 = scmp.eq.s32.totalorder %s6635_s21, 0  ;;  %p43_p9 = scmp.ne.s32.totalorder %s6627_s19, %s6623_s18 }
  0x1d   : > { %s6746_s10 = scalar_select %p28_p6, %s6631_s20, %s30_s9  }
  0x1e   : > { %p39_p10 = por %p38_p8, %p37_p7  ;;  %p6750_p11 = por %p44_p1, %p43_p9 }
  0x1f   : > { %p151_p12 = scmp.eq.s32.totalorder %s6699_s25, 4  ;;  %p157_p13 = scmp.eq.s32.totalorder %s4056_s30, 4 }
  0x20   : > { %p6362_p0 = scmp.lt.s32.totalorder %s6635_s21, 5  ;;  %s229_s7 = sand.u32 1, %s6631_s20  }
  0x21   : > { %p6757_p2 = por %p151_p12, %p37_p7  ;;  %p6761_p4 = por %p157_p13, %p43_p9 }
  0x22   : > { %s6314_s14 = smul.u32 48, %s229_s7  ;;  %p6766_p5 = pnand %p6362_p0, %p39_p10 }
  0x23   : > { %s6315_s15 = smul.u32 48, %s6635_s21  ;;  %s230_s29 = scalar_lea.sflag [#allocation4], %s229_s7 }
  0x24   : > { %s233_s24 = scalar_lea.vmem [#allocation3], %s6314_s14  ;;  %p6535_p7 = pneg %p6766_p5 }
  0x25   : > { %s238_s23 = scalar_lea.hbm %s6957_s0, %s6315_s15  ;;  %s242_s27 = sshll.u32 %s233_s24, 4  ;;  %s243_s27 = int_to_ptr.vmem [resolvable:$true] %s242_s27 }
  0x26   : > { %s240_s28 = sshll.u32 %s238_s23, 4  ;;  %s6538_s17 = scalar_lea.hbm %s6957_s0, 240  ;;  %s241_s28 = int_to_ptr.hbm [resolvable:$true] %s240_s28 }
  0x27   : > { %s6531_s30 = sshra.s32 %s241_s28, 4  ;;  %s6532_s30 = int_to_ptr.hbm [resolvable:$true] %s6531_s30 }
  0x28   : > { %s6533_s8 = scalar_lea.hbm %s6532_s30, 48  ;;  %p6539_p10 = scmp.lt.s32.totalorder %s6532_s30, %s6957_s0 }
  0x29   : > { %p6534_p6 = scmp.ne.s32.totalorder %s6532_s30, %s6533_s8  ;;  %p6540_p12 = scmp.lt.s32.totalorder %s6538_s17, %s6533_s8 }
  0x2b   : > { %p6536_p8 = pnand %p6535_p7, %p6534_p6  ;;  %p6541_p13 = por %p6540_p12, %p6539_p10 }
  0x2d   : > { %p6537_p9 = pneg %p6536_p8 }
  0x2f   : > { %p6542_p0 = pnand %p6541_p13, %p6537_p9 }
  0x31   : > { %6545 = shalt.err (!%p6542_p0)
}
  0x32   : > { %6353 = dma.hbm_to_vmem [thread:$0]  (!%p6766_p5), %s241_s28, 768, %s243_s27, %s230_s29  }
  0x33   : > { %251 = sbr.rel (%p6704_p3) target bundleno = 808 (0x328), region = 40  ;;  %s6786_s7 = sand.u32 (!%p6704_p3), 1, %s6627_s19  }
  0x34   : > { %s6316_s1 = smul.u32 (!%p6704_p3), 48, %s6786_s7  ;;  %s254_s14 = scalar_lea.sflag (!%p6704_p3), [#allocation4], %s6786_s7 }
  0x36   : > { %s6790_s23 = scalar_lea.vmem (!%p6704_p3), [#allocation3], %s6316_s1 }
  0x38   : > { %6606 = dma.done.wait (%p6750_p11), %s254_s14, 768  }
  0x39   : > { %6608 = vsyncadd (%p6750_p11), %s254_s14, 4294966528 }
  0x3a   : > { %6610 = dma.done.wait (%p44_p1), [#allocation7], 49280  }
  0x3b   : > { %6612 = vsyncadd (%p44_p1), [#allocation7], 4294918016 }
  0x3c   : > { %6614 = dma.done.wait (%p44_p1), [#allocation10], 8208  }
  0x3d   : > { %6616 = vsyncadd (%p44_p1), [#allocation10], 4294959088  ;;  %v4296_v0 = vld [vmem:[#allocation6 + $0x1c0] sm:$0xf]  ;;  %s4069_s26 = sshll.u32 %s6786_s7, 3  ;;  %s5863_s11 = sshll.u32 %s6699_s25, 3 }
  0x3e   : > { %v5926_v1 = vld [vmem:[#allocation6 + $0x1dc] sm:$0xf0]  ;;  %s3943_s27 = scalar_lea.hbm %s6962_s5, %s5863_s11  ;;  %s304_s28 = scalar_lea.vmem [#allocation12], %s4069_s26 }
  0x3f   : > { %v4552_v2 = vld [vmem:[#allocation6 + $0x3c0] sm:$0xf]  ;;  %v4297_v3 = vor.u32 %v5926_v1, %v4296_v0  ;;  %s3945_s29 = sshll.u32 %s304_s28, 4  ;;  %s3947_s30 = sshll.u32 %s3943_s27, 4  ;;  %s3946_s29 = int_to_ptr.vmem [resolvable:$true] %s3945_s29  ;;  %s3948_s30 = int_to_ptr.hbm [resolvable:$true] %s3947_s30 }
  0x40   : > { %v5990_v4 = vld [vmem:[#allocation6 + $0x3dc] sm:$0xf0]  ;;  %s3933_s8 = scalar_lea.sflag [#allocation5], %s6786_s7  ;;  %s6575_s9 = sshra.s32 %s3948_s30, 4  ;;  %s6576_s9 = int_to_ptr.hbm [resolvable:$true] %s6575_s9 }
  0x41   : > { %v4808_v5 = vld [vmem:[#allocation6 + $0x5c0] sm:$0xf]  ;;  %v4553_v7 = vor.u32 %v5990_v4, %v4552_v2  ;;  %2639 = vmatpush.bf16.msra.mxu0 %v4297_v3  ;;  %s6577_s17 = scalar_lea.hbm %s6576_s9, 8  ;;  %s6581_s15 = scalar_lea.hbm %s6962_s5, 40 }
  0x42   : > { %v6054_v6 = vld [vmem:[#allocation6 + $0x5dc] sm:$0xf0]  ;;  %p6578_p1 = scmp.ne.s32.totalorder %s6576_s9, %s6577_s17  ;;  %p6582_p5 = scmp.lt.s32.totalorder %s6576_s9, %s6962_s5 }
  0x43   : > { %v4809_v8 = vor.u32 %v6054_v6, %v4808_v5  ;;  %v5064_v9 = vld [vmem:[#allocation6 + $0x7c0] sm:$0xf]  ;;  %2652 = vmatpush.bf16.msra.mxu1 %v4553_v7  ;;  %p6583_p6 = scmp.lt.s32.totalorder %s6581_s15, %s6577_s17 }
  0x44   : > { %v6118_v10 = vld [vmem:[#allocation6 + $0x7dc] sm:$0xf0]  ;;  %p6579_p3 = pnand %p6578_p1, %p6757_p2 }
  0x45   : > { %v4264_v11 = vld [vmem:[#allocation6 + $0x180] sm:$0xf]  ;;  %v5065_v12 = vor.u32 %v6118_v10, %v5064_v9  ;;  %2665 = vmatpush.bf16.msra.mxu2 %v4809_v8  ;;  %p6584_p7 = por %p6583_p6, %p6582_p5 }
  0x46   : > { %v5918_v13 = vld [vmem:[#allocation6 + $0x19c] sm:$0xf0]  ;;  %p6580_p11 = pneg %p6579_p3 }
  0x47   : > { %v4520_v14 = vld [vmem:[#allocation6 + $0x380] sm:$0xf]  ;;  %v4265_v16 = vor.u32 %v5918_v13, %v4264_v11  ;;  %2678 = vmatpush.bf16.msra.mxu3 %v5065_v12 }
  0x48   : > { %v5982_v15 = vld [vmem:[#allocation6 + $0x39c] sm:$0xf0]  ;;  %p6585_p8 = pnand %p6584_p7, %p6580_p11 }
  0x49   : > { %v4521_v17 = vor.u32 %v5982_v15, %v4520_v14  ;;  %v4776_v18 = vld [vmem:[#allocation6 + $0x580] sm:$0xf]  ;;  %2640 = vmatpush.bf16.msra.mxu0 %v4265_v16 }
  0x4a   : > { %v6046_v19 = vld [vmem:[#allocation6 + $0x59c] sm:$0xf0] }
  0x4b   : > { %v5032_v20 = vld [vmem:[#allocation6 + $0x780] sm:$0xf]  ;;  %v4777_v21 = vor.u32 %v6046_v19, %v4776_v18  ;;  %2653 = vmatpush.bf16.msra.mxu1 %v4521_v17 }
  0x4c   : > { %v6110_v22 = vld [vmem:[#allocation6 + $0x79c] sm:$0xf0] }
  0x4d   : > { %v4232_v23 = vld [vmem:[#allocation6 + $0x140] sm:$0xf]  ;;  %v5033_v25 = vor.u32 %v6110_v22, %v5032_v20  ;;  %2666 = vmatpush.bf16.msra.mxu2 %v4777_v21 }
  0x4e   : > { %v5910_v24 = vld [vmem:[#allocation6 + $0x15c] sm:$0xf0] }
  0x4f   : > { %v4488_v26 = vld [vmem:[#allocation6 + $0x340] sm:$0xf]  ;;  %v4233_v29 = vor.u32 %v5910_v24, %v4232_v23  ;;  %2679 = vmatpush.bf16.msra.mxu3 %v5033_v25 }
  0x50   : > { %v5974_v27 = vld [vmem:[#allocation6 + $0x35c] sm:$0xf0] }
  0x51   : > { %v4744_v28 = vld [vmem:[#allocation6 + $0x540] sm:$0xf]  ;;  %v4489_v33 = vor.u32 %v5974_v27, %v4488_v26  ;;  %2641 = vmatpush.bf16.msra.mxu0 %v4233_v29 }
  0x52   : > { %v6038_v30 = vld [vmem:[#allocation6 + $0x55c] sm:$0xf0] }
  0x53   : > { %v5000_v31 = vld [vmem:[#allocation6 + $0x740] sm:$0xf]  ;;  %v4745_v34 = vor.u32 %v6038_v30, %v4744_v28  ;;  %2654 = vmatpush.bf16.msra.mxu1 %v4489_v33  ;;  %v5922_v33 = vld [vmem:[#allocation6 + $0x1c4] sm:$0xf] }
  0x54   : > { %v6102_v32 = vld [vmem:[#allocation6 + $0x75c] sm:$0xf0] }
  0x55   : > { %v4200_v35 = vld [vmem:[#allocation6 + $0x100] sm:$0xf]  ;;  %v5001_v38 = vor.u32 %v6102_v32, %v5000_v31  ;;  %2667 = vmatpush.bf16.msra.mxu2 %v4745_v34  ;;  %v4298_v34 = vld [vmem:[#allocation6 + $0x1e0] sm:$0xf0] }
  0x56   : > { %v5902_v36 = vld [vmem:[#allocation6 + $0x11c] sm:$0xf0] }
  0x57   : > { %v4456_v37 = vld [vmem:[#allocation6 + $0x300] sm:$0xf]  ;;  %v4201_v44 = vor.u32 %v5902_v36, %v4200_v35  ;;  %2680 = vmatpush.bf16.msra.mxu3 %v5001_v38  ;;  %v4554_v38 = vld [vmem:[#allocation6 + $0x3e0] sm:$0xf0] }
  0x58   : > { %v5966_v39 = vld [vmem:[#allocation6 + $0x31c] sm:$0xf0] }
  0x59   : > { %v4712_v40 = vld [vmem:[#allocation6 + $0x500] sm:$0xf]  ;;  %v4457_v45 = vor.u32 %v5966_v39, %v4456_v37  ;;  %2642 = vmatpush.bf16.msra.mxu0 %v4201_v44  ;;  %v5986_v37 = vld [vmem:[#allocation6 + $0x3c4] sm:$0xf] }
  0x5a   : > { %v6030_v41 = vld [vmem:[#allocation6 + $0x51c] sm:$0xf0] }
  0x5b   : > { %v4968_v42 = vld [vmem:[#allocation6 + $0x700] sm:$0xf]  ;;  %v4713_v46 = vor.u32 %v6030_v41, %v4712_v40  ;;  %2655 = vmatpush.bf16.msra.mxu1 %v4457_v45 }
  0x5c   : > { %v6094_v43 = vld [vmem:[#allocation6 + $0x71c] sm:$0xf0] }
  0x5d   : > { %v4168_v47 = vld [vmem:[#allocation6 + $0xc0] sm:$0xf]  ;;  %v4969_v50 = vor.u32 %v6094_v43, %v4968_v42  ;;  %2668 = vmatpush.bf16.msra.mxu2 %v4713_v46  ;;  %v4301_v42 = vor.u32 %v5922_v33, %v4298_v34  ;;  %v4557_v46 = vor.u32 %v5986_v37, %v4554_v38 }
  0x5e   : > { %v5894_v48 = vld [vmem:[#allocation6 + $0xdc] sm:$0xf0] }
  0x5f   : > { %v4424_v49 = vld [vmem:[#allocation6 + $0x2c0] sm:$0xf]  ;;  %v4169_v56 = vor.u32 %v5894_v48, %v4168_v47  ;;  %2681 = vmatpush.bf16.msra.mxu3 %v4969_v50  ;;  %v5914_v48 = vld [vmem:[#allocation6 + $0x184] sm:$0xf] }
  0x60   : > { %v5958_v51 = vld [vmem:[#allocation6 + $0x2dc] sm:$0xf0]  ;;  %v5978_v50 = vld [vmem:[#allocation6 + $0x384] sm:$0xf] }
  0x61   : > { %v4680_v52 = vld [vmem:[#allocation6 + $0x4c0] sm:$0xf]  ;;  %v4425_v57 = vor.u32 %v5958_v51, %v4424_v49  ;;  %2643 = vmatpush.bf16.msra.mxu0 %v4169_v56  ;;  %v4266_v49 = vld [vmem:[#allocation6 + $0x1a0] sm:$0xf0] }
  0x62   : > { %v6022_v53 = vld [vmem:[#allocation6 + $0x4dc] sm:$0xf0]  ;;  %v4522_v51 = vld [vmem:[#allocation6 + $0x3a0] sm:$0xf0] }
  0x63   : > { %v4936_v54 = vld [vmem:[#allocation6 + $0x6c0] sm:$0xf]  ;;  %v4681_v58 = vor.u32 %v6022_v53, %v4680_v52  ;;  %2656 = vmatpush.bf16.msra.mxu1 %v4425_v57 }
  0x64   : > { %v6086_v55 = vld [vmem:[#allocation6 + $0x6dc] sm:$0xf0] }
  0x65   : > { %v4136_v59 = vld [vmem:[#allocation6 + $0x80] sm:$0xf]  ;;  %v4937_v62 = vor.u32 %v6086_v55, %v4936_v54  ;;  %2669 = vmatpush.bf16.msra.mxu2 %v4681_v58  ;;  %v4269_v55 = vor.u32 %v5914_v48, %v4266_v49 }
  0x66   : > { %v5886_v60 = vld [vmem:[#allocation6 + $0x9c] sm:$0xf0] }
  0x67   : > { %v4392_v61 = vld [vmem:[#allocation6 + $0x280] sm:$0xf]  ;;  %v4137_v4 = vor.u32 %v5886_v60, %v4136_v59  ;;  %2682 = vmatpush.bf16.msra.mxu3 %v4937_v62  ;;  %v4525_v59 = vor.u32 %v5978_v50, %v4522_v51  ;;  %v5906_v60 = vld [vmem:[#allocation6 + $0x144] sm:$0xf] }
  0x68   : > { %v5950_v63 = vld [vmem:[#allocation6 + $0x29c] sm:$0xf0]  ;;  %v5970_v62 = vld [vmem:[#allocation6 + $0x344] sm:$0xf] }
  0x69   : > { %v4648_v0 = vld [vmem:[#allocation6 + $0x480] sm:$0xf]  ;;  %v4393_v5 = vor.u32 %v5950_v63, %v4392_v61  ;;  %2644 = vmatpush.bf16.msra.mxu0 %v4137_v4  ;;  %v4234_v61 = vld [vmem:[#allocation6 + $0x160] sm:$0xf0] }
  0x6a   : > { %v6014_v1 = vld [vmem:[#allocation6 + $0x49c] sm:$0xf0]  ;;  %v4490_v63 = vld [vmem:[#allocation6 + $0x360] sm:$0xf0] }
  0x6b   : > { %v4904_v2 = vld [vmem:[#allocation6 + $0x680] sm:$0xf]  ;;  %v4649_v6 = vor.u32 %v6014_v1, %v4648_v0  ;;  %2657 = vmatpush.bf16.msra.mxu1 %v4393_v5  ;;  %v4237_v5 = vor.u32 %v5906_v60, %v4234_v61 }
  0x6c   : > { %v6078_v3 = vld [vmem:[#allocation6 + $0x69c] sm:$0xf0] }
  0x6d   : > { %v4104_v7 = vld [vmem:[#allocation6 + $0x40] sm:$0xf]  ;;  %v4905_v10 = vor.u32 %v6078_v3, %v4904_v2  ;;  %2670 = vmatpush.bf16.msra.mxu2 %v4649_v6 }
  0x6e   : > { %v5878_v8 = vld [vmem:[#allocation6 + $0x5c] sm:$0xf0] }
  0x6f   : > { %v4360_v9 = vld [vmem:[#allocation6 + $0x240] sm:$0xf]  ;;  %v4105_v16 = vor.u32 %v5878_v8, %v4104_v7  ;;  %2683 = vmatpush.bf16.msra.mxu3 %v4905_v10  ;;  %v308_v10 = vld [vmem:[%s6790_s23 + $0x18] sm:$0xff] }
  0x70   : > { %v5942_v11 = vld [vmem:[#allocation6 + $0x25c] sm:$0xf0] }
  0x71   : > { %v4616_v12 = vld [vmem:[#allocation6 + $0x440] sm:$0xf]  ;;  %v4361_v19 = vor.u32 %v5942_v11, %v4360_v9  ;;  %2645 = vmatpush.bf16.msra.mxu0 %v4105_v16  ;;  %v4493_v11 = vor.u32 %v5970_v62, %v4490_v63  ;;  %v5962_v16 = vld [vmem:[#allocation6 + $0x304] sm:$0xf] }
  0x72   : > { %v6006_v13 = vld [vmem:[#allocation6 + $0x45c] sm:$0xf0]  ;;  %v5866_v63 = vld [vmem:[#allocation6 + $0x4] sm:$0xf] }
  0x73   : > { %v4872_v14 = vld [vmem:[#allocation6 + $0x640] sm:$0xf]  ;;  %v4617_v20 = vor.u32 %v6006_v13, %v4616_v12  ;;  %2658 = vmatpush.bf16.msra.mxu1 %v4361_v19  ;;  %v5898_v13 = vld [vmem:[#allocation6 + $0x104] sm:$0xf]  ;;  %v306_v19 = vld [vmem:[%s6790_s23 + $0x8] sm:$0xff] }
  0x74   : > { %v6070_v15 = vld [vmem:[#allocation6 + $0x65c] sm:$0xf0] }
  0x75   : > { %v4072_v17 = vld [vmem:[#allocation6] sm:$0xf]  ;;  %v4873_v24 = vor.u32 %v6070_v15, %v4872_v14  ;;  %2671 = vmatpush.bf16.msra.mxu2 %v4617_v20  ;;  %v4202_v14 = vld [vmem:[#allocation6 + $0x120] sm:$0xf0]  ;;  %v6811_v15 = vpack.c.bf16 %v308_v10, %v308_v10 }
  0x76   : > { %v5870_v18 = vld [vmem:[#allocation6 + $0x1c] sm:$0xf0]  ;;  %v5066_v10 = vld [vmem:[#allocation6 + $0x7e0] sm:$0xf0] }
  0x77   : > { %v4328_v21 = vld [vmem:[#allocation6 + $0x200] sm:$0xf]  ;;  %v4073_v31 = vor.u32 %v5870_v18, %v4072_v17  ;;  %2684 = vmatpush.bf16.msra.mxu3 %v4873_v24  ;;  %v4458_v17 = vld [vmem:[#allocation6 + $0x320] sm:$0xf0] }
  0x78   : > { %v5934_v22 = vld [vmem:[#allocation6 + $0x21c] sm:$0xf0] }
  0x79   : > { %v4584_v23 = vld [vmem:[#allocation6 + $0x400] sm:$0xf]  ;;  %v4329_v35 = vor.u32 %v5934_v22, %v4328_v21  ;;  %2646 = vmatpush.bf16.msra.mxu0 %v4073_v31  ;;  %v4205_v21 = vor.u32 %v5898_v13, %v4202_v14  ;;  %v4426_v31 = vld [vmem:[#allocation6 + $0x2e0] sm:$0xf0] }
  0x7a   : > { %v5998_v25 = vld [vmem:[#allocation6 + $0x41c] sm:$0xf0] }
  0x7b   : > { %v4840_v26 = vld [vmem:[#allocation6 + $0x600] sm:$0xf]  ;;  %v4585_v36 = vor.u32 %v5998_v25, %v4584_v23  ;;  %2659 = vmatpush.bf16.msra.mxu1 %v4329_v35  ;;  %v6817_v25 = vpack.c.bf16 %v306_v19, %v306_v19 }
  0x7c   : > { %v6062_v27 = vld [vmem:[#allocation6 + $0x61c] sm:$0xf0] }
  0x7d   : > { %v5320_v28 = vld [vmem:[#allocation6 + $0x9c0] sm:$0xf]  ;;  %v4841_v39 = vor.u32 %v6062_v27, %v4840_v26  ;;  %2672 = vmatpush.bf16.msra.mxu2 %v4585_v36  ;;  %v4461_v26 = vor.u32 %v5962_v16, %v4458_v17  ;;  %v6242_v16 = vld [vmem:[#allocation6 + $0xbc4] sm:$0xf] }
  0x7e   : > { %v6182_v29 = vld [vmem:[#allocation6 + $0x9dc] sm:$0xf0]  ;;  %2660 = vmatmul.bf16.vlgmr.msra.gmra.mxu1 %v6817_v25  ;;  %v5578_v17 = vld [vmem:[#allocation6 + $0xbe0] sm:$0xf0] }
  0x7f   : > { %v5576_v30 = vld [vmem:[#allocation6 + $0xbc0] sm:$0xf]  ;;  %v5321_v40 = vor.u32 %v6182_v29, %v5320_v28  ;;  %2685 = vmatpush.bf16.msra.mxu3 %v4841_v39  ;;  %v5890_v28 = vld [vmem:[#allocation6 + $0xc4] sm:$0xf] }
  0x80   : > { %v6246_v32 = vld [vmem:[#allocation6 + $0xbdc] sm:$0xf0]  ;;  %v4170_v29 = vld [vmem:[#allocation6 + $0xe0] sm:$0xf0] }
  0x81   : > { %v5577_v41 = vor.u32 %v6246_v32, %v5576_v30  ;;  %v5288_v43 = vld [vmem:[#allocation6 + $0x980] sm:$0xf]  ;;  %2691 = vmatpush.bf16.msrb.mxu0 %v5321_v40  ;;  %2717 = vmatpush.bf16.msrb.mxu2 %v4301_v42  ;;  %v5954_v30 = vld [vmem:[#allocation6 + $0x2c4] sm:$0xf]  ;;  %v4173_v34 = vor.u32 %v5890_v28, %v4170_v29  ;;  %v5581_v28 = vor.u32 %v6242_v16, %v5578_v17 }
  0x82   : > { %v6174_v44 = vld [vmem:[#allocation6 + $0x99c] sm:$0xf0]  ;;  %2686 = vmatmul.bf16.vlgmr.msra.gmra.mxu3 %v6811_v15  ;;  %v4429_v38 = vor.u32 %v5954_v30, %v4426_v31  ;;  %v5882_v40 = vld [vmem:[#allocation6 + $0x84] sm:$0xf] }
  0x83   : > { %v5544_v45 = vld [vmem:[#allocation6 + $0xb80] sm:$0xf]  ;;  %v5289_v52 = vor.u32 %v6174_v44, %v5288_v43  ;;  %2704 = vmatpush.bf16.msrb.mxu1 %v5577_v41  ;;  %2730 = vmatpush.bf16.msrb.mxu3 %v4557_v46  ;;  %v4138_v41 = vld [vmem:[#allocation6 + $0xa0] sm:$0xf0] }
  0x84   : > { %v6238_v47 = vld [vmem:[#allocation6 + $0xb9c] sm:$0xf0]  ;;  %v5946_v42 = vld [vmem:[#allocation6 + $0x284] sm:$0xf]  ;;  %v4141_v46 = vor.u32 %v5882_v40, %v4138_v41 }
  0x85   : > { %v5256_v53 = vld [vmem:[#allocation6 + $0x940] sm:$0xf]  ;;  %v5545_v54 = vor.u32 %v6238_v47, %v5544_v45  ;;  %2692 = vmatpush.bf16.msrb.mxu0 %v5289_v52  ;;  %2718 = vmatpush.bf16.msrb.mxu2 %v4269_v55  ;;  %v4394_v43 = vld [vmem:[#allocation6 + $0x2a0] sm:$0xf0] }
  0x86   : > { %v6166_v56 = vld [vmem:[#allocation6 + $0x95c] sm:$0xf0]  ;;  %v4397_v50 = vor.u32 %v5946_v42, %v4394_v43  ;;  %v5874_v52 = vld [vmem:[#allocation6 + $0x44] sm:$0xf] }
  0x87   : > { %v5512_v57 = vld [vmem:[#allocation6 + $0xb40] sm:$0xf]  ;;  %v5257_v0 = vor.u32 %v6166_v56, %v5256_v53  ;;  %2705 = vmatpush.bf16.msrb.mxu1 %v5545_v54  ;;  %2731 = vmatpush.bf16.msrb.mxu3 %v4525_v59  ;;  %v4106_v53 = vld [vmem:[#allocation6 + $0x60] sm:$0xf0] }
  0x88   : > { %v6230_v58 = vld [vmem:[#allocation6 + $0xb5c] sm:$0xf0]  ;;  %v5938_v54 = vld [vmem:[#allocation6 + $0x244] sm:$0xf]  ;;  %v4109_v60 = vor.u32 %v5874_v52, %v4106_v53 }
  0x89   : > { %v5513_v1 = vor.u32 %v6230_v58, %v5512_v57  ;;  %v5224_v2 = vld [vmem:[#allocation6 + $0x900] sm:$0xf]  ;;  %2693 = vmatpush.bf16.msrb.mxu0 %v5257_v0  ;;  %2719 = vmatpush.bf16.msrb.mxu2 %v4237_v5  ;;  %v4362_v55 = vld [vmem:[#allocation6 + $0x260] sm:$0xf0] }
  0x8a   : > { %v307_v3 = vld [vmem:[%s6790_s23 + $0x10] sm:$0xff]  ;;  %v305_v4 = vld [vmem:[%s6790_s23] sm:$0xff]  ;;  %v4365_v0 = vor.u32 %v5938_v54, %v4362_v55 }
  0x8b   : > { %v6158_v6 = vld [vmem:[#allocation6 + $0x91c] sm:$0xf0]  ;;  %v6806_v8 = vpack.c.bf16 %v307_v3, %v307_v3  ;;  %v6808_v9 = vpack.c.bf16 %v305_v4, %v305_v4  ;;  %2706 = vmatpush.bf16.msrb.mxu1 %v5513_v1  ;;  %2732 = vmatpush.bf16.msrb.mxu3 %v4493_v11  ;;  %v4074_v1 = vld [vmem:[#allocation6 + $0x20] sm:$0xf0] }
  0x8c   : > { %v5480_v7 = vld [vmem:[#allocation6 + $0xb00] sm:$0xf]  ;;  %v5225_v18 = vor.u32 %v6158_v6, %v5224_v2  ;;  %v5930_v2 = vld [vmem:[#allocation6 + $0x204] sm:$0xf]  ;;  %v4077_v14 = vor.u32 %v5866_v63, %v4074_v1 }
  0x8d   : > { %v6222_v12 = vld [vmem:[#allocation6 + $0xb1c] sm:$0xf0]  ;;  %2673 = vmatmul.bf16.vlgmr.msra.gmra.mxu2 %v6806_v8  ;;  %2647 = vmatmul.bf16.vlgmr.msra.gmra.mxu0 %v6808_v9  ;;  %v4330_v3 = vld [vmem:[#allocation6 + $0x220] sm:$0xf0] }
  0x8e   : > { %v5481_v20 = vor.u32 %v6222_v12, %v5480_v7  ;;  %v5192_v22 = vld [vmem:[#allocation6 + $0x8c0] sm:$0xf]  ;;  %2694 = vmatpush.bf16.msrb.mxu0 %v5225_v18  ;;  %2720 = vmatpush.bf16.msrb.mxu2 %v4205_v21  ;;  %v6050_v4 = vld [vmem:[#allocation6 + $0x5c4] sm:$0xf]  ;;  %v4333_v19 = vor.u32 %v5930_v2, %v4330_v3  ;;  %v310_v21 = vld [vmem:[%s6790_s23 + $0x28] sm:$0xff] }
  0x8f   : > { %v6150_v23 = vld [vmem:[#allocation6 + $0x8dc] sm:$0xf0]  ;;  %2733 = vmatpush.bf16.msrb.mxu3 %v4461_v26  ;;  %v4810_v5 = vld [vmem:[#allocation6 + $0x5e0] sm:$0xf0] }
  0x90   : > { %v5448_v24 = vld [vmem:[#allocation6 + $0xac0] sm:$0xf]  ;;  %v5193_v32 = vor.u32 %v6150_v23, %v5192_v22  ;;  %2707 = vmatpush.bf16.msrb.mxu1 %v5481_v20  ;;  %v6114_v6 = vld [vmem:[#allocation6 + $0x7c4] sm:$0xf]  ;;  %v4813_v20 = vor.u32 %v6050_v4, %v4810_v5 }
  0x91   : > { %v6214_v27 = vld [vmem:[#allocation6 + $0xadc] sm:$0xf0]  ;;  %v6178_v11 = vld [vmem:[#allocation6 + $0x9c4] sm:$0xf]  ;;  %v5069_v22 = vor.u32 %v6114_v6, %v5066_v10 }
  0x92   : > { %v5449_v33 = vor.u32 %v6214_v27, %v5448_v24  ;;  %v5160_v35 = vld [vmem:[#allocation6 + $0x880] sm:$0xf]  ;;  %2695 = vmatpush.bf16.msrb.mxu0 %v5193_v32  ;;  %2721 = vmatpush.bf16.msrb.mxu2 %v4173_v34  ;;  %v5322_v12 = vld [vmem:[#allocation6 + $0x9e0] sm:$0xf0] }
  0x93   : > { %v6142_v36 = vld [vmem:[#allocation6 + $0x89c] sm:$0xf0]  ;;  %2734 = vmatpush.bf16.msrb.mxu3 %v4429_v38  ;;  %v5325_v23 = vor.u32 %v6178_v11, %v5322_v12  ;;  %v6042_v24 = vld [vmem:[#allocation6 + $0x584] sm:$0xf] }
  0x94   : > { %v5416_v37 = vld [vmem:[#allocation6 + $0xa80] sm:$0xf]  ;;  %v5161_v44 = vor.u32 %v6142_v36, %v5160_v35  ;;  %2708 = vmatpush.bf16.msrb.mxu1 %v5449_v33  ;;  %v4778_v26 = vld [vmem:[#allocation6 + $0x5a0] sm:$0xf0]  ;;  %v6824_v35 = vpack.c.bf16 %v310_v21, %v310_v21 }
  0x95   : > { %v6206_v39 = vld [vmem:[#allocation6 + $0xa9c] sm:$0xf0]  ;;  %v6106_v27 = vld [vmem:[#allocation6 + $0x784] sm:$0xf]  ;;  %v4781_v36 = vor.u32 %v6042_v24, %v4778_v26 }
  0x96   : > { %v5417_v45 = vor.u32 %v6206_v39, %v5416_v37  ;;  %v5128_v47 = vld [vmem:[#allocation6 + $0x840] sm:$0xf]  ;;  %2696 = vmatpush.bf16.msrb.mxu0 %v5161_v44  ;;  %2722 = vmatpush.bf16.msrb.mxu2 %v4141_v46  ;;  %v5034_v29 = vld [vmem:[#allocation6 + $0x7a0] sm:$0xf0] }
  0x97   : > { %v6134_v48 = vld [vmem:[#allocation6 + $0x85c] sm:$0xf0]  ;;  %2735 = vmatpush.bf16.msrb.mxu3 %v4397_v50  ;;  %v6170_v30 = vld [vmem:[#allocation6 + $0x984] sm:$0xf]  ;;  %v5037_v37 = vor.u32 %v6106_v27, %v5034_v29 }
  0x98   : > { %v5384_v49 = vld [vmem:[#allocation6 + $0xa40] sm:$0xf]  ;;  %v5129_v56 = vor.u32 %v6134_v48, %v5128_v47  ;;  %2709 = vmatpush.bf16.msrb.mxu1 %v5417_v45  ;;  %v5290_v31 = vld [vmem:[#allocation6 + $0x9a0] sm:$0xf0] }
  0x99   : > { %v6198_v51 = vld [vmem:[#allocation6 + $0xa5c] sm:$0xf0]  ;;  %v6234_v33 = vld [vmem:[#allocation6 + $0xb84] sm:$0xf]  ;;  %v5293_v38 = vor.u32 %v6170_v30, %v5290_v31 }
  0x9a   : > { %v5096_v57 = vld [vmem:[#allocation6 + $0x800] sm:$0xf]  ;;  %v5385_v59 = vor.u32 %v6198_v51, %v5384_v49  ;;  %2697 = vmatpush.bf16.msrb.mxu0 %v5129_v56  ;;  %2723 = vmatpush.bf16.msrb.mxu2 %v4109_v60  ;;  %v5546_v34 = vld [vmem:[#allocation6 + $0xba0] sm:$0xf0] }
  0x9b   : > { %v6126_v58 = vld [vmem:[#allocation6 + $0x81c] sm:$0xf0]  ;;  %2736 = vmatpush.bf16.msrb.mxu3 %v4365_v0  ;;  %v6034_v39 = vld [vmem:[#allocation6 + $0x544] sm:$0xf]  ;;  %v5549_v42 = vor.u32 %v6234_v33, %v5546_v34 }
  0x9c   : > { %v5352_v61 = vld [vmem:[#allocation6 + $0xa00] sm:$0xf]  ;;  %v5097_v7 = vor.u32 %v6126_v58, %v5096_v57  ;;  %2710 = vmatpush.bf16.msrb.mxu1 %v5385_v59  ;;  %v4746_v40 = vld [vmem:[#allocation6 + $0x560] sm:$0xf0] }
  0x9d   : > { %v6190_v62 = vld [vmem:[#allocation6 + $0xa1c] sm:$0xf0]  ;;  %v6098_v41 = vld [vmem:[#allocation6 + $0x744] sm:$0xf]  ;;  %v4749_v48 = vor.u32 %v6034_v39, %v4746_v40 }
  0x9e   : > { %v5353_v13 = vor.u32 %v6190_v62, %v5352_v61  ;;  %v309_v18 = vld [vmem:[%s6790_s23 + $0x20] sm:$0xff]  ;;  %2698 = vmatpush.bf16.msrb.mxu0 %v5097_v7  ;;  %2724 = vmatpush.bf16.msrb.mxu2 %v4077_v14 }
  0x9f   : > { %v6822_v32 = vpack.c.bf16 %v309_v18, %v309_v18  ;;  %2737 = vmatpush.bf16.msrb.mxu3 %v4333_v19  ;;  %v5002_v43 = vld [vmem:[#allocation6 + $0x760] sm:$0xf0] }
  0xa0   : > { %2711 = vmatpush.bf16.msrb.mxu1 %v5353_v13  ;;  %v6162_v44 = vld [vmem:[#allocation6 + $0x944] sm:$0xf]  ;;  %v5005_v49 = vor.u32 %v6098_v41, %v5002_v43 }
  0xa1   : > { %v5258_v45 = vld [vmem:[#allocation6 + $0x960] sm:$0xf0]  ;;  %2699 = vmatmul.bf16.vlgmr.msrb.gmra.mxu0 %v6822_v32  ;;  %2725 = vmatmul.bf16.vlgmr.msrb.gmra.mxu2 %v6808_v9 }
  0xa2   : > { %2743 = vmatpush.bf16.msra.mxu0 %v4813_v20  ;;  %2769 = vmatpush.bf16.msra.mxu2 %v5325_v23  ;;  %v6226_v46 = vld [vmem:[#allocation6 + $0xb44] sm:$0xf]  ;;  %v5261_v50 = vor.u32 %v6162_v44, %v5258_v45 }
  0xa3   : > { %2782 = vmatpush.bf16.msra.mxu3 %v5581_v28  ;;  %v5514_v47 = vld [vmem:[#allocation6 + $0xb60] sm:$0xf0]  ;;  %2712 = vmatmul.bf16.vlgmr.msrb.gmra.mxu1 %v6824_v35 }
  0xa4   : > { %2756 = vmatpush.bf16.msra.mxu1 %v5069_v22  ;;  %2738 = vmatmul.bf16.vlgmr.msrb.gmra.mxu3 %v6817_v25  ;;  %v6026_v51 = vld [vmem:[#allocation6 + $0x504] sm:$0xf]  ;;  %v5517_v54 = vor.u32 %v6226_v46, %v5514_v47 }
  0xa5   : > { %v4714_v52 = vld [vmem:[#allocation6 + $0x520] sm:$0xf0] }
  0xa6   : > { %2744 = vmatpush.bf16.msra.mxu0 %v4781_v36  ;;  %2770 = vmatpush.bf16.msra.mxu2 %v5293_v38  ;;  %v6090_v53 = vld [vmem:[#allocation6 + $0x704] sm:$0xf]  ;;  %v4717_v60 = vor.u32 %v6026_v51, %v4714_v52  ;;  %v5927_v51 = vld [vmem:[#allocation6 + $0x1e4] sm:$0xf0] }
  0xa7   : > { %2783 = vmatpush.bf16.msra.mxu3 %v5549_v42  ;;  %v4970_v55 = vld [vmem:[#allocation6 + $0x720] sm:$0xf0]  ;;  %v4560_v52 = vld [vmem:[#allocation6 + $0x3c8] sm:$0xf] }
  0xa8   : > { %2757 = vmatpush.bf16.msra.mxu1 %v5037_v37  ;;  %v6154_v56 = vld [vmem:[#allocation6 + $0x904] sm:$0xf]  ;;  %v4973_v61 = vor.u32 %v6090_v53, %v4970_v55  ;;  %v4816_v55 = vld [vmem:[#allocation6 + $0x5c8] sm:$0xf] }
  0xa9   : > { %v5226_v57 = vld [vmem:[#allocation6 + $0x920] sm:$0xf0] }
  0xaa   : > { %v6218_v58 = vld [vmem:[#allocation6 + $0xb04] sm:$0xf]  ;;  %2745 = vmatpush.bf16.msra.mxu0 %v4749_v48  ;;  %2771 = vmatpush.bf16.msra.mxu2 %v5261_v50  ;;  %v5229_v62 = vor.u32 %v6154_v56, %v5226_v57  ;;  %v4304_v50 = vld [vmem:[#allocation6 + $0x1c8] sm:$0xf] }
  0xab   : > { %v5482_v59 = vld [vmem:[#allocation6 + $0xb20] sm:$0xf0]  ;;  %2784 = vmatpush.bf16.msra.mxu3 %v5517_v54  ;;  %v5991_v54 = vld [vmem:[#allocation6 + $0x3e4] sm:$0xf0] }
  0xac   : > { %2758 = vmatpush.bf16.msra.mxu1 %v5005_v49  ;;  %v6018_v63 = vld [vmem:[#allocation6 + $0x4c4] sm:$0xf]  ;;  %v5485_v2 = vor.u32 %v6218_v58, %v5482_v59  ;;  %v6055_v56 = vld [vmem:[#allocation6 + $0x5e4] sm:$0xf0] }
  0xad   : > { %v4682_v0 = vld [vmem:[#allocation6 + $0x4e0] sm:$0xf0]  ;;  %v5072_v59 = vld [vmem:[#allocation6 + $0x7c8] sm:$0xf] }
  0xae   : > { %v6082_v1 = vld [vmem:[#allocation6 + $0x6c4] sm:$0xf]  ;;  %2746 = vmatpush.bf16.msra.mxu0 %v4717_v60  ;;  %v4685_v10 = vor.u32 %v6018_v63, %v4682_v0  ;;  %2772 = vmatpush.bf16.msra.mxu2 %v5229_v62  ;;  %v6119_v60 = vld [vmem:[#allocation6 + $0x7e4] sm:$0xf0]  ;;  %v4305_v62 = vor.u32 %v5927_v51, %v4304_v50  ;;  %v4561_v63 = vor.u32 %v5991_v54, %v4560_v52 }
  0xaf   : > { %v4938_v3 = vld [vmem:[#allocation6 + $0x6e0] sm:$0xf0]  ;;  %2785 = vmatpush.bf16.msra.mxu3 %v5485_v2  ;;  %v4817_v0 = vor.u32 %v6055_v56, %v4816_v55  ;;  %v5919_v2 = vld [vmem:[#allocation6 + $0x1a4] sm:$0xf0] }
  0xb0   : > { %v6146_v4 = vld [vmem:[#allocation6 + $0x8c4] sm:$0xf]  ;;  %2759 = vmatpush.bf16.msra.mxu1 %v4973_v61  ;;  %v4941_v11 = vor.u32 %v6082_v1, %v4938_v3  ;;  %v4272_v1 = vld [vmem:[#allocation6 + $0x188] sm:$0xf] }
  0xb1   : > { %v5194_v5 = vld [vmem:[#allocation6 + $0x8e0] sm:$0xf0]  ;;  %v4528_v3 = vld [vmem:[#allocation6 + $0x388] sm:$0xf] }
  0xb2   : > { %v6210_v6 = vld [vmem:[#allocation6 + $0xac4] sm:$0xf]  ;;  %v5197_v12 = vor.u32 %v6146_v4, %v5194_v5  ;;  %2747 = vmatpush.bf16.msra.mxu0 %v4685_v10  ;;  %v5073_v4 = vor.u32 %v6119_v60, %v5072_v59  ;;  %v5983_v5 = vld [vmem:[#allocation6 + $0x3a4] sm:$0xf0] }
  0xb3   : > { %v5450_v7 = vld [vmem:[#allocation6 + $0xae0] sm:$0xf0]  ;;  %v5040_v10 = vld [vmem:[#allocation6 + $0x788] sm:$0xf] }
  0xb4   : > { %v6010_v13 = vld [vmem:[#allocation6 + $0x484] sm:$0xf]  ;;  %v5453_v17 = vor.u32 %v6210_v6, %v5450_v7  ;;  %2760 = vmatpush.bf16.msra.mxu1 %v4941_v11  ;;  %2773 = vmatpush.bf16.msra.mxu2 %v5197_v12  ;;  %v4784_v6 = vld [vmem:[#allocation6 + $0x588] sm:$0xf]  ;;  %v4273_v12 = vor.u32 %v5919_v2, %v4272_v1 }
  0xb5   : > { %v4650_v14 = vld [vmem:[#allocation6 + $0x4a0] sm:$0xf0]  ;;  %v6047_v7 = vld [vmem:[#allocation6 + $0x5a4] sm:$0xf0] }
  0xb6   : > { %v6074_v16 = vld [vmem:[#allocation6 + $0x684] sm:$0xf]  ;;  %v4653_v23 = vor.u32 %v6010_v13, %v4650_v14  ;;  %2786 = vmatpush.bf16.msra.mxu3 %v5453_v17  ;;  %v6111_v11 = vld [vmem:[#allocation6 + $0x7a4] sm:$0xf0]  ;;  %v4529_v13 = vor.u32 %v5983_v5, %v4528_v3  ;;  %v4785_v14 = vor.u32 %v6047_v7, %v4784_v6 }
  0xb7   : > { %v4906_v18 = vld [vmem:[#allocation6 + $0x6a0] sm:$0xf0]  ;;  %v5911_v17 = vld [vmem:[#allocation6 + $0x164] sm:$0xf0] }
  0xb8   : > { %v6138_v19 = vld [vmem:[#allocation6 + $0x884] sm:$0xf]  ;;  %v4909_v24 = vor.u32 %v6074_v16, %v4906_v18  ;;  %2748 = vmatpush.bf16.msra.mxu0 %v4653_v23  ;;  %v4240_v16 = vld [vmem:[#allocation6 + $0x148] sm:$0xf] }
  0xb9   : > { %v5162_v20 = vld [vmem:[#allocation6 + $0x8a0] sm:$0xf0]  ;;  %v4496_v18 = vld [vmem:[#allocation6 + $0x348] sm:$0xf] }
  0xba   : > { %v6202_v21 = vld [vmem:[#allocation6 + $0xa84] sm:$0xf]  ;;  %v5165_v26 = vor.u32 %v6138_v19, %v5162_v20  ;;  %2761 = vmatpush.bf16.msra.mxu1 %v4909_v24  ;;  %v5041_v19 = vor.u32 %v6111_v11, %v5040_v10  ;;  %v5975_v20 = vld [vmem:[#allocation6 + $0x364] sm:$0xf0] }
  0xbb   : > { %v5418_v22 = vld [vmem:[#allocation6 + $0xaa0] sm:$0xf0]  ;;  %v5008_v23 = vld [vmem:[#allocation6 + $0x748] sm:$0xf] }
  0xbc   : > { %v6002_v27 = vld [vmem:[#allocation6 + $0x444] sm:$0xf]  ;;  %v5421_v30 = vor.u32 %v6202_v21, %v5418_v22  ;;  %2774 = vmatpush.bf16.msra.mxu2 %v5165_v26  ;;  %v4752_v21 = vld [vmem:[#allocation6 + $0x548] sm:$0xf]  ;;  %v4241_v26 = vor.u32 %v5911_v17, %v4240_v16 }
  0xbd   : > { %v4618_v28 = vld [vmem:[#allocation6 + $0x460] sm:$0xf0]  ;;  %v6039_v22 = vld [vmem:[#allocation6 + $0x564] sm:$0xf0] }
  0xbe   : > { %v6066_v29 = vld [vmem:[#allocation6 + $0x644] sm:$0xf]  ;;  %v4621_v38 = vor.u32 %v6002_v27, %v4618_v28  ;;  %2787 = vmatpush.bf16.msra.mxu3 %v5421_v30  ;;  %v6103_v24 = vld [vmem:[#allocation6 + $0x764] sm:$0xf0]  ;;  %v4497_v27 = vor.u32 %v5975_v20, %v4496_v18  ;;  %v4753_v28 = vor.u32 %v6039_v22, %v4752_v21 }
  0xbf   : > { %v4874_v31 = vld [vmem:[#allocation6 + $0x660] sm:$0xf0]  ;;  %v5903_v30 = vld [vmem:[#allocation6 + $0x124] sm:$0xf0] }
  0xc0   : > { %v6130_v33 = vld [vmem:[#allocation6 + $0x844] sm:$0xf]  ;;  %v4877_v41 = vor.u32 %v6066_v29, %v4874_v31  ;;  %2749 = vmatpush.bf16.msra.mxu0 %v4621_v38  ;;  %v4208_v29 = vld [vmem:[#allocation6 + $0x108] sm:$0xf] }
  0xc1   : > { %v5130_v34 = vld [vmem:[#allocation6 + $0x860] sm:$0xf0]  ;;  %v4464_v31 = vld [vmem:[#allocation6 + $0x308] sm:$0xf] }
  0xc2   : > { %v6194_v36 = vld [vmem:[#allocation6 + $0xa44] sm:$0xf]  ;;  %v5133_v42 = vor.u32 %v6130_v33, %v5130_v34  ;;  %2762 = vmatpush.bf16.msra.mxu1 %v4877_v41  ;;  %v5009_v33 = vor.u32 %v6103_v24, %v5008_v23  ;;  %v5967_v34 = vld [vmem:[#allocation6 + $0x324] sm:$0xf0] }
  0xc3   : > { %v5386_v37 = vld [vmem:[#allocation6 + $0xa60] sm:$0xf0]  ;;  %v4976_v38 = vld [vmem:[#allocation6 + $0x708] sm:$0xf]  ;;  %v4465_v41 = vor.u32 %v5967_v34, %v4464_v31  ;;  %v5923_v34 = vld [vmem:[#allocation6 + $0x1cc] sm:$0xf] }
  0xc4   : > { %v5994_v39 = vld [vmem:[#allocation6 + $0x404] sm:$0xf]  ;;  %v5389_v46 = vor.u32 %v6194_v36, %v5386_v37  ;;  %2775 = vmatpush.bf16.msra.mxu2 %v5133_v42  ;;  %v4720_v36 = vld [vmem:[#allocation6 + $0x508] sm:$0xf] }
  0xc5   : > { %v4586_v40 = vld [vmem:[#allocation6 + $0x420] sm:$0xf0]  ;;  %v6031_v37 = vld [vmem:[#allocation6 + $0x524] sm:$0xf0] }
  0xc6   : > { %v6058_v43 = vld [vmem:[#allocation6 + $0x604] sm:$0xf]  ;;  %v4589_v53 = vor.u32 %v5994_v39, %v4586_v40  ;;  %2788 = vmatpush.bf16.msra.mxu3 %v5389_v46  ;;  %v6095_v39 = vld [vmem:[#allocation6 + $0x724] sm:$0xf0]  ;;  %v4209_v40 = vor.u32 %v5903_v30, %v4208_v29  ;;  %v4721_v42 = vor.u32 %v6031_v37, %v4720_v36  ;;  %v4306_v36 = vld [vmem:[#allocation6 + $0x1e8] sm:$0xf0] }
  0xc7   : > { %v4842_v44 = vld [vmem:[#allocation6 + $0x620] sm:$0xf0]  ;;  %v4977_v46 = vor.u32 %v6095_v39, %v4976_v38  ;;  %v4944_v50 = vld [vmem:[#allocation6 + $0x6c8] sm:$0xf]  ;;  %v5987_v39 = vld [vmem:[#allocation6 + $0x3cc] sm:$0xf] }
  0xc8   : > { %v6122_v45 = vld [vmem:[#allocation6 + $0x804] sm:$0xf]  ;;  %v4845_v57 = vor.u32 %v6058_v43, %v4842_v44  ;;  %2750 = vmatpush.bf16.msra.mxu0 %v4589_v53  ;;  %v4176_v43 = vld [vmem:[#allocation6 + $0xc8] sm:$0xf] }
  0xc9   : > { %v5098_v47 = vld [vmem:[#allocation6 + $0x820] sm:$0xf0]  ;;  %v5895_v44 = vld [vmem:[#allocation6 + $0xe4] sm:$0xf0] }
  0xca   : > { %v6186_v48 = vld [vmem:[#allocation6 + $0xa04] sm:$0xf]  ;;  %v5101_v58 = vor.u32 %v6122_v45, %v5098_v47  ;;  %2763 = vmatpush.bf16.msra.mxu1 %v4845_v57  ;;  %v4432_v45 = vld [vmem:[#allocation6 + $0x2c8] sm:$0xf]  ;;  %v4177_v52 = vor.u32 %v5895_v44, %v4176_v43  ;;  %v4309_v44 = vor.u32 %v5923_v34, %v4306_v36 }
  0xcb   : > { %v5354_v49 = vld [vmem:[#allocation6 + $0xa20] sm:$0xf0]  ;;  %2751 = vmatmul.bf16.vlgmr.msra.gmra.mxu0 %v6806_v8  ;;  %v5959_v47 = vld [vmem:[#allocation6 + $0x2e4] sm:$0xf0] }
  0xcc   : > { %v5357_v61 = vor.u32 %v6186_v48, %v5354_v49  ;;  %2776 = vmatpush.bf16.msra.mxu2 %v5101_v58  ;;  %2795 = vmatpush.bf16.msrb.mxu0 %v4305_v62  ;;  %v4688_v48 = vld [vmem:[#allocation6 + $0x4c8] sm:$0xf]  ;;  %v4433_v53 = vor.u32 %v5959_v47, %v4432_v45 }
  0xcd   : > { %2764 = vmatmul.bf16.vlgmr.msra.gmra.mxu1 %v6811_v15  ;;  %v6023_v49 = vld [vmem:[#allocation6 + $0x4e4] sm:$0xf0] }
  0xce   : > { %2789 = vmatpush.bf16.msra.mxu3 %v5357_v61  ;;  %2808 = vmatpush.bf16.msrb.mxu1 %v4561_v63  ;;  %v6087_v51 = vld [vmem:[#allocation6 + $0x6e4] sm:$0xf0]  ;;  %v4689_v54 = vor.u32 %v6023_v49, %v4688_v48 }
  0xcf   : > { %2777 = vmatmul.bf16.vlgmr.msra.gmra.mxu2 %v6822_v32  ;;  %v4144_v55 = vld [vmem:[#allocation6 + $0x88] sm:$0xf]  ;;  %v4945_v58 = vor.u32 %v6087_v51, %v4944_v50  ;;  %v5915_v50 = vld [vmem:[#allocation6 + $0x18c] sm:$0xf] }
  0xd0   : > { %2821 = vmatpush.bf16.msrb.mxu2 %v4817_v0  ;;  %2796 = vmatpush.bf16.msrb.mxu0 %v4273_v12  ;;  %v5887_v56 = vld [vmem:[#allocation6 + $0xa4] sm:$0xf0]  ;;  %v4274_v51 = vld [vmem:[#allocation6 + $0x1a8] sm:$0xf0] }
  0xd1   : > { %2790 = vmatmul.bf16.vlgmr.msra.gmra.mxu3 %v6824_v35  ;;  %v4400_v57 = vld [vmem:[#allocation6 + $0x288] sm:$0xf]  ;;  %v4145_v0 = vor.u32 %v5887_v56, %v4144_v55  ;;  %v4277_v56 = vor.u32 %v5915_v50, %v4274_v51 }
  0xd2   : > { %2834 = vmatpush.bf16.msrb.mxu3 %v5073_v4  ;;  %2809 = vmatpush.bf16.msrb.mxu1 %v4529_v13  ;;  %v5951_v59 = vld [vmem:[#allocation6 + $0x2a4] sm:$0xf0] }
  0xd3   : > { %v4656_v60 = vld [vmem:[#allocation6 + $0x488] sm:$0xf]  ;;  %v4401_v1 = vor.u32 %v5951_v59, %v4400_v57 }
  0xd4   : > { %2822 = vmatpush.bf16.msrb.mxu2 %v4785_v14  ;;  %2797 = vmatpush.bf16.msrb.mxu0 %v4241_v26  ;;  %v6015_v61 = vld [vmem:[#allocation6 + $0x4a4] sm:$0xf0] }
  0xd5   : > { %v4912_v62 = vld [vmem:[#allocation6 + $0x688] sm:$0xf]  ;;  %v4657_v2 = vor.u32 %v6015_v61, %v4656_v60 }
  0xd6   : > { %2835 = vmatpush.bf16.msrb.mxu3 %v5041_v19  ;;  %2810 = vmatpush.bf16.msrb.mxu1 %v4497_v27  ;;  %v6079_v63 = vld [vmem:[#allocation6 + $0x6a4] sm:$0xf0] }
  0xd7   : > { %v4112_v3 = vld [vmem:[#allocation6 + $0x48] sm:$0xf]  ;;  %v4913_v6 = vor.u32 %v6079_v63, %v4912_v62  ;;  %v5907_v62 = vld [vmem:[#allocation6 + $0x14c] sm:$0xf] }
  0xd8   : > { %2823 = vmatpush.bf16.msrb.mxu2 %v4753_v28  ;;  %2798 = vmatpush.bf16.msrb.mxu0 %v4209_v40  ;;  %v5879_v4 = vld [vmem:[#allocation6 + $0x64] sm:$0xf0]  ;;  %v4562_v40 = vld [vmem:[#allocation6 + $0x3e8] sm:$0xf0] }
  0xd9   : > { %v4368_v5 = vld [vmem:[#allocation6 + $0x248] sm:$0xf]  ;;  %v4113_v14 = vor.u32 %v5879_v4, %v4112_v3  ;;  %v4565_v48 = vor.u32 %v5987_v39, %v4562_v40  ;;  %v4242_v63 = vld [vmem:[#allocation6 + $0x168] sm:$0xf0] }
  0xda   : > { %2836 = vmatpush.bf16.msrb.mxu3 %v5009_v33  ;;  %2811 = vmatpush.bf16.msrb.mxu1 %v4465_v41  ;;  %v5943_v7 = vld [vmem:[#allocation6 + $0x264] sm:$0xf0]  ;;  %v4245_v4 = vor.u32 %v5907_v62, %v4242_v63  ;;  %v5883_v40 = vld [vmem:[#allocation6 + $0x8c] sm:$0xf] }
  0xdb   : > { %v4624_v10 = vld [vmem:[#allocation6 + $0x448] sm:$0xf]  ;;  %v4369_v18 = vor.u32 %v5943_v7, %v4368_v5  ;;  %v5867_v63 = vld [vmem:[#allocation6 + $0xc] sm:$0xf] }
  0xdc   : > { %2824 = vmatpush.bf16.msrb.mxu2 %v4721_v42  ;;  %2799 = vmatpush.bf16.msrb.mxu0 %v4177_v52  ;;  %v6007_v11 = vld [vmem:[#allocation6 + $0x464] sm:$0xf0]  ;;  %v5979_v52 = vld [vmem:[#allocation6 + $0x38c] sm:$0xf] }
  0xdd   : > { %v4880_v12 = vld [vmem:[#allocation6 + $0x648] sm:$0xf]  ;;  %v4625_v19 = vor.u32 %v6007_v11, %v4624_v10 }
  0xde   : > { %2837 = vmatpush.bf16.msrb.mxu3 %v4977_v46  ;;  %2812 = vmatpush.bf16.msrb.mxu1 %v4433_v53  ;;  %v6071_v13 = vld [vmem:[#allocation6 + $0x664] sm:$0xf0]  ;;  %v4530_v53 = vld [vmem:[#allocation6 + $0x3a8] sm:$0xf0] }
  0xdf   : > { %v4080_v16 = vld [vmem:[#allocation6 + $0x8] sm:$0xf]  ;;  %v4881_v23 = vor.u32 %v6071_v13, %v4880_v12  ;;  %v4533_v60 = vor.u32 %v5979_v52, %v4530_v53  ;;  %v5899_v12 = vld [vmem:[#allocation6 + $0x10c] sm:$0xf] }
  0xe0   : > { %2825 = vmatpush.bf16.msrb.mxu2 %v4689_v54  ;;  %2800 = vmatpush.bf16.msrb.mxu0 %v4145_v0  ;;  %v5871_v17 = vld [vmem:[#allocation6 + $0x24] sm:$0xf0]  ;;  %v5971_v0 = vld [vmem:[#allocation6 + $0x34c] sm:$0xf] }
  0xe1   : > { %v4336_v20 = vld [vmem:[#allocation6 + $0x208] sm:$0xf]  ;;  %v4081_v31 = vor.u32 %v5871_v17, %v4080_v16  ;;  %v4210_v13 = vld [vmem:[#allocation6 + $0x128] sm:$0xf0] }
  0xe2   : > { %2838 = vmatpush.bf16.msrb.mxu3 %v4945_v58  ;;  %2813 = vmatpush.bf16.msrb.mxu1 %v4401_v1  ;;  %v5935_v21 = vld [vmem:[#allocation6 + $0x224] sm:$0xf0]  ;;  %v4498_v1 = vld [vmem:[#allocation6 + $0x368] sm:$0xf0] }
  0xe3   : > { %v4592_v22 = vld [vmem:[#allocation6 + $0x408] sm:$0xf]  ;;  %v4337_v37 = vor.u32 %v5935_v21, %v4336_v20  ;;  %v4501_v10 = vor.u32 %v5971_v0, %v4498_v1  ;;  %v4466_v16 = vld [vmem:[#allocation6 + $0x328] sm:$0xf0] }
  0xe4   : > { %2826 = vmatpush.bf16.msrb.mxu2 %v4657_v2  ;;  %v5999_v24 = vld [vmem:[#allocation6 + $0x424] sm:$0xf0]  ;;  %2801 = vmatpush.bf16.msrb.mxu0 %v4113_v14  ;;  %v5963_v14 = vld [vmem:[#allocation6 + $0x30c] sm:$0xf] }
  0xe5   : > { %v4848_v26 = vld [vmem:[#allocation6 + $0x608] sm:$0xf]  ;;  %v4593_v38 = vor.u32 %v5999_v24, %v4592_v22  ;;  %v5875_v52 = vld [vmem:[#allocation6 + $0x4c] sm:$0xf] }
  0xe6   : > { %2839 = vmatpush.bf16.msrb.mxu3 %v4913_v6  ;;  %v6063_v27 = vld [vmem:[#allocation6 + $0x624] sm:$0xf0]  ;;  %2814 = vmatpush.bf16.msrb.mxu1 %v4369_v18  ;;  %v4114_v53 = vld [vmem:[#allocation6 + $0x68] sm:$0xf0] }
  0xe7   : > { %v5328_v28 = vld [vmem:[#allocation6 + $0x9c8] sm:$0xf]  ;;  %v4849_v41 = vor.u32 %v6063_v27, %v4848_v26  ;;  %v5891_v26 = vld [vmem:[#allocation6 + $0xcc] sm:$0xf] }
  0xe8   : > { %v6183_v29 = vld [vmem:[#allocation6 + $0x9e4] sm:$0xf0]  ;;  %2827 = vmatpush.bf16.msrb.mxu2 %v4625_v19  ;;  %2802 = vmatpush.bf16.msrb.mxu0 %v4081_v31  ;;  %v4213_v19 = vor.u32 %v5899_v12, %v4210_v13  ;;  %v4178_v27 = vld [vmem:[#allocation6 + $0xe8] sm:$0xf0] }
  0xe9   : > { %v5584_v30 = vld [vmem:[#allocation6 + $0xbc8] sm:$0xf]  ;;  %v5329_v42 = vor.u32 %v6183_v29, %v5328_v28  ;;  %v5955_v28 = vld [vmem:[#allocation6 + $0x2cc] sm:$0xf] }
  0xea   : > { %v6247_v33 = vld [vmem:[#allocation6 + $0xbe4] sm:$0xf0]  ;;  %2840 = vmatpush.bf16.msrb.mxu3 %v4881_v23  ;;  %2815 = vmatpush.bf16.msrb.mxu1 %v4337_v37  ;;  %v4469_v23 = vor.u32 %v5963_v14, %v4466_v16  ;;  %v4434_v29 = vld [vmem:[#allocation6 + $0x2e8] sm:$0xf0] }
  0xeb   : > { %v5585_v43 = vor.u32 %v6247_v33, %v5584_v30  ;;  %v5296_v45 = vld [vmem:[#allocation6 + $0x988] sm:$0xf]  ;;  %2803 = vmatmul.bf16.vlgmr.msrb.gmra.mxu0 %v6808_v9  ;;  %v4181_v33 = vor.u32 %v5891_v26, %v4178_v27  ;;  %v4082_v1 = vld [vmem:[#allocation6 + $0x28] sm:$0xf0] }
  0xec   : > { %v6175_v46 = vld [vmem:[#allocation6 + $0x9a4] sm:$0xf0]  ;;  %2828 = vmatpush.bf16.msrb.mxu2 %v4593_v38  ;;  %2847 = vmatpush.bf16.msra.mxu0 %v5329_v42  ;;  %v4437_v38 = vor.u32 %v5955_v28, %v4434_v29  ;;  %v5947_v42 = vld [vmem:[#allocation6 + $0x28c] sm:$0xf]  ;;  %v4085_v14 = vor.u32 %v5867_v63, %v4082_v1 }
  0xed   : > { %v5552_v47 = vld [vmem:[#allocation6 + $0xb88] sm:$0xf]  ;;  %v5297_v54 = vor.u32 %v6175_v46, %v5296_v45  ;;  %2816 = vmatmul.bf16.vlgmr.msrb.gmra.mxu1 %v6817_v25  ;;  %v5330_v12 = vld [vmem:[#allocation6 + $0x9e8] sm:$0xf0] }
  0xee   : > { %v6239_v49 = vld [vmem:[#allocation6 + $0xba4] sm:$0xf0]  ;;  %2841 = vmatpush.bf16.msrb.mxu3 %v4849_v41  ;;  %2860 = vmatpush.bf16.msra.mxu1 %v5585_v43  ;;  %v4146_v41 = vld [vmem:[#allocation6 + $0xa8] sm:$0xf0] }
  0xef   : > { %v5553_v55 = vor.u32 %v6239_v49, %v5552_v47  ;;  %v5264_v57 = vld [vmem:[#allocation6 + $0x948] sm:$0xf]  ;;  %2829 = vmatmul.bf16.vlgmr.msrb.gmra.mxu2 %v6806_v8  ;;  %v4402_v43 = vld [vmem:[#allocation6 + $0x2a8] sm:$0xf0]  ;;  %v4149_v46 = vor.u32 %v5883_v40, %v4146_v41 }
  0xf0   : > { %2873 = vmatpush.bf16.msra.mxu2 %v4309_v44  ;;  %v6167_v58 = vld [vmem:[#allocation6 + $0x964] sm:$0xf0]  ;;  %2848 = vmatpush.bf16.msra.mxu0 %v5297_v54  ;;  %v4405_v50 = vor.u32 %v5947_v42, %v4402_v43  ;;  %v5939_v54 = vld [vmem:[#allocation6 + $0x24c] sm:$0xf] }
  0xf1   : > { %v5520_v59 = vld [vmem:[#allocation6 + $0xb48] sm:$0xf]  ;;  %2842 = vmatmul.bf16.vlgmr.msrb.gmra.mxu3 %v6811_v15  ;;  %v5265_v2 = vor.u32 %v6167_v58, %v5264_v57  ;;  %v6243_v16 = vld [vmem:[#allocation6 + $0xbcc] sm:$0xf] }
  0xf2   : > { %2886 = vmatpush.bf16.msra.mxu3 %v4565_v48  ;;  %v6231_v61 = vld [vmem:[#allocation6 + $0xb64] sm:$0xf0]  ;;  %2861 = vmatpush.bf16.msra.mxu1 %v5553_v55  ;;  %v4370_v55 = vld [vmem:[#allocation6 + $0x268] sm:$0xf0] }
  0xf3   : > { %v5521_v3 = vor.u32 %v6231_v61, %v5520_v59  ;;  %v5232_v5 = vld [vmem:[#allocation6 + $0x908] sm:$0xf]  ;;  %v4373_v0 = vor.u32 %v5939_v54, %v4370_v55  ;;  %v5042_v27 = vld [vmem:[#allocation6 + $0x7a8] sm:$0xf0] }
  0xf4   : > { %2874 = vmatpush.bf16.msra.mxu2 %v4277_v56  ;;  %v6159_v6 = vld [vmem:[#allocation6 + $0x924] sm:$0xf0]  ;;  %2849 = vmatpush.bf16.msra.mxu0 %v5265_v2  ;;  %v5931_v2 = vld [vmem:[#allocation6 + $0x20c] sm:$0xf] }
  0xf5   : > { %v5488_v7 = vld [vmem:[#allocation6 + $0xb08] sm:$0xf]  ;;  %v5233_v17 = vor.u32 %v6159_v6, %v5232_v5  ;;  %v4818_v5 = vld [vmem:[#allocation6 + $0x5e8] sm:$0xf0] }
  0xf6   : > { %2887 = vmatpush.bf16.msra.mxu3 %v4533_v60  ;;  %v6223_v11 = vld [vmem:[#allocation6 + $0xb24] sm:$0xf0]  ;;  %2862 = vmatpush.bf16.msra.mxu1 %v5521_v3  ;;  %v4117_v60 = vor.u32 %v5875_v52, %v4114_v53  ;;  %v4338_v3 = vld [vmem:[#allocation6 + $0x228] sm:$0xf0] }
  0xf7   : > { %v5489_v18 = vor.u32 %v6223_v11, %v5488_v7  ;;  %v5200_v20 = vld [vmem:[#allocation6 + $0x8c8] sm:$0xf]  ;;  %v6115_v6 = vld [vmem:[#allocation6 + $0x7cc] sm:$0xf] }
  0xf8   : > { %2875 = vmatpush.bf16.msra.mxu2 %v4245_v4  ;;  %v6151_v21 = vld [vmem:[#allocation6 + $0x8e4] sm:$0xf0]  ;;  %2850 = vmatpush.bf16.msra.mxu0 %v5233_v17  ;;  %v6051_v4 = vld [vmem:[#allocation6 + $0x5cc] sm:$0xf] }
  0xf9   : > { %v5456_v22 = vld [vmem:[#allocation6 + $0xac8] sm:$0xf]  ;;  %v5201_v30 = vor.u32 %v6151_v21, %v5200_v20  ;;  %v6179_v11 = vld [vmem:[#allocation6 + $0x9cc] sm:$0xf] }
  0xfa   : > { %2888 = vmatpush.bf16.msra.mxu3 %v4501_v10  ;;  %v6215_v24 = vld [vmem:[#allocation6 + $0xae4] sm:$0xf0]  ;;  %2863 = vmatpush.bf16.msra.mxu1 %v5489_v18  ;;  %v5074_v10 = vld [vmem:[#allocation6 + $0x7e8] sm:$0xf0]  ;;  %v4341_v18 = vor.u32 %v5931_v2, %v4338_v3  ;;  %v5333_v21 = vor.u32 %v6179_v11, %v5330_v12 }
  0xfb   : > { %v5457_v31 = vor.u32 %v6215_v24, %v5456_v22  ;;  %v5168_v34 = vld [vmem:[#allocation6 + $0x888] sm:$0xf]  ;;  %v5586_v17 = vld [vmem:[#allocation6 + $0xbe8] sm:$0xf0]  ;;  %v5077_v20 = vor.u32 %v6115_v6, %v5074_v10 }
  0xfc   : > { %2876 = vmatpush.bf16.msra.mxu2 %v4213_v19  ;;  %v6143_v36 = vld [vmem:[#allocation6 + $0x8a4] sm:$0xf0]  ;;  %2851 = vmatpush.bf16.msra.mxu0 %v5201_v30  ;;  %v4821_v19 = vor.u32 %v6051_v4, %v4818_v5  ;;  %v6043_v22 = vld [vmem:[#allocation6 + $0x58c] sm:$0xf]  ;;  %v5589_v26 = vor.u32 %v6243_v16, %v5586_v17 }
  0xfd   : > { %v5424_v37 = vld [vmem:[#allocation6 + $0xa88] sm:$0xf]  ;;  %v5169_v44 = vor.u32 %v6143_v36, %v5168_v34  ;;  %v6107_v24 = vld [vmem:[#allocation6 + $0x78c] sm:$0xf] }
  0xfe   : > { %2889 = vmatpush.bf16.msra.mxu3 %v4469_v23  ;;  %v6207_v39 = vld [vmem:[#allocation6 + $0xaa4] sm:$0xf0]  ;;  %2864 = vmatpush.bf16.msra.mxu1 %v5457_v31  ;;  %v4786_v23 = vld [vmem:[#allocation6 + $0x5a8] sm:$0xf0]  ;;  %v5045_v34 = vor.u32 %v6107_v24, %v5042_v27  ;;  %v2661_v27 = vpop.f32.mrf.mxu1 }
  0xff   : > { %v5425_v45 = vor.u32 %v6207_v39, %v5424_v37  ;;  %v5136_v47 = vld [vmem:[#allocation6 + $0x848] sm:$0xf]  ;;  %v6171_v28 = vld [vmem:[#allocation6 + $0x98c] sm:$0xf] }
 0x100   : > { %2877 = vmatpush.bf16.msra.mxu2 %v4181_v33  ;;  %v6135_v48 = vld [vmem:[#allocation6 + $0x864] sm:$0xf0]  ;;  %2852 = vmatpush.bf16.msra.mxu0 %v5169_v44  ;;  %v5298_v29 = vld [vmem:[#allocation6 + $0x9a8] sm:$0xf0]  ;;  %v4789_v33 = vor.u32 %v6043_v22, %v4786_v23 }
 0x101   : > { %v5392_v49 = vld [vmem:[#allocation6 + $0xa48] sm:$0xf]  ;;  %v5137_v56 = vor.u32 %v6135_v48, %v5136_v47  ;;  %v6235_v30 = vld [vmem:[#allocation6 + $0xb8c] sm:$0xf]  ;;  %v5301_v36 = vor.u32 %v6171_v28, %v5298_v29 }
 0x102   : > { %2890 = vmatpush.bf16.msra.mxu3 %v4437_v38  ;;  %v6199_v51 = vld [vmem:[#allocation6 + $0xa64] sm:$0xf0]  ;;  %2865 = vmatpush.bf16.msra.mxu1 %v5425_v45  ;;  %v5554_v31 = vld [vmem:[#allocation6 + $0xba8] sm:$0xf0] }
 0x103   : > { %v5104_v57 = vld [vmem:[#allocation6 + $0x808] sm:$0xf]  ;;  %v5393_v59 = vor.u32 %v6199_v51, %v5392_v49  ;;  %v6035_v37 = vld [vmem:[#allocation6 + $0x54c] sm:$0xf]  ;;  %v5557_v40 = vor.u32 %v6235_v30, %v5554_v31 }
 0x104   : > { %v6127_v58 = vld [vmem:[#allocation6 + $0x824] sm:$0xf0]  ;;  %2878 = vmatpush.bf16.msra.mxu2 %v4149_v46  ;;  %2853 = vmatpush.bf16.msra.mxu0 %v5137_v56  ;;  %v4754_v38 = vld [vmem:[#allocation6 + $0x568] sm:$0xf0]  ;;  %v6842_v56 = vld [vmem:[#allocation8] sm:$0xff] }
 0x105   : > { %v5360_v61 = vld [vmem:[#allocation6 + $0xa08] sm:$0xf]  ;;  %v5105_v7 = vor.u32 %v6127_v58, %v5104_v57  ;;  %v6099_v39 = vld [vmem:[#allocation6 + $0x74c] sm:$0xf]  ;;  %v4757_v46 = vor.u32 %v6035_v37, %v4754_v38  ;;  %v703_v1 = vperm.slane %v6842_v56, 0 }
 0x106   : > { %v6191_v62 = vld [vmem:[#allocation6 + $0xa24] sm:$0xf0]  ;;  %2891 = vmatpush.bf16.msra.mxu3 %v4405_v50  ;;  %2866 = vmatpush.bf16.msra.mxu1 %v5393_v59  ;;  %v5010_v41 = vld [vmem:[#allocation6 + $0x768] sm:$0xf0] }
 0x107   : > { %v5361_v13 = vor.u32 %v6191_v62, %v5360_v61  ;;  %v6163_v42 = vld [vmem:[#allocation6 + $0x94c] sm:$0xf]  ;;  %v5013_v48 = vor.u32 %v6099_v39, %v5010_v41 }
 0x108   : > { %2879 = vmatpush.bf16.msra.mxu2 %v4117_v60  ;;  %2854 = vmatpush.bf16.msra.mxu0 %v5105_v7  ;;  %v5266_v43 = vld [vmem:[#allocation6 + $0x968] sm:$0xf0] }
 0x109   : > { %v6227_v44 = vld [vmem:[#allocation6 + $0xb4c] sm:$0xf]  ;;  %v5269_v49 = vor.u32 %v6163_v42, %v5266_v43 }
 0x10a   : > { %2892 = vmatpush.bf16.msra.mxu3 %v4373_v0  ;;  %2867 = vmatpush.bf16.msra.mxu1 %v5361_v13  ;;  %v5522_v45 = vld [vmem:[#allocation6 + $0xb68] sm:$0xf0]  ;;  %v2648_v11 = vpop.f32.mrf.mxu0 }
 0x10b   : > { %2855 = vmatmul.bf16.vlgmr.msra.gmra.mxu0 %v6822_v32  ;;  %v6027_v47 = vld [vmem:[#allocation6 + $0x50c] sm:$0xf]  ;;  %v5525_v53 = vor.u32 %v6227_v44, %v5522_v45  ;;  %v2687_v44 = vpop.f32.mrf.mxu3 }
 0x10c   : > { %2880 = vmatpush.bf16.msra.mxu2 %v4085_v14  ;;  %2899 = vmatpush.bf16.msrb.mxu0 %v4821_v19  ;;  %v4722_v50 = vld [vmem:[#allocation6 + $0x528] sm:$0xf0] }
 0x10d   : > { %2868 = vmatmul.bf16.vlgmr.msra.gmra.mxu1 %v6824_v35  ;;  %v6091_v51 = vld [vmem:[#allocation6 + $0x70c] sm:$0xf]  ;;  %v4725_v59 = vor.u32 %v6027_v47, %v4722_v50 }
 0x10e   : > { %2893 = vmatpush.bf16.msra.mxu3 %v4341_v18  ;;  %2912 = vmatpush.bf16.msrb.mxu1 %v5077_v20  ;;  %v4978_v52 = vld [vmem:[#allocation6 + $0x728] sm:$0xf0]  ;;  %v2649_v18 = vadd.f32 %v2648_v11, %v703_v1  ;;  %v4824_v1 = vld [vmem:[#allocation6 + $0x5d0] sm:$0xf] }
 0x10f   : > { %2881 = vmatmul.bf16.vlgmr.msra.gmra.mxu2 %v6808_v9  ;;  %v6155_v54 = vld [vmem:[#allocation6 + $0x90c] sm:$0xf]  ;;  %v4981_v61 = vor.u32 %v6091_v51, %v4978_v52 }
 0x110   : > { %2925 = vmatpush.bf16.msrb.mxu2 %v5333_v21  ;;  %2900 = vmatpush.bf16.msrb.mxu0 %v4789_v33  ;;  %v5234_v55 = vld [vmem:[#allocation6 + $0x928] sm:$0xf0] }
 0x111   : > { %2894 = vmatmul.bf16.vlgmr.msra.gmra.mxu3 %v6817_v25  ;;  %v6219_v57 = vld [vmem:[#allocation6 + $0xb0c] sm:$0xf]  ;;  %v5237_v62 = vor.u32 %v6155_v54, %v5234_v55 }
 0x112   : > { %2938 = vmatpush.bf16.msrb.mxu3 %v5589_v26  ;;  %2913 = vmatpush.bf16.msrb.mxu1 %v5045_v34  ;;  %v5490_v58 = vld [vmem:[#allocation6 + $0xb28] sm:$0xf0]  ;;  %v2662_v34 = vadd.f32 %v2661_v27, %v2649_v18  ;;  %v4536_v18 = vld [vmem:[#allocation6 + $0x390] sm:$0xf] }
 0x113   : > { %v6019_v60 = vld [vmem:[#allocation6 + $0x4cc] sm:$0xf]  ;;  %v5493_v2 = vor.u32 %v6219_v57, %v5490_v58 }
 0x114   : > { %2926 = vmatpush.bf16.msrb.mxu2 %v5301_v36  ;;  %2901 = vmatpush.bf16.msrb.mxu0 %v4757_v46  ;;  %v4690_v63 = vld [vmem:[#allocation6 + $0x4e8] sm:$0xf0] }
 0x115   : > { %v6083_v0 = vld [vmem:[#allocation6 + $0x6cc] sm:$0xf]  ;;  %v4693_v10 = vor.u32 %v6019_v60, %v4690_v63  ;;  %v4312_v60 = vld [vmem:[#allocation6 + $0x1d0] sm:$0xf] }
 0x116   : > { %2939 = vmatpush.bf16.msrb.mxu3 %v5557_v40  ;;  %2914 = vmatpush.bf16.msrb.mxu1 %v5013_v48  ;;  %v4946_v3 = vld [vmem:[#allocation6 + $0x6e8] sm:$0xf0]  ;;  %v2674_v40 = vpop.f32.mrf.mxu2  ;;  %v2650_v48 = vpop.f32.mrf.mxu0 }
 0x117   : > { %v6147_v4 = vld [vmem:[#allocation6 + $0x8cc] sm:$0xf]  ;;  %v4949_v12 = vor.u32 %v6083_v0, %v4946_v3  ;;  %v2675_v43 = vadd.f32 %v2674_v40, %v2662_v34  ;;  %v5992_v0 = vld [vmem:[#allocation6 + $0x3ec] sm:$0xf0]  ;;  %v2663_v3 = vpop.f32.mrf.mxu1 }
 0x118   : > { %2927 = vmatpush.bf16.msrb.mxu2 %v5269_v49  ;;  %v5202_v5 = vld [vmem:[#allocation6 + $0x8e8] sm:$0xf0]  ;;  %2902 = vmatpush.bf16.msrb.mxu0 %v4725_v59  ;;  %v6104_v40 = vld [vmem:[#allocation6 + $0x76c] sm:$0xf0] }
 0x119   : > { %v6211_v6 = vld [vmem:[#allocation6 + $0xacc] sm:$0xf]  ;;  %v5205_v13 = vor.u32 %v6147_v4, %v5202_v5  ;;  %v6845_v54 = vadd.f32 %v2687_v44, %v2675_v43  ;;  %v4216_v44 = vld [vmem:[#allocation6 + $0x110] sm:$0xf] }
 0x11a   : > { %2940 = vmatpush.bf16.msrb.mxu3 %v5525_v53  ;;  %v5458_v7 = vld [vmem:[#allocation6 + $0xae8] sm:$0xf0]  ;;  %2915 = vmatpush.bf16.msrb.mxu1 %v4981_v61  ;;  %v5928_v61 = vld [vmem:[#allocation6 + $0x1ec] sm:$0xf0] }
 0x11b   : > { %v6011_v14 = vld [vmem:[#allocation6 + $0x48c] sm:$0xf]  ;;  %v5461_v19 = vor.u32 %v6211_v6, %v5458_v7  ;;  %v5080_v6 = vld [vmem:[#allocation6 + $0x7d0] sm:$0xf]  ;;  %v4313_v11 = vor.u32 %v5928_v61, %v4312_v60 }
 0x11c   : > { %2928 = vmatpush.bf16.msrb.mxu2 %v5237_v62  ;;  %v4658_v16 = vld [vmem:[#allocation6 + $0x4a8] sm:$0xf0]  ;;  %2903 = vmatpush.bf16.msrb.mxu0 %v4693_v10  ;;  %v4568_v62 = vld [vmem:[#allocation6 + $0x3d0] sm:$0xf] }
 0x11d   : > { %v6075_v17 = vld [vmem:[#allocation6 + $0x68c] sm:$0xf]  ;;  %v4661_v26 = vor.u32 %v6011_v14, %v4658_v16  ;;  %v6120_v7 = vld [vmem:[#allocation6 + $0x7ec] sm:$0xf0] }
 0x11e   : > { %2941 = vmatpush.bf16.msrb.mxu3 %v5493_v2  ;;  %v4914_v20 = vld [vmem:[#allocation6 + $0x6a8] sm:$0xf0]  ;;  %2916 = vmatpush.bf16.msrb.mxu1 %v4949_v12  ;;  %v6056_v2 = vld [vmem:[#allocation6 + $0x5ec] sm:$0xf0]  ;;  %v2676_v12 = vpop.f32.mrf.mxu2 }
 0x11f   : > { %v6139_v21 = vld [vmem:[#allocation6 + $0x88c] sm:$0xf]  ;;  %v4917_v28 = vor.u32 %v6075_v17, %v4914_v20  ;;  %v4825_v14 = vor.u32 %v6056_v2, %v4824_v1  ;;  %v4280_v16 = vld [vmem:[#allocation6 + $0x190] sm:$0xf]  ;;  %v5081_v20 = vor.u32 %v6120_v7, %v5080_v6  ;;  %v704_v7 = vperm.slane %v6842_v56, 1 }
 0x120   : > { %v5170_v22 = vld [vmem:[#allocation6 + $0x8a8] sm:$0xf0]  ;;  %2929 = vmatpush.bf16.msrb.mxu2 %v5205_v13  ;;  %2904 = vmatpush.bf16.msrb.mxu0 %v4661_v26  ;;  %v4569_v13 = vor.u32 %v5992_v0, %v4568_v62  ;;  %v5920_v17 = vld [vmem:[#allocation6 + $0x1ac] sm:$0xf0] }
 0x121   : > { %v6203_v23 = vld [vmem:[#allocation6 + $0xa8c] sm:$0xf]  ;;  %v5173_v29 = vor.u32 %v6139_v21, %v5170_v22  ;;  %v5984_v21 = vld [vmem:[#allocation6 + $0x3ac] sm:$0xf0]  ;;  %v4281_v27 = vor.u32 %v5920_v17, %v4280_v16 }
 0x122   : > { %v5426_v24 = vld [vmem:[#allocation6 + $0xaa8] sm:$0xf0]  ;;  %2942 = vmatpush.bf16.msrb.mxu3 %v5461_v19  ;;  %2917 = vmatpush.bf16.msrb.mxu1 %v4917_v28  ;;  %v2689_v19 = vpop.f32.mrf.mxu3  ;;  %v4792_v22 = vld [vmem:[#allocation6 + $0x590] sm:$0xf]  ;;  %v4537_v28 = vor.u32 %v5984_v21, %v4536_v18 }
 0x123   : > { %v6003_v30 = vld [vmem:[#allocation6 + $0x44c] sm:$0xf]  ;;  %v5429_v36 = vor.u32 %v6203_v23, %v5426_v24  ;;  %v6048_v23 = vld [vmem:[#allocation6 + $0x5ac] sm:$0xf0] }
 0x124   : > { %v4626_v31 = vld [vmem:[#allocation6 + $0x468] sm:$0xf0]  ;;  %2930 = vmatpush.bf16.msrb.mxu2 %v5173_v29  ;;  %v5048_v24 = vld [vmem:[#allocation6 + $0x790] sm:$0xf]  ;;  %v4793_v29 = vor.u32 %v6048_v23, %v4792_v22 }
 0x125   : > { %v6067_v33 = vld [vmem:[#allocation6 + $0x64c] sm:$0xf]  ;;  %v4629_v45 = vor.u32 %v6003_v30, %v4626_v31  ;;  %v6112_v26 = vld [vmem:[#allocation6 + $0x7ac] sm:$0xf0] }
 0x126   : > { %v4882_v37 = vld [vmem:[#allocation6 + $0x668] sm:$0xf0]  ;;  %2943 = vmatpush.bf16.msrb.mxu3 %v5429_v36  ;;  %v4248_v30 = vld [vmem:[#allocation6 + $0x150] sm:$0xf]  ;;  %v5049_v34 = vor.u32 %v6112_v26, %v5048_v24 }
 0x127   : > { %v6131_v38 = vld [vmem:[#allocation6 + $0x84c] sm:$0xf]  ;;  %v4885_v49 = vor.u32 %v6067_v33, %v4882_v37  ;;  %2905 = vmatpush.bf16.msrb.mxu0 %v4629_v45  ;;  %v5912_v31 = vld [vmem:[#allocation6 + $0x16c] sm:$0xf0] }
 0x128   : > { %v5138_v39 = vld [vmem:[#allocation6 + $0x868] sm:$0xf0]  ;;  %v4504_v33 = vld [vmem:[#allocation6 + $0x350] sm:$0xf] }
 0x129   : > { %v6195_v41 = vld [vmem:[#allocation6 + $0xa4c] sm:$0xf]  ;;  %v5141_v50 = vor.u32 %v6131_v38, %v5138_v39  ;;  %2918 = vmatpush.bf16.msrb.mxu1 %v4885_v49  ;;  %v5976_v36 = vld [vmem:[#allocation6 + $0x36c] sm:$0xf0] }
 0x12a   : > { %v5394_v42 = vld [vmem:[#allocation6 + $0xa68] sm:$0xf0]  ;;  %v4760_v37 = vld [vmem:[#allocation6 + $0x550] sm:$0xf]  ;;  %v2739_v24 = vpop.f32.mrf.mxu3 }
 0x12b   : > { %v5995_v46 = vld [vmem:[#allocation6 + $0x40c] sm:$0xf]  ;;  %v5397_v55 = vor.u32 %v6195_v41, %v5394_v42  ;;  %2931 = vmatpush.bf16.msrb.mxu2 %v5141_v50  ;;  %v6040_v38 = vld [vmem:[#allocation6 + $0x56c] sm:$0xf0]  ;;  %v4249_v41 = vor.u32 %v5912_v31, %v4248_v30  ;;  %v4505_v42 = vor.u32 %v5976_v36, %v4504_v33 }
 0x12c   : > { %v4594_v47 = vld [vmem:[#allocation6 + $0x428] sm:$0xf0]  ;;  %v5016_v39 = vld [vmem:[#allocation6 + $0x750] sm:$0xf]  ;;  %v4761_v43 = vor.u32 %v6040_v38, %v4760_v37 }
 0x12d   : > { %v6059_v51 = vld [vmem:[#allocation6 + $0x60c] sm:$0xf]  ;;  %v4597_v63 = vor.u32 %v5995_v46, %v4594_v47  ;;  %2944 = vmatpush.bf16.msrb.mxu3 %v5397_v55  ;;  %v5904_v45 = vld [vmem:[#allocation6 + $0x12c] sm:$0xf0]  ;;  %v5017_v47 = vor.u32 %v6104_v40, %v5016_v39 }
 0x12e   : > { %v4850_v52 = vld [vmem:[#allocation6 + $0x628] sm:$0xf0]  ;;  %v4472_v46 = vld [vmem:[#allocation6 + $0x310] sm:$0xf]  ;;  %v4217_v55 = vor.u32 %v5904_v45, %v4216_v44 }
 0x12f   : > { %v6123_v53 = vld [vmem:[#allocation6 + $0x80c] sm:$0xf]  ;;  %v4853_v4 = vor.u32 %v6059_v51, %v4850_v52  ;;  %2906 = vmatpush.bf16.msrb.mxu0 %v4597_v63  ;;  %v5968_v48 = vld [vmem:[#allocation6 + $0x32c] sm:$0xf0] }
 0x130   : > { %v5106_v57 = vld [vmem:[#allocation6 + $0x828] sm:$0xf0]  ;;  %v4728_v49 = vld [vmem:[#allocation6 + $0x510] sm:$0xf] }
 0x131   : > { %v6187_v58 = vld [vmem:[#allocation6 + $0xa0c] sm:$0xf]  ;;  %v5109_v5 = vor.u32 %v6123_v53, %v5106_v57  ;;  %2919 = vmatpush.bf16.msrb.mxu1 %v4853_v4  ;;  %v6032_v50 = vld [vmem:[#allocation6 + $0x52c] sm:$0xf0]  ;;  %v2700_v53 = vpop.f32.mrf.mxu0 }
 0x132   : > { %v5362_v59 = vld [vmem:[#allocation6 + $0xa28] sm:$0xf0]  ;;  %2907 = vmatmul.bf16.vlgmr.msrb.gmra.mxu0 %v6806_v8  ;;  %v4984_v51 = vld [vmem:[#allocation6 + $0x710] sm:$0xf]  ;;  %v2701_v57 = vadd.f32 %v2700_v53, %v6845_v54  ;;  %v4729_v60 = vor.u32 %v6032_v50, %v4728_v49 }
 0x133   : > { %v5365_v10 = vor.u32 %v6187_v58, %v5362_v59  ;;  %2932 = vmatpush.bf16.msrb.mxu2 %v5109_v5  ;;  %2951 = vmatpush.bf16.msra.mxu0 %v4313_v11  ;;  %v6096_v52 = vld [vmem:[#allocation6 + $0x72c] sm:$0xf0]  ;;  %v2713_v58 = vpop.f32.mrf.mxu1  ;;  %v4473_v59 = vor.u32 %v5968_v48, %v4472_v46 }
 0x134   : > { %2920 = vmatmul.bf16.vlgmr.msrb.gmra.mxu1 %v6811_v15  ;;  %v4184_v61 = vld [vmem:[#allocation6 + $0xd0] sm:$0xf]  ;;  %v4985_v0 = vor.u32 %v6096_v52, %v4984_v51  ;;  %v6852_v4 = vadd.f32 %v2713_v58, %v2701_v57 }
 0x135   : > { %2945 = vmatpush.bf16.msrb.mxu3 %v5365_v10  ;;  %2964 = vmatpush.bf16.msra.mxu1 %v4569_v13  ;;  %v5896_v62 = vld [vmem:[#allocation6 + $0xec] sm:$0xf0] }
 0x136   : > { %2933 = vmatmul.bf16.vlgmr.msrb.gmra.mxu2 %v6822_v32  ;;  %v4440_v63 = vld [vmem:[#allocation6 + $0x2d0] sm:$0xf]  ;;  %v4185_v54 = vor.u32 %v5896_v62, %v4184_v61  ;;  %v2741_v61 = vpop.f32.mrf.mxu3 }
 0x137   : > { %2977 = vmatpush.bf16.msra.mxu2 %v4825_v14  ;;  %2952 = vmatpush.bf16.msra.mxu0 %v4281_v27  ;;  %v5960_v1 = vld [vmem:[#allocation6 + $0x2ec] sm:$0xf0] }
 0x138   : > { %2946 = vmatmul.bf16.vlgmr.msrb.gmra.mxu3 %v6824_v35  ;;  %v4696_v2 = vld [vmem:[#allocation6 + $0x4d0] sm:$0xf]  ;;  %v4441_v10 = vor.u32 %v5960_v1, %v4440_v63  ;;  %v4314_v1 = vld [vmem:[#allocation6 + $0x1f0] sm:$0xf0] }
 0x139   : > { %2990 = vmatpush.bf16.msra.mxu3 %v5081_v20  ;;  %2965 = vmatpush.bf16.msra.mxu1 %v4537_v28  ;;  %v6024_v3 = vld [vmem:[#allocation6 + $0x4ec] sm:$0xf0]  ;;  %v2726_v20 = vpop.f32.mrf.mxu2  ;;  %v2702_v26 = vpop.f32.mrf.mxu0 }
 0x13a   : > { %v4952_v5 = vld [vmem:[#allocation6 + $0x6d0] sm:$0xf]  ;;  %v4697_v11 = vor.u32 %v6024_v3, %v4696_v2  ;;  %v2727_v23 = vadd.f32 %v2726_v20, %v704_v7  ;;  %v5980_v20 = vld [vmem:[#allocation6 + $0x394] sm:$0xf] }
 0x13b   : > { %2978 = vmatpush.bf16.msra.mxu2 %v4793_v29  ;;  %2953 = vmatpush.bf16.msra.mxu0 %v4249_v41  ;;  %v6088_v6 = vld [vmem:[#allocation6 + $0x6ec] sm:$0xf0]  ;;  %v2715_v28 = vpop.f32.mrf.mxu1 }
 0x13c   : > { %v4152_v12 = vld [vmem:[#allocation6 + $0x90] sm:$0xf]  ;;  %v4953_v16 = vor.u32 %v6088_v6, %v4952_v5  ;;  %v6855_v36 = vadd.f32 %v2739_v24, %v2727_v23  ;;  %v5988_v5 = vld [vmem:[#allocation6 + $0x3d4] sm:$0xf] }
 0x13d   : > { %2991 = vmatpush.bf16.msra.mxu3 %v5049_v34  ;;  %2966 = vmatpush.bf16.msra.mxu1 %v4505_v42  ;;  %v5888_v13 = vld [vmem:[#allocation6 + $0xac] sm:$0xf0]  ;;  %v4570_v6 = vld [vmem:[#allocation6 + $0x3f0] sm:$0xf0] }
 0x13e   : > { %v4408_v14 = vld [vmem:[#allocation6 + $0x290] sm:$0xf]  ;;  %v4153_v27 = vor.u32 %v5888_v13, %v4152_v12 }
 0x13f   : > { %2979 = vmatpush.bf16.msra.mxu2 %v4761_v43  ;;  %2954 = vmatpush.bf16.msra.mxu0 %v4217_v55  ;;  %v5952_v17 = vld [vmem:[#allocation6 + $0x2ac] sm:$0xf0] }
 0x140   : > { %v4664_v18 = vld [vmem:[#allocation6 + $0x490] sm:$0xf]  ;;  %v4409_v29 = vor.u32 %v5952_v17, %v4408_v14 }
 0x141   : > { %2992 = vmatpush.bf16.msra.mxu3 %v5017_v47  ;;  %2967 = vmatpush.bf16.msra.mxu1 %v4473_v59  ;;  %v6016_v19 = vld [vmem:[#allocation6 + $0x4ac] sm:$0xf0]  ;;  %v2728_v57 = vpop.f32.mrf.mxu2 }
 0x142   : > { %v4920_v21 = vld [vmem:[#allocation6 + $0x690] sm:$0xf]  ;;  %v4665_v30 = vor.u32 %v6016_v19, %v4664_v18  ;;  %v5916_v18 = vld [vmem:[#allocation6 + $0x194] sm:$0xf] }
 0x143   : > { %2980 = vmatpush.bf16.msra.mxu2 %v4729_v60  ;;  %v6080_v22 = vld [vmem:[#allocation6 + $0x6ac] sm:$0xf0]  ;;  %2955 = vmatpush.bf16.msra.mxu0 %v4185_v54  ;;  %v4282_v19 = vld [vmem:[#allocation6 + $0x1b0] sm:$0xf0] }
 0x144   : > { %v4120_v31 = vld [vmem:[#allocation6 + $0x50] sm:$0xf]  ;;  %v4921_v37 = vor.u32 %v6080_v22, %v4920_v21  ;;  %v4538_v21 = vld [vmem:[#allocation6 + $0x3b0] sm:$0xf0]  ;;  %v4285_v24 = vor.u32 %v5916_v18, %v4282_v19 }
 0x145   : > { %2993 = vmatpush.bf16.msra.mxu3 %v4985_v0  ;;  %2968 = vmatpush.bf16.msra.mxu1 %v4441_v10  ;;  %v5880_v33 = vld [vmem:[#allocation6 + $0x6c] sm:$0xf0]  ;;  %v5924_v0 = vld [vmem:[#allocation6 + $0x1d4] sm:$0xf] }
 0x146   : > { %v4376_v34 = vld [vmem:[#allocation6 + $0x250] sm:$0xf]  ;;  %v4121_v43 = vor.u32 %v5880_v33, %v4120_v31  ;;  %v5908_v31 = vld [vmem:[#allocation6 + $0x154] sm:$0xf] }
 0x147   : > { %2981 = vmatpush.bf16.msra.mxu2 %v4697_v11  ;;  %v5944_v38 = vld [vmem:[#allocation6 + $0x26c] sm:$0xf0]  ;;  %2956 = vmatpush.bf16.msra.mxu0 %v4153_v27  ;;  %v4317_v11 = vor.u32 %v5924_v0, %v4314_v1  ;;  %v4250_v33 = vld [vmem:[#allocation6 + $0x170] sm:$0xf0] }
 0x148   : > { %v4632_v39 = vld [vmem:[#allocation6 + $0x450] sm:$0xf]  ;;  %v4377_v46 = vor.u32 %v5944_v38, %v4376_v34  ;;  %v5972_v34 = vld [vmem:[#allocation6 + $0x354] sm:$0xf] }
 0x149   : > { %2994 = vmatpush.bf16.msra.mxu3 %v4953_v16  ;;  %v6008_v40 = vld [vmem:[#allocation6 + $0x46c] sm:$0xf0]  ;;  %2969 = vmatpush.bf16.msra.mxu1 %v4409_v29  ;;  %v4573_v16 = vor.u32 %v5988_v5, %v4570_v6  ;;  %v4541_v29 = vor.u32 %v5980_v20, %v4538_v21  ;;  %v4186_v0 = vld [vmem:[#allocation6 + $0xf0] sm:$0xf0] }
 0x14a   : > { %v4888_v41 = vld [vmem:[#allocation6 + $0x650] sm:$0xf]  ;;  %v4633_v47 = vor.u32 %v6008_v40, %v4632_v39  ;;  %v4253_v40 = vor.u32 %v5908_v31, %v4250_v33  ;;  %v2765_v57 = vpop.f32.mrf.mxu1  ;;  %v4154_v18 = vld [vmem:[#allocation6 + $0xb0] sm:$0xf0]  ;;  %v3263_v33 = vmax.f32 %v6852_v4, 0.0 }
 0x14b   : > { %v6072_v42 = vld [vmem:[#allocation6 + $0x66c] sm:$0xf0]  ;;  %2982 = vmatpush.bf16.msra.mxu2 %v4665_v30  ;;  %2957 = vmatpush.bf16.msra.mxu0 %v4121_v43  ;;  %v5948_v19 = vld [vmem:[#allocation6 + $0x294] sm:$0xf] }
 0x14c   : > { %v4088_v44 = vld [vmem:[#allocation6 + $0x10] sm:$0xf]  ;;  %v4889_v51 = vor.u32 %v6072_v42, %v4888_v41  ;;  %v4410_v20 = vld [vmem:[#allocation6 + $0x2b0] sm:$0xf0] }
 0x14d   : > { %v5872_v45 = vld [vmem:[#allocation6 + $0x2c] sm:$0xf0]  ;;  %2995 = vmatpush.bf16.msra.mxu3 %v4921_v37  ;;  %2970 = vmatpush.bf16.msra.mxu1 %v4377_v46  ;;  %v4506_v37 = vld [vmem:[#allocation6 + $0x370] sm:$0xf0] }
 0x14e   : > { %v4344_v48 = vld [vmem:[#allocation6 + $0x210] sm:$0xf]  ;;  %v4089_v62 = vor.u32 %v5872_v45, %v4088_v44  ;;  %v4509_v44 = vor.u32 %v5972_v34, %v4506_v37  ;;  %v5900_v46 = vld [vmem:[#allocation6 + $0x114] sm:$0xf]  ;;  %v4413_v37 = vor.u32 %v5948_v19, %v4410_v20 }
 0x14f   : > { %v5936_v49 = vld [vmem:[#allocation6 + $0x22c] sm:$0xf0]  ;;  %2983 = vmatpush.bf16.msra.mxu2 %v4633_v47  ;;  %v4218_v47 = vld [vmem:[#allocation6 + $0x130] sm:$0xf0] }
 0x150   : > { %v4600_v50 = vld [vmem:[#allocation6 + $0x410] sm:$0xf]  ;;  %v4345_v2 = vor.u32 %v5936_v49, %v4344_v48  ;;  %2958 = vmatpush.bf16.msra.mxu0 %v4089_v62  ;;  %v5964_v48 = vld [vmem:[#allocation6 + $0x314] sm:$0xf] }
 0x151   : > { %v6000_v52 = vld [vmem:[#allocation6 + $0x42c] sm:$0xf0]  ;;  %2996 = vmatpush.bf16.msra.mxu3 %v4889_v51  ;;  %v4474_v49 = vld [vmem:[#allocation6 + $0x330] sm:$0xf0]  ;;  %v2752_v51 = vpop.f32.mrf.mxu0 }
 0x152   : > { %v4856_v53 = vld [vmem:[#allocation6 + $0x610] sm:$0xf]  ;;  %v4601_v3 = vor.u32 %v6000_v52, %v4600_v50  ;;  %2971 = vmatpush.bf16.msra.mxu1 %v4345_v2  ;;  %v4477_v61 = vor.u32 %v5964_v48, %v4474_v49  ;;  %v5956_v2 = vld [vmem:[#allocation6 + $0x2d4] sm:$0xf]  ;;  %v2767_v31 = vpop.f32.mrf.mxu1 }
 0x153   : > { %v6064_v55 = vld [vmem:[#allocation6 + $0x62c] sm:$0xf0]  ;;  %2959 = vmatmul.bf16.vlgmr.msra.gmra.mxu0 %v6808_v9  ;;  %v5868_v4 = vld [vmem:[#allocation6 + $0x14] sm:$0xf] }
 0x154   : > { %v5336_v58 = vld [vmem:[#allocation6 + $0x9d0] sm:$0xf]  ;;  %v4857_v7 = vor.u32 %v6064_v55, %v4856_v53  ;;  %2984 = vmatpush.bf16.msra.mxu2 %v4601_v3  ;;  %v4221_v53 = vor.u32 %v5900_v46, %v4218_v47  ;;  %v2753_v55 = vadd.f32 %v2752_v51, %v6855_v36  ;;  %v4442_v3 = vld [vmem:[#allocation6 + $0x2f0] sm:$0xf0] }
 0x155   : > { %v6184_v59 = vld [vmem:[#allocation6 + $0x9ec] sm:$0xf0]  ;;  %2972 = vmatmul.bf16.vlgmr.msra.gmra.mxu1 %v6817_v25  ;;  %v5562_v19 = vld [vmem:[#allocation6 + $0xbb0] sm:$0xf0] }
 0x156   : > { %v5592_v60 = vld [vmem:[#allocation6 + $0xbd0] sm:$0xf]  ;;  %v5337_v54 = vor.u32 %v6184_v59, %v5336_v58  ;;  %2997 = vmatpush.bf16.msra.mxu3 %v4857_v7  ;;  %v2766_v1 = vadd.f32 %v2765_v57, %v2753_v55  ;;  %v4346_v55 = vld [vmem:[#allocation6 + $0x230] sm:$0xf0] }
 0x157   : > { %v6248_v63 = vld [vmem:[#allocation6 + $0xbec] sm:$0xf0]  ;;  %2985 = vmatmul.bf16.vlgmr.msra.gmra.mxu2 %v6806_v8  ;;  %v6228_v31 = vld [vmem:[#allocation6 + $0xb54] sm:$0xf] }
 0x158   : > { %v5593_v10 = vor.u32 %v6248_v63, %v5592_v60  ;;  %v5304_v12 = vld [vmem:[#allocation6 + $0x990] sm:$0xf]  ;;  %3003 = vmatpush.bf16.msrb.mxu0 %v5337_v54  ;;  %3029 = vmatpush.bf16.msrb.mxu2 %v4317_v11  ;;  %v5892_v63 = vld [vmem:[#allocation6 + $0xd4] sm:$0xf]  ;;  %v2778_v54 = vpop.f32.mrf.mxu2 }
 0x159   : > { %v6176_v13 = vld [vmem:[#allocation6 + $0x9ac] sm:$0xf0]  ;;  %2998 = vmatmul.bf16.vlgmr.msra.gmra.mxu3 %v6811_v15  ;;  %v4189_v7 = vor.u32 %v5892_v63, %v4186_v0  ;;  %v6180_v63 = vld [vmem:[#allocation6 + $0x9d4] sm:$0xf] }
 0x15a   : > { %v5560_v14 = vld [vmem:[#allocation6 + $0xb90] sm:$0xf]  ;;  %v5305_v22 = vor.u32 %v6176_v13, %v5304_v12  ;;  %3016 = vmatpush.bf16.msrb.mxu1 %v5593_v10  ;;  %3042 = vmatpush.bf16.msrb.mxu3 %v4573_v16  ;;  %v4445_v12 = vor.u32 %v5956_v2, %v4442_v3  ;;  %v2779_v13 = vadd.f32 %v2778_v54, %v2766_v1  ;;  %v5338_v0 = vld [vmem:[#allocation6 + $0x9f0] sm:$0xf0] }
 0x15b   : > { %v6240_v17 = vld [vmem:[#allocation6 + $0xbac] sm:$0xf0]  ;;  %v6244_v3 = vld [vmem:[#allocation6 + $0xbd4] sm:$0xf] }
 0x15c   : > { %v5561_v23 = vor.u32 %v6240_v17, %v5560_v14  ;;  %v5272_v26 = vld [vmem:[#allocation6 + $0x950] sm:$0xf]  ;;  %3004 = vmatpush.bf16.msrb.mxu0 %v5305_v22  ;;  %3030 = vmatpush.bf16.msrb.mxu2 %v4285_v24  ;;  %v2791_v14 = vpop.f32.mrf.mxu3  ;;  %v5884_v17 = vld [vmem:[#allocation6 + $0x94] sm:$0xf]  ;;  %v2754_v24 = vpop.f32.mrf.mxu0 }
 0x15d   : > { %v6168_v27 = vld [vmem:[#allocation6 + $0x96c] sm:$0xf0]  ;;  %v2792_v21 = vadd.f32 %v2791_v14, %v2779_v13  ;;  %v5050_v14 = vld [vmem:[#allocation6 + $0x7b0] sm:$0xf0] }
 0x15e   : > { %v5528_v28 = vld [vmem:[#allocation6 + $0xb50] sm:$0xf]  ;;  %v5273_v38 = vor.u32 %v6168_v27, %v5272_v26  ;;  %3017 = vmatpush.bf16.msrb.mxu1 %v5561_v23  ;;  %3043 = vmatpush.bf16.msrb.mxu3 %v4541_v29  ;;  %v4157_v27 = vor.u32 %v5884_v17, %v4154_v18  ;;  %v5306_v17 = vld [vmem:[#allocation6 + $0x9b0] sm:$0xf0] }
 0x15f   : > { %v6232_v30 = vld [vmem:[#allocation6 + $0xb6c] sm:$0xf0]  ;;  %v3264_v34 = vmax.f32 %v2792_v21, 0.0  ;;  %v6236_v18 = vld [vmem:[#allocation6 + $0xb94] sm:$0xf] }
 0x160   : > { %v5529_v39 = vor.u32 %v6232_v30, %v5528_v28  ;;  %v5240_v41 = vld [vmem:[#allocation6 + $0x910] sm:$0xf]  ;;  %3005 = vmatpush.bf16.msrb.mxu0 %v5273_v38  ;;  %3031 = vmatpush.bf16.msrb.mxu2 %v4253_v40  ;;  %v5876_v38 = vld [vmem:[#allocation6 + $0x54] sm:$0xf] }
 0x161   : > { %v6160_v42 = vld [vmem:[#allocation6 + $0x92c] sm:$0xf0]  ;;  %v5940_v40 = vld [vmem:[#allocation6 + $0x254] sm:$0xf] }
 0x162   : > { %v5496_v43 = vld [vmem:[#allocation6 + $0xb10] sm:$0xf]  ;;  %v5241_v50 = vor.u32 %v6160_v42, %v5240_v41  ;;  %3018 = vmatpush.bf16.msrb.mxu1 %v5529_v39  ;;  %3044 = vmatpush.bf16.msrb.mxu3 %v4509_v44  ;;  %v4122_v39 = vld [vmem:[#allocation6 + $0x70] sm:$0xf0]  ;;  %v6863_v42 = vpack.c.bf16 %v3264_v34, %v3263_v33 }
 0x163   : > { %v6224_v45 = vld [vmem:[#allocation6 + $0xb2c] sm:$0xf0]  ;;  %v4378_v41 = vld [vmem:[#allocation6 + $0x270] sm:$0xf0]  ;;  %v4125_v47 = vor.u32 %v5876_v38, %v4122_v39 }
 0x164   : > { %v5497_v52 = vor.u32 %v6224_v45, %v5496_v43  ;;  %v5208_v58 = vld [vmem:[#allocation6 + $0x8d0] sm:$0xf]  ;;  %3006 = vmatpush.bf16.msrb.mxu0 %v5241_v50  ;;  %3032 = vmatpush.bf16.msrb.mxu2 %v4221_v53  ;;  %v2780_v50 = vpop.f32.mrf.mxu2  ;;  %v4381_v51 = vor.u32 %v5940_v40, %v4378_v41  ;;  %v5932_v53 = vld [vmem:[#allocation6 + $0x214] sm:$0xf]  ;;  %v2793_v57 = vpop.f32.mrf.mxu3 }
 0x165   : > { %v6152_v59 = vld [vmem:[#allocation6 + $0x8ec] sm:$0xf0]  ;;  %v4762_v24 = vld [vmem:[#allocation6 + $0x570] sm:$0xf0] }
 0x166   : > { %v5464_v60 = vld [vmem:[#allocation6 + $0xad0] sm:$0xf]  ;;  %v5209_v5 = vor.u32 %v6152_v59, %v5208_v58  ;;  %3019 = vmatpush.bf16.msrb.mxu1 %v5497_v52  ;;  %3045 = vmatpush.bf16.msrb.mxu3 %v4477_v61  ;;  %v4090_v52 = vld [vmem:[#allocation6 + $0x30] sm:$0xf0] }
 0x167   : > { %v6216_v62 = vld [vmem:[#allocation6 + $0xaec] sm:$0xf0]  ;;  %v6052_v58 = vld [vmem:[#allocation6 + $0x5d4] sm:$0xf]  ;;  %v4093_v2 = vor.u32 %v5868_v4, %v4090_v52 }
 0x168   : > { %v5465_v6 = vor.u32 %v6216_v62, %v5464_v60  ;;  %v5176_v36 = vld [vmem:[#allocation6 + $0x890] sm:$0xf]  ;;  %3007 = vmatpush.bf16.msrb.mxu0 %v5209_v5  ;;  %3033 = vmatpush.bf16.msrb.mxu2 %v4189_v7  ;;  %v4826_v59 = vld [vmem:[#allocation6 + $0x5f0] sm:$0xf0]  ;;  %v2804_v50 = vpop.f32.mrf.mxu0 }
 0x169   : > { %v6144_v10 = vld [vmem:[#allocation6 + $0x8ac] sm:$0xf0]  ;;  %v6116_v60 = vld [vmem:[#allocation6 + $0x7d4] sm:$0xf]  ;;  %v4829_v7 = vor.u32 %v6052_v58, %v4826_v59 }
 0x16a   : > { %v5432_v11 = vld [vmem:[#allocation6 + $0xa90] sm:$0xf]  ;;  %v5177_v22 = vor.u32 %v6144_v10, %v5176_v36  ;;  %3020 = vmatpush.bf16.msrb.mxu1 %v5465_v6  ;;  %3046 = vmatpush.bf16.msrb.mxu3 %v4445_v12  ;;  %v5082_v62 = vld [vmem:[#allocation6 + $0x7f0] sm:$0xf0]  ;;  %v4349_v6 = vor.u32 %v5932_v53, %v4346_v55  ;;  %v5341_v36 = vor.u32 %v6180_v63, %v5338_v0  ;;  %v2817_v59 = vpop.f32.mrf.mxu1 }
 0x16b   : > { %v6208_v16 = vld [vmem:[#allocation6 + $0xaac] sm:$0xf0]  ;;  %v5594_v5 = vld [vmem:[#allocation6 + $0xbf0] sm:$0xf0]  ;;  %v5085_v54 = vor.u32 %v6116_v60, %v5082_v62 }
 0x16c   : > { %v5144_v23 = vld [vmem:[#allocation6 + $0x850] sm:$0xf]  ;;  %v5433_v26 = vor.u32 %v6208_v16, %v5432_v11  ;;  %3008 = vmatpush.bf16.msrb.mxu0 %v5177_v22  ;;  %3034 = vmatpush.bf16.msrb.mxu2 %v4157_v27  ;;  %v6044_v10 = vld [vmem:[#allocation6 + $0x594] sm:$0xf]  ;;  %v5597_v13 = vor.u32 %v6244_v3, %v5594_v5  ;;  %v5565_v27 = vor.u32 %v6236_v18, %v5562_v19 }
 0x16d   : > { %v6136_v28 = vld [vmem:[#allocation6 + $0x86c] sm:$0xf0]  ;;  %v4794_v11 = vld [vmem:[#allocation6 + $0x5b0] sm:$0xf0] }
 0x16e   : > { %v5400_v29 = vld [vmem:[#allocation6 + $0xa50] sm:$0xf]  ;;  %v5145_v43 = vor.u32 %v6136_v28, %v5144_v23  ;;  %3021 = vmatpush.bf16.msrb.mxu1 %v5433_v26  ;;  %3047 = vmatpush.bf16.msrb.mxu3 %v4413_v37  ;;  %v6108_v12 = vld [vmem:[#allocation6 + $0x794] sm:$0xf]  ;;  %v4797_v20 = vor.u32 %v6044_v10, %v4794_v11 }
 0x16f   : > { %v6200_v30 = vld [vmem:[#allocation6 + $0xa6c] sm:$0xf0]  ;;  %v6172_v16 = vld [vmem:[#allocation6 + $0x994] sm:$0xf]  ;;  %v5053_v21 = vor.u32 %v6108_v12, %v5050_v14 }
 0x170   : > { %v5112_v44 = vld [vmem:[#allocation6 + $0x810] sm:$0xf]  ;;  %v5401_v46 = vor.u32 %v6200_v30, %v5400_v29  ;;  %3009 = vmatpush.bf16.msrb.mxu0 %v5145_v43  ;;  %3035 = vmatpush.bf16.msrb.mxu2 %v4125_v47  ;;  %v5309_v22 = vor.u32 %v6172_v16, %v5306_v17  ;;  %v6036_v23 = vld [vmem:[#allocation6 + $0x554] sm:$0xf]  ;;  %v705_v43 = vperm.slane %v6842_v56, 2 }
 0x171   : > { %v6128_v45 = vld [vmem:[#allocation6 + $0x82c] sm:$0xf0]  ;;  %v6100_v26 = vld [vmem:[#allocation6 + $0x754] sm:$0xf]  ;;  %v4765_v34 = vor.u32 %v6036_v23, %v4762_v24 }
 0x172   : > { %v5368_v48 = vld [vmem:[#allocation6 + $0xa10] sm:$0xf]  ;;  %v5113_v61 = vor.u32 %v6128_v45, %v5112_v44  ;;  %3022 = vmatpush.bf16.msrb.mxu1 %v5401_v46  ;;  %3048 = vmatpush.bf16.msrb.mxu3 %v4381_v51  ;;  %v5018_v28 = vld [vmem:[#allocation6 + $0x770] sm:$0xf0]  ;;  %v2805_v58 = vadd.f32 %v2804_v50, %v705_v43 }
 0x173   : > { %v6192_v49 = vld [vmem:[#allocation6 + $0xa2c] sm:$0xf0]  ;;  %v6164_v29 = vld [vmem:[#allocation6 + $0x954] sm:$0xf]  ;;  %v5021_v38 = vor.u32 %v6100_v26, %v5018_v28  ;;  %v2819_v28 = vpop.f32.mrf.mxu1 }
 0x174   : > { %v5369_v1 = vor.u32 %v6192_v49, %v5368_v48  ;;  %3010 = vmatpush.bf16.msrb.mxu0 %v5113_v61  ;;  %3036 = vmatpush.bf16.msrb.mxu2 %v4093_v2  ;;  %v5274_v30 = vld [vmem:[#allocation6 + $0x970] sm:$0xf0]  ;;  %v2843_v16 = vpop.f32.mrf.mxu3  ;;  %v6105_v28 = vld [vmem:[#allocation6 + $0x774] sm:$0xf0] }
 0x175   : > { %v5530_v33 = vld [vmem:[#allocation6 + $0xb70] sm:$0xf0]  ;;  %v5277_v39 = vor.u32 %v6164_v29, %v5274_v30 }
 0x176   : > { %3023 = vmatpush.bf16.msrb.mxu1 %v5369_v1  ;;  %3049 = vmatpush.bf16.msrb.mxu3 %v4349_v6  ;;  %v6028_v37 = vld [vmem:[#allocation6 + $0x514] sm:$0xf]  ;;  %v5533_v44 = vor.u32 %v6228_v31, %v5530_v33  ;;  %v2818_v1 = vadd.f32 %v2817_v59, %v2805_v58  ;;  %v5993_v58 = vld [vmem:[#allocation6 + $0x3f4] sm:$0xf0] }
 0x177   : > { %3011 = vmatmul.bf16.vlgmr.msrb.gmra.mxu0 %v6822_v32  ;;  %3037 = vmatmul.bf16.vlgmr.msrb.gmra.mxu2 %v6808_v9  ;;  %v4730_v40 = vld [vmem:[#allocation6 + $0x530] sm:$0xf0]  ;;  %v4832_v59 = vld [vmem:[#allocation6 + $0x5d8] sm:$0xf] }
 0x178   : > { %3055 = vmatpush.bf16.msra.mxu0 %v4829_v7  ;;  %3081 = vmatpush.bf16.msra.mxu2 %v5341_v36  ;;  %v6092_v41 = vld [vmem:[#allocation6 + $0x714] sm:$0xf]  ;;  %v4733_v4 = vor.u32 %v6028_v37, %v4730_v40  ;;  %v2830_v36 = vpop.f32.mrf.mxu2 }
 0x179   : > { %3024 = vmatmul.bf16.vlgmr.msrb.gmra.mxu1 %v6824_v35  ;;  %3050 = vmatmul.bf16.vlgmr.msrb.gmra.mxu3 %v6817_v25  ;;  %v4986_v45 = vld [vmem:[#allocation6 + $0x730] sm:$0xf0]  ;;  %v2831_v14 = vadd.f32 %v2830_v36, %v2818_v1  ;;  %v5985_v36 = vld [vmem:[#allocation6 + $0x3b4] sm:$0xf0] }
 0x17a   : > { %3068 = vmatpush.bf16.msra.mxu1 %v5085_v54  ;;  %3094 = vmatpush.bf16.msra.mxu3 %v5597_v13  ;;  %v6156_v46 = vld [vmem:[#allocation6 + $0x914] sm:$0xf]  ;;  %v4989_v51 = vor.u32 %v6092_v41, %v4986_v45 }
 0x17b   : > { %v5242_v47 = vld [vmem:[#allocation6 + $0x930] sm:$0xf0] }
 0x17c   : > { %3056 = vmatpush.bf16.msra.mxu0 %v4797_v20  ;;  %3082 = vmatpush.bf16.msra.mxu2 %v5309_v22  ;;  %v6220_v48 = vld [vmem:[#allocation6 + $0xb14] sm:$0xf]  ;;  %v5245_v52 = vor.u32 %v6156_v46, %v5242_v47  ;;  %v6870_v20 = vadd.f32 %v2843_v16, %v2831_v14 }
 0x17d   : > { %v5498_v49 = vld [vmem:[#allocation6 + $0xb30] sm:$0xf0] }
 0x17e   : > { %3069 = vmatpush.bf16.msra.mxu1 %v5053_v21  ;;  %3095 = vmatpush.bf16.msra.mxu3 %v5565_v27  ;;  %v6020_v53 = vld [vmem:[#allocation6 + $0x4d4] sm:$0xf]  ;;  %v5501_v56 = vor.u32 %v6220_v48, %v5498_v49  ;;  %v2806_v21 = vpop.f32.mrf.mxu0 }
 0x17f   : > { %v4698_v55 = vld [vmem:[#allocation6 + $0x4f0] sm:$0xf0]  ;;  %v4512_v21 = vld [vmem:[#allocation6 + $0x358] sm:$0xf] }
 0x180   : > { %3057 = vmatpush.bf16.msra.mxu0 %v4765_v34  ;;  %3083 = vmatpush.bf16.msra.mxu2 %v5277_v39  ;;  %v6084_v57 = vld [vmem:[#allocation6 + $0x6d4] sm:$0xf]  ;;  %v4701_v2 = vor.u32 %v6020_v53, %v4698_v55  ;;  %v2832_v47 = vpop.f32.mrf.mxu2  ;;  %v5929_v53 = vld [vmem:[#allocation6 + $0x1f4] sm:$0xf0] }
 0x181   : > { %v4954_v60 = vld [vmem:[#allocation6 + $0x6f0] sm:$0xf0]  ;;  %v4576_v55 = vld [vmem:[#allocation6 + $0x3d8] sm:$0xf] }
 0x182   : > { %3070 = vmatpush.bf16.msra.mxu1 %v5021_v38  ;;  %3096 = vmatpush.bf16.msra.mxu3 %v5533_v44  ;;  %v6148_v61 = vld [vmem:[#allocation6 + $0x8d4] sm:$0xf]  ;;  %v4957_v3 = vor.u32 %v6084_v57, %v4954_v60 }
 0x183   : > { %v5210_v62 = vld [vmem:[#allocation6 + $0x8f0] sm:$0xf0] }
 0x184   : > { %v6212_v63 = vld [vmem:[#allocation6 + $0xad4] sm:$0xf]  ;;  %3058 = vmatpush.bf16.msra.mxu0 %v4733_v4  ;;  %3084 = vmatpush.bf16.msra.mxu2 %v5245_v52  ;;  %v5213_v5 = vor.u32 %v6148_v61, %v5210_v62  ;;  %v4320_v52 = vld [vmem:[#allocation6 + $0x1d8] sm:$0xf] }
 0x185   : > { %v5466_v0 = vld [vmem:[#allocation6 + $0xaf0] sm:$0xf0]  ;;  %v5088_v62 = vld [vmem:[#allocation6 + $0x7d8] sm:$0xf]  ;;  %v4321_v1 = vor.u32 %v5929_v53, %v4320_v52 }
 0x186   : > { %3071 = vmatpush.bf16.msra.mxu1 %v4989_v51  ;;  %v6012_v6 = vld [vmem:[#allocation6 + $0x494] sm:$0xf]  ;;  %3097 = vmatpush.bf16.msra.mxu3 %v5501_v56  ;;  %v5469_v10 = vor.u32 %v6212_v63, %v5466_v0  ;;  %v2845_v51 = vpop.f32.mrf.mxu3  ;;  %v6057_v56 = vld [vmem:[#allocation6 + $0x5f4] sm:$0xf0] }
 0x187   : > { %v4666_v7 = vld [vmem:[#allocation6 + $0x4b0] sm:$0xf0]  ;;  %v6121_v63 = vld [vmem:[#allocation6 + $0x7f4] sm:$0xf0] }
 0x188   : > { %v6076_v54 = vld [vmem:[#allocation6 + $0x694] sm:$0xf]  ;;  %3059 = vmatpush.bf16.msra.mxu0 %v4701_v2  ;;  %v4669_v19 = vor.u32 %v6012_v6, %v4666_v7  ;;  %3085 = vmatpush.bf16.msra.mxu2 %v5213_v5  ;;  %v4577_v2 = vor.u32 %v5993_v58, %v4576_v55  ;;  %v4288_v5 = vld [vmem:[#allocation6 + $0x198] sm:$0xf] }
 0x189   : > { %v4922_v11 = vld [vmem:[#allocation6 + $0x6b0] sm:$0xf0]  ;;  %v5921_v6 = vld [vmem:[#allocation6 + $0x1b4] sm:$0xf0] }
 0x18a   : > { %v6140_v12 = vld [vmem:[#allocation6 + $0x894] sm:$0xf]  ;;  %3072 = vmatpush.bf16.msra.mxu1 %v4957_v3  ;;  %v4925_v22 = vor.u32 %v6076_v54, %v4922_v11  ;;  %3098 = vmatpush.bf16.msra.mxu3 %v5469_v10  ;;  %v4833_v3 = vor.u32 %v6057_v56, %v4832_v59  ;;  %v4544_v7 = vld [vmem:[#allocation6 + $0x398] sm:$0xf]  ;;  %v5089_v54 = vor.u32 %v6121_v63, %v5088_v62 }
 0x18b   : > { %v5178_v13 = vld [vmem:[#allocation6 + $0x8b0] sm:$0xf0]  ;;  %v4800_v10 = vld [vmem:[#allocation6 + $0x598] sm:$0xf]  ;;  %v4289_v14 = vor.u32 %v5921_v6, %v4288_v5  ;;  %v4545_v16 = vor.u32 %v5985_v36, %v4544_v7 }
 0x18c   : > { %v6204_v17 = vld [vmem:[#allocation6 + $0xa94] sm:$0xf]  ;;  %v5181_v23 = vor.u32 %v6140_v12, %v5178_v13  ;;  %3060 = vmatpush.bf16.msra.mxu0 %v4669_v19  ;;  %v6049_v11 = vld [vmem:[#allocation6 + $0x5b4] sm:$0xf0] }
 0x18d   : > { %v5434_v18 = vld [vmem:[#allocation6 + $0xab0] sm:$0xf0]  ;;  %v5056_v12 = vld [vmem:[#allocation6 + $0x798] sm:$0xf] }
 0x18e   : > { %v6004_v24 = vld [vmem:[#allocation6 + $0x454] sm:$0xf]  ;;  %v5437_v29 = vor.u32 %v6204_v17, %v5434_v18  ;;  %3073 = vmatpush.bf16.msra.mxu1 %v4925_v22  ;;  %3086 = vmatpush.bf16.msra.mxu2 %v5181_v23  ;;  %v6113_v13 = vld [vmem:[#allocation6 + $0x7b4] sm:$0xf0]  ;;  %v4801_v17 = vor.u32 %v6049_v11, %v4800_v10 }
 0x18f   : > { %v4634_v26 = vld [vmem:[#allocation6 + $0x470] sm:$0xf0]  ;;  %v4256_v18 = vld [vmem:[#allocation6 + $0x158] sm:$0xf]  ;;  %v5057_v22 = vor.u32 %v6113_v13, %v5056_v12 }
 0x190   : > { %v6068_v27 = vld [vmem:[#allocation6 + $0x654] sm:$0xf]  ;;  %v4637_v38 = vor.u32 %v6004_v24, %v4634_v26  ;;  %3099 = vmatpush.bf16.msra.mxu3 %v5437_v29  ;;  %v5913_v19 = vld [vmem:[#allocation6 + $0x174] sm:$0xf0] }
 0x191   : > { %v4890_v30 = vld [vmem:[#allocation6 + $0x670] sm:$0xf0]  ;;  %v5977_v23 = vld [vmem:[#allocation6 + $0x374] sm:$0xf0]  ;;  %v4257_v29 = vor.u32 %v5913_v19, %v4256_v18 }
 0x192   : > { %v6132_v31 = vld [vmem:[#allocation6 + $0x854] sm:$0xf]  ;;  %v4893_v41 = vor.u32 %v6068_v27, %v4890_v30  ;;  %3061 = vmatpush.bf16.msra.mxu0 %v4637_v38  ;;  %v4768_v24 = vld [vmem:[#allocation6 + $0x558] sm:$0xf]  ;;  %v4513_v30 = vor.u32 %v5977_v23, %v4512_v21  ;;  %v2882_v36 = vpop.f32.mrf.mxu2 }
 0x193   : > { %v5146_v33 = vld [vmem:[#allocation6 + $0x870] sm:$0xf0]  ;;  %v6041_v26 = vld [vmem:[#allocation6 + $0x574] sm:$0xf0] }
 0x194   : > { %v6196_v34 = vld [vmem:[#allocation6 + $0xa54] sm:$0xf]  ;;  %v5149_v43 = vor.u32 %v6132_v31, %v5146_v33  ;;  %3074 = vmatpush.bf16.msra.mxu1 %v4893_v41  ;;  %v5024_v27 = vld [vmem:[#allocation6 + $0x758] sm:$0xf]  ;;  %v4769_v31 = vor.u32 %v6041_v26, %v4768_v24  ;;  %v2895_v13 = vpop.f32.mrf.mxu3 }
 0x195   : > { %v5402_v37 = vld [vmem:[#allocation6 + $0xa70] sm:$0xf0]  ;;  %v4224_v33 = vld [vmem:[#allocation6 + $0x118] sm:$0xf]  ;;  %v5025_v38 = vor.u32 %v6105_v28, %v5024_v27 }
 0x196   : > { %v5996_v39 = vld [vmem:[#allocation6 + $0x414] sm:$0xf]  ;;  %v5405_v48 = vor.u32 %v6196_v34, %v5402_v37  ;;  %3087 = vmatpush.bf16.msra.mxu2 %v5149_v43  ;;  %v5905_v34 = vld [vmem:[#allocation6 + $0x134] sm:$0xf0] }
 0x197   : > { %v4602_v40 = vld [vmem:[#allocation6 + $0x430] sm:$0xf0]  ;;  %v4480_v37 = vld [vmem:[#allocation6 + $0x318] sm:$0xf] }
 0x198   : > { %v6060_v44 = vld [vmem:[#allocation6 + $0x614] sm:$0xf]  ;;  %v4605_v57 = vor.u32 %v5996_v39, %v4602_v40  ;;  %3100 = vmatpush.bf16.msra.mxu3 %v5405_v48  ;;  %v5969_v39 = vld [vmem:[#allocation6 + $0x334] sm:$0xf0]  ;;  %v2869_v48 = vpop.f32.mrf.mxu1 }
 0x199   : > { %v4858_v45 = vld [vmem:[#allocation6 + $0x630] sm:$0xf0]  ;;  %v4736_v40 = vld [vmem:[#allocation6 + $0x518] sm:$0xf] }
 0x19a   : > { %v6124_v46 = vld [vmem:[#allocation6 + $0x814] sm:$0xf]  ;;  %v4861_v60 = vor.u32 %v6060_v44, %v4858_v45  ;;  %3062 = vmatpush.bf16.msra.mxu0 %v4605_v57  ;;  %v6033_v41 = vld [vmem:[#allocation6 + $0x534] sm:$0xf0]  ;;  %v2856_v45 = vpop.f32.mrf.mxu0 }
 0x19b   : > { %v5114_v49 = vld [vmem:[#allocation6 + $0x830] sm:$0xf0]  ;;  %v4992_v43 = vld [vmem:[#allocation6 + $0x718] sm:$0xf]  ;;  %v2857_v47 = vadd.f32 %v2856_v45, %v6870_v20 }
 0x19c   : > { %v6188_v4 = vld [vmem:[#allocation6 + $0xa14] sm:$0xf]  ;;  %v5117_v61 = vor.u32 %v6124_v46, %v5114_v49  ;;  %3075 = vmatpush.bf16.msra.mxu1 %v4861_v60  ;;  %v6097_v44 = vld [vmem:[#allocation6 + $0x734] sm:$0xf0]  ;;  %v4225_v46 = vor.u32 %v5905_v34, %v4224_v33  ;;  %v4481_v49 = vor.u32 %v5969_v39, %v4480_v37 }
 0x19d   : > { %v5370_v50 = vld [vmem:[#allocation6 + $0xa30] sm:$0xf0]  ;;  %3063 = vmatmul.bf16.vlgmr.msra.gmra.mxu0 %v6806_v8  ;;  %v5897_v51 = vld [vmem:[#allocation6 + $0xf4] sm:$0xf0]  ;;  %v4993_v53 = vor.u32 %v6097_v44, %v4992_v43  ;;  %v6877_v59 = vadd.f32 %v2869_v48, %v2857_v47  ;;  %v2884_v48 = vpop.f32.mrf.mxu2 }
 0x19e   : > { %v5373_v0 = vor.u32 %v6188_v4, %v5370_v50  ;;  %3088 = vmatpush.bf16.msra.mxu2 %v5117_v61  ;;  %3107 = vmatpush.bf16.msrb.mxu0 %v4321_v1  ;;  %v4737_v4 = vor.u32 %v6033_v41, %v4736_v40  ;;  %v4192_v50 = vld [vmem:[#allocation6 + $0xd8] sm:$0xf]  ;;  %v6879_v61 = vld [vmem:[#allocation8] sm:$0xff] }
 0x19f   : > { %3076 = vmatmul.bf16.vlgmr.msra.gmra.mxu1 %v6811_v15  ;;  %v4448_v52 = vld [vmem:[#allocation6 + $0x2d8] sm:$0xf]  ;;  %v706_v20 = vperm.slane %v6879_v61, 3  ;;  %v4193_v62 = vor.u32 %v5897_v51, %v4192_v50  ;;  %v2897_v51 = vpop.f32.mrf.mxu3 }
 0x1a0   : > { %3101 = vmatpush.bf16.msra.mxu3 %v5373_v0  ;;  %3120 = vmatpush.bf16.msrb.mxu1 %v4577_v2  ;;  %v5961_v55 = vld [vmem:[#allocation6 + $0x2f4] sm:$0xf0] }
 0x1a1   : > { %3089 = vmatmul.bf16.vlgmr.msra.gmra.mxu2 %v6822_v32  ;;  %v4704_v57 = vld [vmem:[#allocation6 + $0x4d8] sm:$0xf]  ;;  %v4449_v63 = vor.u32 %v5961_v55, %v4448_v52  ;;  %v2883_v12 = vadd.f32 %v2882_v36, %v706_v20  ;;  %v5925_v55 = vld [vmem:[#allocation6 + $0x1dc] sm:$0xf] }
 0x1a2   : > { %3133 = vmatpush.bf16.msrb.mxu2 %v4833_v3  ;;  %3108 = vmatpush.bf16.msrb.mxu0 %v4289_v14  ;;  %v6025_v58 = vld [vmem:[#allocation6 + $0x4f4] sm:$0xf0]  ;;  %v2858_v14 = vpop.f32.mrf.mxu0  ;;  %v4578_v20 = vld [vmem:[#allocation6 + $0x3f8] sm:$0xf0] }
 0x1a3   : > { %3102 = vmatmul.bf16.vlgmr.msra.gmra.mxu3 %v6824_v35  ;;  %v4960_v56 = vld [vmem:[#allocation6 + $0x6d8] sm:$0xf]  ;;  %v4705_v0 = vor.u32 %v6025_v58, %v4704_v57  ;;  %v6882_v24 = vadd.f32 %v2895_v13, %v2883_v12  ;;  %v4322_v57 = vld [vmem:[#allocation6 + $0x1f8] sm:$0xf0] }
 0x1a4   : > { %3146 = vmatpush.bf16.msrb.mxu3 %v5089_v54  ;;  %3121 = vmatpush.bf16.msrb.mxu1 %v4545_v16  ;;  %v6089_v60 = vld [vmem:[#allocation6 + $0x6f4] sm:$0xf0]  ;;  %v4290_v36 = vld [vmem:[#allocation6 + $0x1b8] sm:$0xf0] }
 0x1a5   : > { %v4160_v1 = vld [vmem:[#allocation6 + $0x98] sm:$0xf]  ;;  %v4961_v5 = vor.u32 %v6089_v60, %v4960_v56  ;;  %v5989_v60 = vld [vmem:[#allocation6 + $0x3dc] sm:$0xf] }
 0x1a6   : > { %3134 = vmatpush.bf16.msrb.mxu2 %v4801_v17  ;;  %3109 = vmatpush.bf16.msrb.mxu0 %v4257_v29  ;;  %v5889_v2 = vld [vmem:[#allocation6 + $0xb4] sm:$0xf0]  ;;  %v2871_v17 = vpop.f32.mrf.mxu1 }
 0x1a7   : > { %v4416_v3 = vld [vmem:[#allocation6 + $0x298] sm:$0xf]  ;;  %v4161_v16 = vor.u32 %v5889_v2, %v4160_v1  ;;  %v4325_v1 = vor.u32 %v5925_v55, %v4322_v57  ;;  %v5893_v55 = vld [vmem:[#allocation6 + $0xdc] sm:$0xf] }
 0x1a8   : > { %3147 = vmatpush.bf16.msrb.mxu3 %v5057_v22  ;;  %3122 = vmatpush.bf16.msrb.mxu1 %v4513_v30  ;;  %v5953_v6 = vld [vmem:[#allocation6 + $0x2b4] sm:$0xf0]  ;;  %v4194_v57 = vld [vmem:[#allocation6 + $0xf8] sm:$0xf0] }
 0x1a9   : > { %v4672_v7 = vld [vmem:[#allocation6 + $0x498] sm:$0xf]  ;;  %v4417_v18 = vor.u32 %v5953_v6, %v4416_v3  ;;  %v4581_v6 = vor.u32 %v5989_v60, %v4578_v20  ;;  %v4450_v60 = vld [vmem:[#allocation6 + $0x2f8] sm:$0xf0] }
 0x1aa   : > { %3135 = vmatpush.bf16.msrb.mxu2 %v4769_v31  ;;  %3110 = vmatpush.bf16.msrb.mxu0 %v4225_v46  ;;  %v6017_v54 = vld [vmem:[#allocation6 + $0x4b4] sm:$0xf0] }
 0x1ab   : > { %v4928_v10 = vld [vmem:[#allocation6 + $0x698] sm:$0xf]  ;;  %v4673_v19 = vor.u32 %v6017_v54, %v4672_v7  ;;  %v5917_v54 = vld [vmem:[#allocation6 + $0x19c] sm:$0xf] }
 0x1ac   : > { %3148 = vmatpush.bf16.msrb.mxu3 %v5025_v38  ;;  %3123 = vmatpush.bf16.msrb.mxu1 %v4481_v49  ;;  %v6081_v11 = vld [vmem:[#allocation6 + $0x6b4] sm:$0xf0]  ;;  %v4293_v14 = vor.u32 %v5917_v54, %v4290_v36  ;;  %v5885_v54 = vld [vmem:[#allocation6 + $0x9c] sm:$0xf] }
 0x1ad   : > { %v4128_v21 = vld [vmem:[#allocation6 + $0x58] sm:$0xf]  ;;  %v4929_v26 = vor.u32 %v6081_v11, %v4928_v10  ;;  %v5981_v10 = vld [vmem:[#allocation6 + $0x39c] sm:$0xf] }
 0x1ae   : > { %3136 = vmatpush.bf16.msrb.mxu2 %v4737_v4  ;;  %3111 = vmatpush.bf16.msrb.mxu0 %v4193_v62  ;;  %v5881_v22 = vld [vmem:[#allocation6 + $0x74] sm:$0xf0]  ;;  %v4546_v11 = vld [vmem:[#allocation6 + $0x3b8] sm:$0xf0] }
 0x1af   : > { %v4384_v23 = vld [vmem:[#allocation6 + $0x258] sm:$0xf]  ;;  %v4129_v33 = vor.u32 %v5881_v22, %v4128_v21  ;;  %v5909_v22 = vld [vmem:[#allocation6 + $0x15c] sm:$0xf] }
 0x1b0   : > { %3149 = vmatpush.bf16.msrb.mxu3 %v4993_v53  ;;  %3124 = vmatpush.bf16.msrb.mxu1 %v4449_v63  ;;  %v5945_v27 = vld [vmem:[#allocation6 + $0x274] sm:$0xf0]  ;;  %v4162_v36 = vld [vmem:[#allocation6 + $0xb8] sm:$0xf0] }
 0x1b1   : > { %v4640_v28 = vld [vmem:[#allocation6 + $0x458] sm:$0xf]  ;;  %v4385_v38 = vor.u32 %v5945_v27, %v4384_v23  ;;  %v4258_v23 = vld [vmem:[#allocation6 + $0x178] sm:$0xf0] }
 0x1b2   : > { %3137 = vmatpush.bf16.msrb.mxu2 %v4705_v0  ;;  %v6009_v29 = vld [vmem:[#allocation6 + $0x474] sm:$0xf0]  ;;  %3112 = vmatpush.bf16.msrb.mxu0 %v4161_v16  ;;  %v4514_v27 = vld [vmem:[#allocation6 + $0x378] sm:$0xf0] }
 0x1b3   : > { %v4896_v30 = vld [vmem:[#allocation6 + $0x658] sm:$0xf]  ;;  %v4641_v39 = vor.u32 %v6009_v29, %v4640_v28 }
 0x1b4   : > { %3150 = vmatpush.bf16.msrb.mxu3 %v4961_v5  ;;  %v6073_v31 = vld [vmem:[#allocation6 + $0x674] sm:$0xf0]  ;;  %3125 = vmatpush.bf16.msrb.mxu1 %v4417_v18 }
 0x1b5   : > { %v4096_v34 = vld [vmem:[#allocation6 + $0x18] sm:$0xf]  ;;  %v4897_v44 = vor.u32 %v6073_v31, %v4896_v30  ;;  %v4261_v30 = vor.u32 %v5909_v22, %v4258_v23 }
 0x1b6   : > { %v5873_v37 = vld [vmem:[#allocation6 + $0x34] sm:$0xf0]  ;;  %3138 = vmatpush.bf16.msrb.mxu2 %v4673_v19  ;;  %3113 = vmatpush.bf16.msrb.mxu0 %v4129_v33  ;;  %v4549_v19 = vor.u32 %v5981_v10, %v4546_v11  ;;  %v5949_v10 = vld [vmem:[#allocation6 + $0x29c] sm:$0xf] }
 0x1b7   : > { %v4352_v40 = vld [vmem:[#allocation6 + $0x218] sm:$0xf]  ;;  %v4097_v52 = vor.u32 %v5873_v37, %v4096_v34  ;;  %v4418_v11 = vld [vmem:[#allocation6 + $0x2b8] sm:$0xf0] }
 0x1b8   : > { %v5937_v41 = vld [vmem:[#allocation6 + $0x234] sm:$0xf0]  ;;  %3151 = vmatpush.bf16.msrb.mxu3 %v4929_v26  ;;  %3126 = vmatpush.bf16.msrb.mxu1 %v4385_v38  ;;  %v5973_v26 = vld [vmem:[#allocation6 + $0x35c] sm:$0xf] }
 0x1b9   : > { %v4608_v43 = vld [vmem:[#allocation6 + $0x418] sm:$0xf]  ;;  %v4353_v58 = vor.u32 %v5937_v41, %v4352_v40  ;;  %v4517_v37 = vor.u32 %v5973_v26, %v4514_v27  ;;  %v4226_v40 = vld [vmem:[#allocation6 + $0x138] sm:$0xf0]  ;;  %v3265_v26 = vmax.f32 %v6877_v59, 0.0 }
 0x1ba   : > { %v6001_v45 = vld [vmem:[#allocation6 + $0x434] sm:$0xf0]  ;;  %3139 = vmatpush.bf16.msrb.mxu2 %v4641_v39  ;;  %3114 = vmatpush.bf16.msrb.mxu0 %v4097_v52  ;;  %v5901_v39 = vld [vmem:[#allocation6 + $0x11c] sm:$0xf] }
 0x1bb   : > { %v4864_v46 = vld [vmem:[#allocation6 + $0x618] sm:$0xf]  ;;  %v4609_v56 = vor.u32 %v6001_v45, %v4608_v43  ;;  %v5965_v41 = vld [vmem:[#allocation6 + $0x31c] sm:$0xf]  ;;  %v2908_v45 = vpop.f32.mrf.mxu0 }
 0x1bc   : > { %v6065_v47 = vld [vmem:[#allocation6 + $0x634] sm:$0xf0]  ;;  %3152 = vmatpush.bf16.msrb.mxu3 %v4897_v44  ;;  %3127 = vmatpush.bf16.msrb.mxu1 %v4353_v58  ;;  %v4482_v43 = vld [vmem:[#allocation6 + $0x338] sm:$0xf0]  ;;  %v2909_v48 = vadd.f32 %v2908_v45, %v6882_v24 }
 0x1bd   : > { %v5344_v49 = vld [vmem:[#allocation6 + $0x9d8] sm:$0xf]  ;;  %v4865_v62 = vor.u32 %v6065_v47, %v4864_v46  ;;  %3115 = vmatmul.bf16.vlgmr.msrb.gmra.mxu0 %v6808_v9  ;;  %v4229_v47 = vor.u32 %v5901_v39, %v4226_v40  ;;  %v4485_v52 = vor.u32 %v5965_v41, %v4482_v43  ;;  %v5869_v59 = vld [vmem:[#allocation6 + $0x1c] sm:$0xf] }
 0x1be   : > { %v6185_v4 = vld [vmem:[#allocation6 + $0x9f4] sm:$0xf0]  ;;  %3140 = vmatpush.bf16.msrb.mxu2 %v4609_v56  ;;  %v5957_v56 = vld [vmem:[#allocation6 + $0x2dc] sm:$0xf] }
 0x1bf   : > { %v5600_v50 = vld [vmem:[#allocation6 + $0xbd8] sm:$0xf]  ;;  %v5345_v63 = vor.u32 %v6185_v4, %v5344_v49  ;;  %3128 = vmatmul.bf16.vlgmr.msrb.gmra.mxu1 %v6817_v25  ;;  %v2921_v49 = vpop.f32.mrf.mxu1 }
 0x1c0   : > { %v6249_v53 = vld [vmem:[#allocation6 + $0xbf4] sm:$0xf0]  ;;  %3153 = vmatpush.bf16.msrb.mxu3 %v4865_v62  ;;  %v2922_v58 = vadd.f32 %v2921_v49, %v2909_v48  ;;  %v5933_v48 = vld [vmem:[#allocation6 + $0x21c] sm:$0xf] }
 0x1c1   : > { %v5601_v0 = vor.u32 %v6249_v53, %v5600_v50  ;;  %v5312_v2 = vld [vmem:[#allocation6 + $0x998] sm:$0xf]  ;;  %3159 = vmatpush.bf16.msra.mxu0 %v5345_v63  ;;  %3141 = vmatmul.bf16.vlgmr.msrb.gmra.mxu2 %v6806_v8  ;;  %v4197_v63 = vor.u32 %v5893_v55, %v4194_v57  ;;  %v4354_v49 = vld [vmem:[#allocation6 + $0x238] sm:$0xf0] }
 0x1c2   : > { %v6177_v3 = vld [vmem:[#allocation6 + $0x9b4] sm:$0xf0]  ;;  %3185 = vmatpush.bf16.msra.mxu2 %v4325_v1  ;;  %v5090_v55 = vld [vmem:[#allocation6 + $0x7f8] sm:$0xf0] }
 0x1c3   : > { %v5568_v5 = vld [vmem:[#allocation6 + $0xb98] sm:$0xf]  ;;  %v5313_v12 = vor.u32 %v6177_v3, %v5312_v2  ;;  %3172 = vmatpush.bf16.msra.mxu1 %v5601_v0  ;;  %3154 = vmatmul.bf16.vlgmr.msrb.gmra.mxu3 %v6811_v15  ;;  %v2934_v0 = vpop.f32.mrf.mxu2  ;;  %v4453_v3 = vor.u32 %v5957_v56, %v4450_v60  ;;  %v6181_v57 = vld [vmem:[#allocation6 + $0x9dc] sm:$0xf] }
 0x1c4   : > { %v6241_v7 = vld [vmem:[#allocation6 + $0xbb4] sm:$0xf0]  ;;  %3198 = vmatpush.bf16.msra.mxu3 %v4581_v6  ;;  %v2947_v6 = vpop.f32.mrf.mxu3 }
 0x1c5   : > { %v5569_v13 = vor.u32 %v6241_v7, %v5568_v5  ;;  %v5280_v16 = vld [vmem:[#allocation6 + $0x958] sm:$0xf]  ;;  %3160 = vmatpush.bf16.msra.mxu0 %v5313_v12  ;;  %v2935_v5 = vadd.f32 %v2934_v0, %v2922_v58  ;;  %v5346_v58 = vld [vmem:[#allocation6 + $0x9f8] sm:$0xf0] }
 0x1c6   : > { %v6169_v17 = vld [vmem:[#allocation6 + $0x974] sm:$0xf0]  ;;  %3186 = vmatpush.bf16.msra.mxu2 %v4293_v14 }
 0x1c7   : > { %v5536_v18 = vld [vmem:[#allocation6 + $0xb58] sm:$0xf]  ;;  %v5281_v28 = vor.u32 %v6169_v17, %v5280_v16  ;;  %3173 = vmatpush.bf16.msra.mxu1 %v5569_v13  ;;  %v2948_v12 = vadd.f32 %v2947_v6, %v2935_v5  ;;  %v2910_v16 = vpop.f32.mrf.mxu0  ;;  %v2923_v23 = vpop.f32.mrf.mxu1  ;;  %v6109_v5 = vld [vmem:[#allocation6 + $0x79c] sm:$0xf] }
 0x1c8   : > { %v6233_v21 = vld [vmem:[#allocation6 + $0xb74] sm:$0xf0]  ;;  %3199 = vmatpush.bf16.msra.mxu3 %v4549_v19  ;;  %v6037_v16 = vld [vmem:[#allocation6 + $0x55c] sm:$0xf] }
 0x1c9   : > { %v5537_v29 = vor.u32 %v6233_v21, %v5536_v18  ;;  %v5248_v31 = vld [vmem:[#allocation6 + $0x918] sm:$0xf]  ;;  %3161 = vmatpush.bf16.msra.mxu0 %v5281_v28  ;;  %v4165_v18 = vor.u32 %v5885_v54, %v4162_v36  ;;  %v3266_v27 = vmax.f32 %v2948_v12, 0.0  ;;  %v4421_v28 = vor.u32 %v5949_v10, %v4418_v11  ;;  %v6173_v54 = vld [vmem:[#allocation6 + $0x99c] sm:$0xf] }
 0x1ca   : > { %v6161_v33 = vld [vmem:[#allocation6 + $0x934] sm:$0xf0]  ;;  %3187 = vmatpush.bf16.msra.mxu2 %v4261_v30  ;;  %v4130_v30 = vld [vmem:[#allocation6 + $0x78] sm:$0xf0] }
 0x1cb   : > { %v5504_v34 = vld [vmem:[#allocation6 + $0xb18] sm:$0xf]  ;;  %v5249_v44 = vor.u32 %v6161_v33, %v5248_v31  ;;  %3174 = vmatpush.bf16.msra.mxu1 %v5537_v29  ;;  %v5877_v29 = vld [vmem:[#allocation6 + $0x5c] sm:$0xf]  ;;  %v2936_v45 = vpop.f32.mrf.mxu2 }
 0x1cc   : > { %v6225_v38 = vld [vmem:[#allocation6 + $0xb34] sm:$0xf0]  ;;  %3200 = vmatpush.bf16.msra.mxu3 %v4517_v37  ;;  %v5941_v31 = vld [vmem:[#allocation6 + $0x25c] sm:$0xf]  ;;  %v4133_v41 = vor.u32 %v5877_v29, %v4130_v30 }
 0x1cd   : > { %v5505_v46 = vor.u32 %v6225_v38, %v5504_v34  ;;  %v5216_v4 = vld [vmem:[#allocation6 + $0x8d8] sm:$0xf]  ;;  %3162 = vmatpush.bf16.msra.mxu0 %v5249_v44  ;;  %v4386_v33 = vld [vmem:[#allocation6 + $0x278] sm:$0xf0]  ;;  %v6890_v34 = vpack.c.bf16 %v3266_v27, %v3265_v26 }
 0x1ce   : > { %v6153_v50 = vld [vmem:[#allocation6 + $0x8f4] sm:$0xf0]  ;;  %3188 = vmatpush.bf16.msra.mxu2 %v4229_v47  ;;  %v4098_v47 = vld [vmem:[#allocation6 + $0x38] sm:$0xf0] }
 0x1cf   : > { %v5472_v51 = vld [vmem:[#allocation6 + $0xad8] sm:$0xf]  ;;  %v5217_v20 = vor.u32 %v6153_v50, %v5216_v4  ;;  %3175 = vmatpush.bf16.msra.mxu1 %v5505_v46  ;;  %v4389_v46 = vor.u32 %v5941_v31, %v4386_v33  ;;  %v2949_v4 = vpop.f32.mrf.mxu3  ;;  %v6053_v50 = vld [vmem:[#allocation6 + $0x5dc] sm:$0xf]  ;;  %v4101_v60 = vor.u32 %v5869_v59, %v4098_v47 }
 0x1d0   : > { %v6217_v53 = vld [vmem:[#allocation6 + $0xaf4] sm:$0xf0]  ;;  %3201 = vmatpush.bf16.msra.mxu3 %v4485_v52  ;;  %v6117_v52 = vld [vmem:[#allocation6 + $0x7dc] sm:$0xf] }
 0x1d1   : > { %v5473_v62 = vor.u32 %v6217_v53, %v5472_v51  ;;  %v5184_v24 = vld [vmem:[#allocation6 + $0x898] sm:$0xf]  ;;  %3163 = vmatpush.bf16.msra.mxu0 %v5217_v20  ;;  %v4834_v51 = vld [vmem:[#allocation6 + $0x5f8] sm:$0xf0] }
 0x1d2   : > { %v6145_v1 = vld [vmem:[#allocation6 + $0x8b4] sm:$0xf0]  ;;  %3189 = vmatpush.bf16.msra.mxu2 %v4197_v63  ;;  %v6245_v20 = vld [vmem:[#allocation6 + $0xbdc] sm:$0xf]  ;;  %v4357_v63 = vor.u32 %v5933_v48, %v4354_v49  ;;  %v4837_v0 = vor.u32 %v6053_v50, %v4834_v51  ;;  %v6898_v49 = vpop.f32.mrf.mxu1 }
 0x1d3   : > { %v5440_v2 = vld [vmem:[#allocation6 + $0xa98] sm:$0xf]  ;;  %v5185_v13 = vor.u32 %v6145_v1, %v5184_v24  ;;  %3176 = vmatpush.bf16.msra.mxu1 %v5473_v62  ;;  %v5602_v62 = vld [vmem:[#allocation6 + $0xbf8] sm:$0xf0]  ;;  %v5093_v24 = vor.u32 %v6117_v52, %v5090_v55  ;;  %v5349_v1 = vor.u32 %v6181_v57, %v5346_v58 }
 0x1d4   : > { %v6209_v7 = vld [vmem:[#allocation6 + $0xab4] sm:$0xf0]  ;;  %3202 = vmatpush.bf16.msra.mxu3 %v4453_v3  ;;  %v4802_v3 = vld [vmem:[#allocation6 + $0x5b8] sm:$0xf0]  ;;  %v5605_v6 = vor.u32 %v6245_v20, %v5602_v62 }
 0x1d5   : > { %v5152_v14 = vld [vmem:[#allocation6 + $0x858] sm:$0xf]  ;;  %v5441_v17 = vor.u32 %v6209_v7, %v5440_v2  ;;  %3164 = vmatpush.bf16.msra.mxu0 %v5185_v13  ;;  %v6045_v2 = vld [vmem:[#allocation6 + $0x59c] sm:$0xf] }
 0x1d6   : > { %v6137_v19 = vld [vmem:[#allocation6 + $0x874] sm:$0xf0]  ;;  %3190 = vmatpush.bf16.msra.mxu2 %v4165_v18  ;;  %v5058_v7 = vld [vmem:[#allocation6 + $0x7b8] sm:$0xf0]  ;;  %v4805_v12 = vor.u32 %v6045_v2, %v4802_v3 }
 0x1d7   : > { %v5408_v21 = vld [vmem:[#allocation6 + $0xa58] sm:$0xf]  ;;  %v5153_v37 = vor.u32 %v6137_v19, %v5152_v14  ;;  %3177 = vmatpush.bf16.msra.mxu1 %v5441_v17  ;;  %v5314_v36 = vld [vmem:[#allocation6 + $0x9b8] sm:$0xf0]  ;;  %v5061_v13 = vor.u32 %v6109_v5, %v5058_v7 }
 0x1d8   : > { %v6201_v22 = vld [vmem:[#allocation6 + $0xa74] sm:$0xf0]  ;;  %3203 = vmatpush.bf16.msra.mxu3 %v4421_v28  ;;  %v6237_v10 = vld [vmem:[#allocation6 + $0xb9c] sm:$0xf]  ;;  %v5317_v14 = vor.u32 %v6173_v54, %v5314_v36 }
 0x1d9   : > { %v5120_v38 = vld [vmem:[#allocation6 + $0x818] sm:$0xf]  ;;  %v5409_v40 = vor.u32 %v6201_v22, %v5408_v21  ;;  %3165 = vmatpush.bf16.msra.mxu0 %v5153_v37  ;;  %v5570_v11 = vld [vmem:[#allocation6 + $0xbb8] sm:$0xf0] }
 0x1da   : > { %v6129_v39 = vld [vmem:[#allocation6 + $0x834] sm:$0xf0]  ;;  %3191 = vmatpush.bf16.msra.mxu2 %v4133_v41  ;;  %v4770_v17 = vld [vmem:[#allocation6 + $0x578] sm:$0xf0]  ;;  %v5573_v19 = vor.u32 %v6237_v10, %v5570_v11 }
 0x1db   : > { %v5376_v43 = vld [vmem:[#allocation6 + $0xa18] sm:$0xf]  ;;  %v5121_v53 = vor.u32 %v6129_v39, %v5120_v38  ;;  %3178 = vmatpush.bf16.msra.mxu1 %v5409_v40  ;;  %v6101_v18 = vld [vmem:[#allocation6 + $0x75c] sm:$0xf]  ;;  %v4773_v28 = vor.u32 %v6037_v16, %v4770_v17 }
 0x1dc   : > { %v6193_v44 = vld [vmem:[#allocation6 + $0xa34] sm:$0xf0]  ;;  %3204 = vmatpush.bf16.msra.mxu3 %v4389_v46  ;;  %v5026_v21 = vld [vmem:[#allocation6 + $0x778] sm:$0xf0]  ;;  %v6902_v3 = vpop.f32.mrf.mxu3 }
 0x1dd   : > { %v5377_v56 = vor.u32 %v6193_v44, %v5376_v43  ;;  %3166 = vmatpush.bf16.msra.mxu0 %v5121_v53  ;;  %v6165_v22 = vld [vmem:[#allocation6 + $0x95c] sm:$0xf]  ;;  %v5029_v29 = vor.u32 %v6101_v18, %v5026_v21  ;;  %v6896_v44 = vpop.f32.mrf.mxu0 }
 0x1de   : > { %3192 = vmatpush.bf16.msra.mxu2 %v4101_v60  ;;  %v5282_v23 = vld [vmem:[#allocation6 + $0x978] sm:$0xf0] }
 0x1df   : > { %3179 = vmatpush.bf16.msra.mxu1 %v5377_v56  ;;  %v6229_v26 = vld [vmem:[#allocation6 + $0xb5c] sm:$0xf]  ;;  %v5285_v30 = vor.u32 %v6165_v22, %v5282_v23 }
 0x1e0   : > { %3205 = vmatpush.bf16.msra.mxu3 %v4357_v63  ;;  %v5538_v27 = vld [vmem:[#allocation6 + $0xb78] sm:$0xf0]  ;;  %3167 = vmatmul.bf16.vlgmr.msra.gmra.mxu0 %v6822_v32  ;;  %v6900_v63 = vpop.f32.mrf.mxu2 }
 0x1e1   : > { %3211 = vmatpush.bf16.msrb.mxu0 %v4837_v0  ;;  %3193 = vmatmul.bf16.vlgmr.msra.gmra.mxu2 %v6808_v9  ;;  %v6029_v31 = vld [vmem:[#allocation6 + $0x51c] sm:$0xf]  ;;  %v5541_v37 = vor.u32 %v6229_v26, %v5538_v27 }
 0x1e2   : > { %3237 = vmatpush.bf16.msrb.mxu2 %v5349_v1  ;;  %3180 = vmatmul.bf16.vlgmr.msra.gmra.mxu1 %v6824_v35  ;;  %v4738_v33 = vld [vmem:[#allocation6 + $0x538] sm:$0xf0] }
 0x1e3   : > { %3224 = vmatpush.bf16.msrb.mxu1 %v5093_v24  ;;  %3206 = vmatmul.bf16.vlgmr.msra.gmra.mxu3 %v6817_v25  ;;  %v6093_v9 = vld [vmem:[#allocation6 + $0x71c] sm:$0xf]  ;;  %v4741_v25 = vor.u32 %v6029_v31, %v4738_v33 }
 0x1e4   : > { %3250 = vmatpush.bf16.msrb.mxu3 %v5605_v6  ;;  %v4994_v38 = vld [vmem:[#allocation6 + $0x738] sm:$0xf0] }
 0x1e5   : > { %3212 = vmatpush.bf16.msrb.mxu0 %v4805_v12  ;;  %v6157_v39 = vld [vmem:[#allocation6 + $0x91c] sm:$0xf]  ;;  %v4997_v59 = vor.u32 %v6093_v9, %v4994_v38  ;;  %v2962_v54 = vpop.f32.mrf.mxu0 }
 0x1e6   : > { %3238 = vmatpush.bf16.msrb.mxu2 %v5317_v14  ;;  %v5250_v40 = vld [vmem:[#allocation6 + $0x938] sm:$0xf0]  ;;  %v2975_v14 = vpop.f32.mrf.mxu1 }
 0x1e7   : > { %3225 = vmatpush.bf16.msrb.mxu1 %v5061_v13  ;;  %v6221_v41 = vld [vmem:[#allocation6 + $0xb1c] sm:$0xf]  ;;  %v5253_v45 = vor.u32 %v6157_v39, %v5250_v40  ;;  %v3001_v39 = vpop.f32.mrf.mxu3  ;;  %v6259_v14 = vld [vmem:[#allocation9 + $0x48] sm:$0xff] }
 0x1e8   : > { %3251 = vmatpush.bf16.msrb.mxu3 %v5573_v19  ;;  %v5506_v43 = vld [vmem:[#allocation6 + $0xb38] sm:$0xf0]  ;;  %v2988_v31 = vpop.f32.mrf.mxu2 }
 0x1e9   : > { %3213 = vmatpush.bf16.msrb.mxu0 %v4773_v28  ;;  %v6021_v46 = vld [vmem:[#allocation6 + $0x4dc] sm:$0xf]  ;;  %v5509_v4 = vor.u32 %v6221_v41, %v5506_v43  ;;  %v6289_v31 = vld [vmem:[#allocation9 + $0x138] sm:$0xff] }
 0x1ea   : > { %3239 = vmatpush.bf16.msrb.mxu2 %v5285_v30  ;;  %v4706_v47 = vld [vmem:[#allocation6 + $0x4f8] sm:$0xf0] }
 0x1eb   : > { %3226 = vmatpush.bf16.msrb.mxu1 %v5029_v29  ;;  %v6085_v48 = vld [vmem:[#allocation6 + $0x6dc] sm:$0xf]  ;;  %v4709_v57 = vor.u32 %v6021_v46, %v4706_v47  ;;  %v6257_v46 = vld [vmem:[#allocation9 + $0x38] sm:$0xff] }
 0x1ec   : > { %3252 = vmatpush.bf16.msrb.mxu3 %v5541_v37  ;;  %v4962_v50 = vld [vmem:[#allocation6 + $0x6f8] sm:$0xf0]  ;;  %v6265_v47 = vld [vmem:[#allocation9 + $0x78] sm:$0xff] }
 0x1ed   : > { %v6149_v51 = vld [vmem:[#allocation6 + $0x8dc] sm:$0xf]  ;;  %3214 = vmatpush.bf16.msrb.mxu0 %v4741_v25  ;;  %v4965_v58 = vor.u32 %v6085_v48, %v4962_v50  ;;  %v6273_v48 = vld [vmem:[#allocation9 + $0xb8] sm:$0xff] }
 0x1ee   : > { %v5218_v52 = vld [vmem:[#allocation6 + $0x8f8] sm:$0xf0]  ;;  %3240 = vmatpush.bf16.msrb.mxu2 %v5253_v45 }
 0x1ef   : > { %v6213_v53 = vld [vmem:[#allocation6 + $0xadc] sm:$0xf]  ;;  %3227 = vmatpush.bf16.msrb.mxu1 %v4997_v59  ;;  %v5221_v56 = vor.u32 %v6149_v51, %v5218_v52 }
 0x1f0   : > { %v5474_v55 = vld [vmem:[#allocation6 + $0xaf8] sm:$0xf0]  ;;  %3253 = vmatpush.bf16.msrb.mxu3 %v5509_v4  ;;  %v6281_v4 = vld [vmem:[#allocation9 + $0xf8] sm:$0xff] }
 0x1f1   : > { %v6013_v60 = vld [vmem:[#allocation6 + $0x49c] sm:$0xf]  ;;  %v5477_v0 = vor.u32 %v6213_v53, %v5474_v55  ;;  %3215 = vmatpush.bf16.msrb.mxu0 %v4709_v57  ;;  %v6255_v55 = vld [vmem:[#allocation9 + $0x28] sm:$0xff] }
 0x1f2   : > { %v4674_v20 = vld [vmem:[#allocation6 + $0x4b8] sm:$0xf0]  ;;  %3241 = vmatpush.bf16.msrb.mxu2 %v5221_v56  ;;  %v6263_v57 = vld [vmem:[#allocation9 + $0x68] sm:$0xff] }
 0x1f3   : > { %v6077_v62 = vld [vmem:[#allocation6 + $0x69c] sm:$0xf]  ;;  %v4677_v7 = vor.u32 %v6013_v60, %v4674_v20  ;;  %3228 = vmatpush.bf16.msrb.mxu1 %v4965_v58  ;;  %v6271_v58 = vld [vmem:[#allocation9 + $0xa8] sm:$0xff]  ;;  %v6254_v20 = vld [vmem:[#allocation9 + $0x20] sm:$0xff] }
 0x1f4   : > { %v4930_v24 = vld [vmem:[#allocation6 + $0x6b8] sm:$0xf0]  ;;  %3254 = vmatpush.bf16.msrb.mxu3 %v5477_v0  ;;  %v6279_v56 = vld [vmem:[#allocation9 + $0xe8] sm:$0xff]  ;;  %v6908_v60 = vpop.f32.mrf.mxu0  ;;  %v6261_v0 = vld [vmem:[#allocation9 + $0x58] sm:$0xff] }
 0x1f5   : > { %v6141_v1 = vld [vmem:[#allocation6 + $0x89c] sm:$0xf]  ;;  %v4933_v36 = vor.u32 %v6077_v62, %v4930_v24  ;;  %3216 = vmatpush.bf16.msrb.mxu0 %v4677_v7  ;;  %v6253_v62 = vld [vmem:[#allocation9 + $0x18] sm:$0xff] }
 0x1f6   : > { %v5186_v2 = vld [vmem:[#allocation6 + $0x8b8] sm:$0xf0]  ;;  %v6269_v24 = vld [vmem:[#allocation9 + $0x98] sm:$0xff] }
 0x1f7   : > { %v6205_v5 = vld [vmem:[#allocation6 + $0xa9c] sm:$0xf]  ;;  %v5189_v10 = vor.u32 %v6141_v1, %v5186_v2  ;;  %3229 = vmatpush.bf16.msrb.mxu1 %v4933_v36  ;;  %v6277_v1 = vld [vmem:[#allocation9 + $0xd8] sm:$0xff] }
 0x1f8   : > { %v5442_v6 = vld [vmem:[#allocation6 + $0xab8] sm:$0xf0] }
 0x1f9   : > { %v6005_v11 = vld [vmem:[#allocation6 + $0x45c] sm:$0xf]  ;;  %v5445_v16 = vor.u32 %v6205_v5, %v5442_v6  ;;  %3242 = vmatpush.bf16.msrb.mxu2 %v5189_v10 }
 0x1fa   : > { %v4642_v12 = vld [vmem:[#allocation6 + $0x478] sm:$0xf0]  ;;  %v3038_v2 = vpop.f32.mrf.mxu2 }
 0x1fb   : > { %v6069_v13 = vld [vmem:[#allocation6 + $0x65c] sm:$0xf]  ;;  %v4645_v23 = vor.u32 %v6005_v11, %v4642_v12  ;;  %3255 = vmatpush.bf16.msrb.mxu3 %v5445_v16  ;;  %v707_v12 = vperm.slane %v6879_v61, 4  ;;  %v6267_v16 = vld [vmem:[#allocation9 + $0x88] sm:$0xff] }
 0x1fc   : > { %v4898_v17 = vld [vmem:[#allocation6 + $0x678] sm:$0xf0]  ;;  %v3051_v5 = vpop.f32.mrf.mxu3  ;;  %v3014_v6 = vpop.f32.mrf.mxu0 }
 0x1fd   : > { %v6133_v18 = vld [vmem:[#allocation6 + $0x85c] sm:$0xf]  ;;  %v4901_v26 = vor.u32 %v6069_v13, %v4898_v17  ;;  %3217 = vmatpush.bf16.msrb.mxu0 %v4645_v23  ;;  %v6251_v13 = vld [vmem:[#allocation9 + $0x8] sm:$0xff]  ;;  %v3419_v23 = vunpack.c.l.b16 %v6863_v42 }
 0x1fe   : > { %v5154_v19 = vld [vmem:[#allocation6 + $0x878] sm:$0xf0]  ;;  %v6275_v17 = vld [vmem:[#allocation9 + $0xc8] sm:$0xff] }
 0x1ff   : > { %v6197_v21 = vld [vmem:[#allocation6 + $0xa5c] sm:$0xf]  ;;  %v5157_v27 = vor.u32 %v6133_v18, %v5154_v19  ;;  %3230 = vmatpush.bf16.msrb.mxu1 %v4901_v26  ;;  %v6258_v26 = vld [vmem:[#allocation9 + $0x40] sm:$0xff] }
 0x200   : > { %v5410_v22 = vld [vmem:[#allocation6 + $0xa78] sm:$0xf0] }
 0x201   : > { %v5997_v28 = vld [vmem:[#allocation6 + $0x41c] sm:$0xf]  ;;  %v5413_v33 = vor.u32 %v6197_v21, %v5410_v22  ;;  %3243 = vmatpush.bf16.msrb.mxu2 %v5157_v27  ;;  %v2961_v21 = vadd.f32 %v6896_v44, %v707_v12  ;;  %v6250_v22 = vld [vmem:[#allocation9] sm:$0xff]  ;;  %v708_v44 = vperm.slane %v6879_v61, 5  ;;  %v6287_v61 = vld [vmem:[#allocation9 + $0x128] sm:$0xff] }
 0x202   : > { %v4610_v29 = vld [vmem:[#allocation6 + $0x438] sm:$0xf0]  ;;  %v3040_v18 = vpop.f32.mrf.mxu2  ;;  %v6266_v27 = vld [vmem:[#allocation9 + $0x80] sm:$0xff] }
 0x203   : > { %v6061_v30 = vld [vmem:[#allocation6 + $0x61c] sm:$0xf]  ;;  %v4613_v43 = vor.u32 %v5997_v28, %v4610_v29  ;;  %3256 = vmatpush.bf16.msrb.mxu3 %v5413_v33  ;;  %v3420_v28 = vunpack.c.h.b16 %v6863_v42  ;;  %v3421_v29 = vunpack.c.l.b16 %v6890_v34  ;;  %v3422_v33 = vunpack.c.h.b16 %v6890_v34 }
 0x204   : > { %v4866_v9 = vld [vmem:[#allocation6 + $0x638] sm:$0xf0]  ;;  %v3053_v19 = vpop.f32.mrf.mxu3 }
 0x205   : > { %v6125_v37 = vld [vmem:[#allocation6 + $0x81c] sm:$0xf]  ;;  %v4869_v25 = vor.u32 %v6061_v30, %v4866_v9  ;;  %3218 = vmatpush.bf16.msrb.mxu0 %v4613_v43  ;;  %v6274_v30 = vld [vmem:[#allocation9 + $0xc0] sm:$0xff]  ;;  %v6297_v9 = vld [vmem:[#allocation9 + $0x178] sm:$0xff]  ;;  %v3428_v39 = vpack.c.b16 %v3420_v28, %v3420_v28  ;;  %v3039_v43 = vadd.f32 %v3038_v2, %v708_v44 }
 0x206   : > { %v5122_v38 = vld [vmem:[#allocation6 + $0x838] sm:$0xf0]  ;;  %v6311_v28 = vld [vmem:[#allocation9 + $0x1e8] sm:$0xff] }
 0x207   : > { %v6189_v40 = vld [vmem:[#allocation6 + $0xa1c] sm:$0xf]  ;;  %v5125_v59 = vor.u32 %v6125_v37, %v5122_v38  ;;  %3231 = vmatpush.bf16.msrb.mxu1 %v4869_v25  ;;  %v2974_v37 = vadd.f32 %v6898_v49, %v2961_v21  ;;  %v3427_v38 = vpack.c.b16 %v3419_v23, %v3419_v23  ;;  %v3052_v49 = vadd.f32 %v3051_v5, %v3039_v43  ;;  %v6299_v43 = vld [vmem:[#allocation9 + $0x188] sm:$0xff] }
 0x208   : > { %v5378_v41 = vld [vmem:[#allocation6 + $0xa38] sm:$0xf0]  ;;  %3219 = vmatmul.bf16.vlgmr.msrb.gmra.mxu0 %v6806_v8  ;;  %v6910_v8 = vpop.f32.mrf.mxu1 }
 0x209   : > { %v5381_v45 = vor.u32 %v6189_v40, %v5378_v41  ;;  %3244 = vmatpush.bf16.msrb.mxu2 %v5125_v59  ;;  %3827 = vmatpush.bf16.msra.mxu0 %v6257_v46  ;;  %v6256_v50 = vld [vmem:[#allocation9 + $0x30] sm:$0xff]  ;;  %v3429_v40 = vpack.c.b16 %v3421_v29, %v3421_v29  ;;  %v3430_v41 = vpack.c.b16 %v3422_v33, %v3422_v33  ;;  %v6295_v59 = vld [vmem:[#allocation9 + $0x168] sm:$0xff]  ;;  %v6286_v46 = vld [vmem:[#allocation9 + $0x120] sm:$0xff] }
 0x20a   : > { %v6264_v51 = vld [vmem:[#allocation9 + $0x70] sm:$0xff]  ;;  %3232 = vmatmul.bf16.vlgmr.msrb.gmra.mxu1 %v6811_v15  ;;  %v6262_v15 = vld [vmem:[#allocation9 + $0x60] sm:$0xff]  ;;  %v2987_v34 = vadd.f32 %v6900_v63, %v2974_v37  ;;  %v6301_v33 = vld [vmem:[#allocation9 + $0x198] sm:$0xff] }
 0x20b   : > { %3257 = vmatpush.bf16.msrb.mxu3 %v5381_v45  ;;  %3840 = vmatpush.bf16.msra.mxu1 %v6265_v47  ;;  %v6272_v52 = vld [vmem:[#allocation9 + $0xb0] sm:$0xff]  ;;  %v6302_v29 = vld [vmem:[#allocation9 + $0x1a0] sm:$0xff] }
 0x20c   : > { %v6280_v53 = vld [vmem:[#allocation9 + $0xf0] sm:$0xff]  ;;  %3245 = vmatmul.bf16.vlgmr.msrb.gmra.mxu2 %v6822_v32  ;;  %v6270_v32 = vld [vmem:[#allocation9 + $0xa0] sm:$0xff]  ;;  %v3000_v45 = vadd.f32 %v6902_v3, %v2987_v34  ;;  %v6410_v34 = vld [vmem:[#allocation8] sm:$0xff] }
 0x20d   : > { %3853 = vmatpush.bf16.msra.mxu2 %v6273_v48  ;;  %3828 = vmatpush.bf16.msra.mxu0 %v6256_v50  ;;  %v6252_v7 = vld [vmem:[#allocation9 + $0x10] sm:$0xff]  ;;  %v6294_v48 = vld [vmem:[#allocation9 + $0x160] sm:$0xff] }
 0x20e   : > { %3258 = vmatmul.bf16.vlgmr.msrb.gmra.mxu3 %v6824_v35  ;;  %v6278_v35 = vld [vmem:[#allocation9 + $0xe0] sm:$0xff]  ;;  %v6260_v36 = vld [vmem:[#allocation9 + $0x50] sm:$0xff] }
 0x20f   : > { %3866 = vmatpush.bf16.msra.mxu3 %v6281_v4  ;;  %3841 = vmatpush.bf16.msra.mxu1 %v6264_v51  ;;  %v6268_v10 = vld [vmem:[#allocation9 + $0x90] sm:$0xff]  ;;  %v3013_v51 = vadd.f32 %v6908_v60, %v3000_v45  ;;  %v6306_v45 = vld [vmem:[#allocation9 + $0x1c0] sm:$0xff] }
 0x210   : > { %v3027_v54 = vpop.f32.mrf.mxu1  ;;  %v6276_v11 = vld [vmem:[#allocation9 + $0xd0] sm:$0xff] }
 0x211   : > { %3854 = vmatpush.bf16.msra.mxu2 %v6272_v52  ;;  %3829 = vmatpush.bf16.msra.mxu0 %v6255_v55  ;;  %v6288_v42 = vld [vmem:[#allocation9 + $0x130] sm:$0xff]  ;;  %v6285_v52 = vld [vmem:[#allocation9 + $0x118] sm:$0xff]  ;;  %v6290_v54 = vld [vmem:[#allocation9 + $0x140] sm:$0xff] }
 0x212   : > { %v6296_v25 = vld [vmem:[#allocation9 + $0x170] sm:$0xff] }
 0x213   : > { %3867 = vmatpush.bf16.msra.mxu3 %v6280_v53  ;;  %3842 = vmatpush.bf16.msra.mxu1 %v6263_v57  ;;  %v6293_v53 = vld [vmem:[#allocation9 + $0x158] sm:$0xff]  ;;  %v3026_v57 = vadd.f32 %v6910_v8, %v3013_v51  ;;  %v6304_v21 = vld [vmem:[#allocation9 + $0x1b0] sm:$0xff] }
 0x215   : > { %3855 = vmatpush.bf16.msra.mxu2 %v6271_v58  ;;  %3830 = vmatpush.bf16.msra.mxu0 %v6254_v20  ;;  %v6284_v20 = vld [vmem:[#allocation9 + $0x110] sm:$0xff] }
 0x217   : > { %3868 = vmatpush.bf16.msra.mxu3 %v6279_v56  ;;  %3843 = vmatpush.bf16.msra.mxu1 %v6262_v15 }
 0x219   : > { %3856 = vmatpush.bf16.msra.mxu2 %v6270_v32  ;;  %3831 = vmatpush.bf16.msra.mxu0 %v6253_v62  ;;  %v6292_v32 = vld [vmem:[#allocation9 + $0x150] sm:$0xff]  ;;  %v3267_v62 = vmax.f32 %v3026_v57, 0.0 }
 0x21a   : > { %v3064_v47 = vpop.f32.mrf.mxu0 }
 0x21b   : > { %3869 = vmatpush.bf16.msra.mxu3 %v6278_v35  ;;  %3844 = vmatpush.bf16.msra.mxu1 %v6261_v0  ;;  %v3065_v4 = vadd.f32 %v3064_v47, %v3052_v49 }
 0x21c   : > { %v3077_v50 = vpop.f32.mrf.mxu1 }
 0x21d   : > { %3857 = vmatpush.bf16.msra.mxu2 %v6269_v24  ;;  %3832 = vmatpush.bf16.msra.mxu0 %v6252_v7  ;;  %v3078_v63 = vadd.f32 %v3077_v50, %v3065_v4  ;;  %v6283_v24 = vld [vmem:[#allocation9 + $0x108] sm:$0xff]  ;;  %v6282_v7 = vld [vmem:[#allocation9 + $0x100] sm:$0xff]  ;;  %v710_v4 = vperm.slane %v6410_v34, 7 }
 0x21f   : > { %3870 = vmatpush.bf16.msra.mxu3 %v6277_v1  ;;  %3845 = vmatpush.bf16.msra.mxu1 %v6260_v36  ;;  %v6291_v1 = vld [vmem:[#allocation9 + $0x148] sm:$0xff] }
 0x221   : > { %3858 = vmatpush.bf16.msra.mxu2 %v6268_v10  ;;  %3833 = vmatpush.bf16.msra.mxu0 %v6251_v13 }
 0x222   : > { %v3066_v15 = vpop.f32.mrf.mxu0 }
 0x223   : > { %3871 = vmatpush.bf16.msra.mxu3 %v6276_v11  ;;  %3846 = vmatpush.bf16.msra.mxu1 %v6259_v14 }
 0x224   : > { %v3090_v55 = vpop.f32.mrf.mxu2  ;;  %v3079_v35 = vpop.f32.mrf.mxu1 }
 0x225   : > { %3859 = vmatpush.bf16.msra.mxu2 %v6267_v16  ;;  %3834 = vmatpush.bf16.msra.mxu0 %v6250_v22  ;;  %v3091_v58 = vadd.f32 %v3090_v55, %v3078_v63  ;;  %v6305_v16 = vld [vmem:[#allocation9 + $0x1b8] sm:$0xff]  ;;  %v6312_v22 = vld [vmem:[#allocation9 + $0x1f0] sm:$0xff] }
 0x226   : > { %v3103_v56 = vpop.f32.mrf.mxu3 }
 0x227   : > { %3872 = vmatpush.bf16.msra.mxu3 %v6275_v17  ;;  %3847 = vmatpush.bf16.msra.mxu1 %v6258_v26  ;;  %v3104_v3 = vadd.f32 %v3103_v56, %v3091_v58  ;;  %v6313_v17 = vld [vmem:[#allocation9 + $0x1f8] sm:$0xff] }
 0x228   : > { %3835 = vmatmul.bf16.vlgmr.msra.gmra.mxu0 %v3427_v38  ;;  %v6300_v38 = vld [vmem:[#allocation9 + $0x190] sm:$0xff] }
 0x229   : > { %3860 = vmatpush.bf16.msra.mxu2 %v6266_v27  ;;  %3879 = vmatpush.bf16.msrb.mxu0 %v6289_v31  ;;  %v3268_v0 = vmax.f32 %v3104_v3, 0.0  ;;  %v6303_v27 = vld [vmem:[#allocation9 + $0x1a8] sm:$0xff] }
 0x22a   : > { %3848 = vmatmul.bf16.vlgmr.msra.gmra.mxu1 %v3428_v39  ;;  %v6308_v39 = vld [vmem:[#allocation9 + $0x1d0] sm:$0xff] }
 0x22b   : > { %3873 = vmatpush.bf16.msra.mxu3 %v6274_v30  ;;  %3892 = vmatpush.bf16.msrb.mxu1 %v6297_v9  ;;  %v3273_v60 = vpack.c.bf16 %v3268_v0, %v3267_v62  ;;  %v6310_v30 = vld [vmem:[#allocation9 + $0x1e0] sm:$0xff]  ;;  %v6309_v9 = vld [vmem:[#allocation9 + $0x1d8] sm:$0xff] }
 0x22c   : > { %3861 = vmatmul.bf16.vlgmr.msra.gmra.mxu2 %v3429_v40  ;;  %v3092_v2 = vpop.f32.mrf.mxu2 }
 0x22d   : > { %3880 = vmatpush.bf16.msrb.mxu0 %v6288_v42  ;;  %v3423_v6 = vunpack.c.l.b16 %v3273_v60  ;;  %v3424_v8 = vunpack.c.h.b16 %v3273_v60  ;;  %3905 = vmatpush.bf16.msrb.mxu2 %v6305_v16 }
 0x22e   : > { %3874 = vmatmul.bf16.vlgmr.msra.gmra.mxu3 %v3430_v41  ;;  %v3105_v5 = vpop.f32.mrf.mxu3 }
 0x22f   : > { %3893 = vmatpush.bf16.msrb.mxu1 %v6296_v25  ;;  %v3431_v36 = vpack.c.b16 %v3423_v6, %v3423_v6  ;;  %v3432_v10 = vpack.c.b16 %v3424_v8, %v3424_v8  ;;  %3918 = vmatpush.bf16.msrb.mxu3 %v6313_v17  ;;  %v6307_v25 = vld [vmem:[#allocation9 + $0x1c8] sm:$0xff] }
 0x231   : > { %3881 = vmatpush.bf16.msrb.mxu0 %v6287_v61  ;;  %3906 = vmatpush.bf16.msrb.mxu2 %v6304_v21  ;;  %v709_v61 = vperm.slane %v6410_v34, 6 }
 0x233   : > { %3894 = vmatpush.bf16.msrb.mxu1 %v6295_v59  ;;  %3919 = vmatpush.bf16.msrb.mxu3 %v6312_v22  ;;  %v6298_v59 = vld [vmem:[#allocation9 + $0x180] sm:$0xff] }
 0x235   : > { %3882 = vmatpush.bf16.msrb.mxu0 %v6286_v46  ;;  %3907 = vmatpush.bf16.msrb.mxu2 %v6303_v27 }
 0x237   : > { %3895 = vmatpush.bf16.msrb.mxu1 %v6294_v48  ;;  %3920 = vmatpush.bf16.msrb.mxu3 %v6311_v28 }
 0x239   : > { %3883 = vmatpush.bf16.msrb.mxu0 %v6285_v52  ;;  %3908 = vmatpush.bf16.msrb.mxu2 %v6302_v29 }
 0x23a   : > { %v3116_v11 = vpop.f32.mrf.mxu0 }
 0x23b   : > { %3896 = vmatpush.bf16.msrb.mxu1 %v6293_v53  ;;  %3921 = vmatpush.bf16.msrb.mxu3 %v6310_v30  ;;  %v3117_v47 = vadd.f32 %v3116_v11, %v709_v61 }
 0x23c   : > { %v3129_v12 = vpop.f32.mrf.mxu1 }
 0x23d   : > { %3884 = vmatpush.bf16.msrb.mxu0 %v6284_v20  ;;  %3909 = vmatpush.bf16.msrb.mxu2 %v6301_v33  ;;  %v3130_v48 = vadd.f32 %v3129_v12, %v3117_v47 }
 0x23f   : > { %3897 = vmatpush.bf16.msrb.mxu1 %v6292_v32  ;;  %3922 = vmatpush.bf16.msrb.mxu3 %v6309_v9 }
 0x241   : > { %3885 = vmatpush.bf16.msrb.mxu0 %v6283_v24  ;;  %3910 = vmatpush.bf16.msrb.mxu2 %v6300_v38 }
 0x242   : > { %v3118_v18 = vpop.f32.mrf.mxu0 }
 0x243   : > { %3898 = vmatpush.bf16.msrb.mxu1 %v6291_v1  ;;  %3923 = vmatpush.bf16.msrb.mxu3 %v6308_v39 }
 0x244   : > { %v3142_v13 = vpop.f32.mrf.mxu2  ;;  %v3131_v19 = vpop.f32.mrf.mxu1 }
 0x245   : > { %3886 = vmatpush.bf16.msrb.mxu0 %v6282_v7  ;;  %3911 = vmatpush.bf16.msrb.mxu2 %v6299_v43  ;;  %v3143_v50 = vadd.f32 %v3142_v13, %v3130_v48 }
 0x246   : > { %v3155_v14 = vpop.f32.mrf.mxu3 }
 0x247   : > { %3899 = vmatpush.bf16.msrb.mxu1 %v6290_v54  ;;  %3924 = vmatpush.bf16.msrb.mxu3 %v6307_v25  ;;  %v3156_v63 = vadd.f32 %v3155_v14, %v3143_v50 }
 0x248   : > { %3887 = vmatmul.bf16.vlgmr.msrb.gmra.mxu0 %v3431_v36  ;;  %v6408_v36 = vld [vmem:[#allocation11] ss:$0 sm:$0xff] }
 0x249   : > { %3912 = vmatpush.bf16.msrb.mxu2 %v6298_v59 }
 0x24a   : > { %3900 = vmatmul.bf16.vlgmr.msrb.gmra.mxu1 %v3432_v10 }
 0x24b   : > { %3925 = vmatpush.bf16.msrb.mxu3 %v6306_v45 }
 0x24c   : > { %v3144_v23 = vpop.f32.mrf.mxu2 }
 0x24e   : > { %v3157_v26 = vpop.f32.mrf.mxu3 }
 0x25d   : > { %v3168_v31 = vpop.f32.mrf.mxu0 }
 0x25e   : > { %v3169_v58 = vadd.f32 %v3168_v31, %v3156_v63 }
 0x25f   : > { %v3181_v44 = vpop.f32.mrf.mxu1 }
 0x260   : > { %v3182_v20 = vadd.f32 %v3181_v44, %v3169_v58 }
 0x262   : > { %v3269_v60 = vmax.f32 %v3182_v20, 0.0 }
 0x264   : > { %v3194_v37 = vpop.f32.mrf.mxu2 }
 0x265   : > { %v3170_v42 = vpop.f32.mrf.mxu0  ;;  %v3195_v51 = vadd.f32 %v3194_v37, %v710_v4 }
 0x266   : > { %v3207_v40 = vpop.f32.mrf.mxu3 }
 0x267   : > { %v3183_v41 = vpop.f32.mrf.mxu1  ;;  %v3208_v52 = vadd.f32 %v3207_v40, %v3195_v51 }
 0x26c   : > { %v3196_v49 = vpop.f32.mrf.mxu2 }
 0x26e   : > { %v3209_v46 = vpop.f32.mrf.mxu3 }
 0x285   : > { %v3220_v53 = vpop.f32.mrf.mxu0 }
 0x286   : > { %v3221_v57 = vadd.f32 %v3220_v53, %v3208_v52 }
 0x287   : > { %v3233_v55 = vpop.f32.mrf.mxu1 }
 0x288   : > { %v3234_v56 = vadd.f32 %v3233_v55, %v3221_v57 }
 0x28d   : > { %v3222_v35 = vpop.f32.mrf.mxu0 }
 0x28f   : > { %v3246_v3 = vpop.f32.mrf.mxu2  ;;  %v3235_v62 = vpop.f32.mrf.mxu1 }
 0x290   : > { %v3247_v15 = vadd.f32 %v3246_v3, %v3234_v56 }
 0x291   : > { %v3259_v32 = vpop.f32.mrf.mxu3 }
 0x292   : > { %v3260_v0 = vadd.f32 %v3259_v32, %v3247_v15 }
 0x294   : > { %v3270_v24 = vmax.f32 %v3260_v0, 0.0 }
 0x296   : > { %v3274_v1 = vpack.c.bf16 %v3270_v24, %v3269_v60 }
 0x297   : > { %v3248_v2 = vpop.f32.mrf.mxu2 }
 0x298   : > { %v3425_v5 = vunpack.c.l.b16 %v3274_v1  ;;  %v3426_v6 = vunpack.c.h.b16 %v3274_v1 }
 0x299   : > { %v3261_v8 = vpop.f32.mrf.mxu3 }
 0x29a   : > { %v3433_v7 = vpack.c.b16 %v3425_v5, %v3425_v5  ;;  %v3434_v54 = vpack.c.b16 %v3426_v6, %v3426_v6 }
 0x29c   : > { %3913 = vmatmul.bf16.vlgmr.msrb.gmra.mxu2 %v3433_v7  ;;  %3926 = vmatmul.bf16.vlgmr.msrb.gmra.mxu3 %v3434_v54 }
 0x2a5   : > { %v3836_v10 = vpop.f32.mrf.mxu0 }
 0x2a6   : > { %v3837_v11 = vadd.f32 %v6408_v36, %v3836_v10 }
 0x2a7   : > { %v3849_v12 = vpop.f32.mrf.mxu1 }
 0x2a8   : > { %v3850_v13 = vadd.f32 %v3849_v12, %v3837_v11 }
 0x2ad   : > { %v3838_v18 = vpop.f32.mrf.mxu0 }
 0x2af   : > { %v3862_v14 = vpop.f32.mrf.mxu2  ;;  %v3851_v19 = vpop.f32.mrf.mxu1 }
 0x2b0   : > { %v3863_v16 = vadd.f32 %v3862_v14, %v3850_v13 }
 0x2b1   : > { %v3875_v17 = vpop.f32.mrf.mxu3 }
 0x2b2   : > { %v3876_v21 = vadd.f32 %v3875_v17, %v3863_v16 }
 0x2b7   : > { %v3864_v22 = vpop.f32.mrf.mxu2 }
 0x2b9   : > { %v3877_v23 = vpop.f32.mrf.mxu3 }
 0x2c5   : > { %v3888_v26 = vpop.f32.mrf.mxu0 }
 0x2c6   : > { %v3889_v27 = vadd.f32 %v3888_v26, %v3876_v21 }
 0x2c7   : > { %v3901_v28 = vpop.f32.mrf.mxu1 }
 0x2c8   : > { %v3902_v29 = vadd.f32 %v3901_v28, %v3889_v27 }
 0x2cd   : > { %v3890_v30 = vpop.f32.mrf.mxu0 }
 0x2cf   : > { %v3903_v31 = vpop.f32.mrf.mxu1 }
 0x31f   : > { %v3914_v33 = vpop.f32.mrf.mxu2  ;;  %v3927_v9 = vpop.f32.mrf.mxu3 }
 0x320   : > { %v3915_v44 = vadd.f32 %v3914_v33, %v3902_v29 }
 0x322   : > { %v3928_v37 = vadd.f32 %v3927_v9, %v3915_v44 }
 0x324   : > { %3931 = vst [vmem:[%s304_s28] sm:$0xff] %v3928_v37 }
 0x325   : > { %6588 = shalt.err (!%p6585_p8)
}
 0x326   : > { %6335 = dma.vmem_to_hbm [thread:$0]  (%p6757_p2), %s3946_s29, 128, %s3948_s30, %s3933_s8  }
 0x327   : > { %v3916_v38 = vpop.f32.mrf.mxu2  ;;  %v3929_v39 = vpop.f32.mrf.mxu3 }
 0x328 PF: > { %p6367_p9 = scmp.ge.s32.totalorder %s6635_s21, 2  ;;  %s3959_s7 = sand.u32 1, %s6623_s18  }
 0x329   : > { %s3960_s23 = scalar_lea.sflag [#allocation5], %s3959_s7 }
 0x32a   : > { %p6355_p10 = pnand %p6367_p9, %p6761_p4 }
 0x32c   : > { %p6356_p12 = pneg %p6355_p10 }
 0x32e   : > { %6618 = dma.done.wait (%p6356_p12), %s3960_s23, 128  }
 0x32f   : > { %6620 = vsyncadd (%p6356_p12), %s3960_s23, 4294967168  ;;  %p20_p2 = scmp.ge.s32.totalorder %s6735_s6, 7   ;;  %s6971_s18 = smov %s6627_s19 }
 0x330   : > { %s6972_s19 = smov %s6631_s20  ;;  %s6973_s20 = smov %s6746_s10 }
 0x331   : > { %s6974_s21 = smov %s6735_s6  ;;  %22 = sbr.rel (!%p20_p2) target bundleno = 9 (0x9), region = 101 }
 0x336   :  { %3966 = vsyncpa [#allocation4], 1 }
 0x337   :  { %3968 = vsyncpa [#allocation4 + $0x1], 1 }
 0x338   :  { %3969 = vsyncpa [#allocation7], 1 }
 0x339   :  { %3970 = vsyncpa [#allocation10], 1 }
 0x33a   :  { %3971 = vsyncpa [#allocation5], 1 }
 0x33b   :  { %3973 = vsyncpa [#allocation5 + $0x1], 1 }

</bundles_post_ra>
